<compile_context>
chip_gen: v7x
topology: tpu7x:2x2x1
jax: 0.10.0
libtpu: 0.0.40
codegen_flags: <defaults>
</compile_context>

<pallas_src>
import functools

import jax
import jax.numpy as jnp
from jax import lax
from jax.experimental import pallas as pl
from jax.experimental.pallas import tpu as pltpu


# ------------------------------ Pallas kernel ------------------------------ #

def _downsampling_kernel(xs_ref, w1_ref, b1_ref, w2_ref, b2_ref, o_ref, hp_ref,
                         *, negative_slope):
    # xs_ref: (1, 2, 2, P, Q, Cin) f32  parity-split zero-padded input:
    #         xs[0, pr, pc, u, v, :] == x_pad[2u + pr, 2v + pc, :]
    # w1_ref: (9, Cin, C1) bf16   b1_ref: (1, C1) f32
    # w2_ref: (9, C1, C2) bf16   b2_ref: (1, C2) f32
    # o_ref : (1, C2, Ho*Wo)      final output (channel-major)
    # hp_ref: (2, 2, P, Q, C1) f32 VMEM scratch, parity-split padded conv1 out
    P, Q, Cin = xs_ref.shape[3], xs_ref.shape[4], xs_ref.shape[5]
    C1 = w1_ref.shape[2]
    C2 = w2_ref.shape[2]
    Hh, Wh = P - 1, Q - 1            # = H/2, W/2 (also conv2 output size)
    HWq = Hh * Wh

    # Zero once per grid step so the padding ring of hp stays zero.
    hp_ref[...] = jnp.zeros_like(hp_ref)

    b1 = b1_ref[...]                 # (1, C1)
    b2 = b2_ref[...]                 # (1, C2)

    # ---- conv1 (3x3, stride 1, pad 1) + bias + LeakyReLU -------------------
    # One output-parity class (py, px) at a time; each tap is a contiguous
    # (Hh, Wh, Cin) slice of the parity-split input.
    for py in range(2):
        for px in range(2):
            acc = jnp.zeros((HWq, C1), jnp.float32)
            for ky in range(3):
                for kx in range(3):
                    s, t = py + ky, px + kx
                    xs = xs_ref[0, s % 2, t % 2,
                                s // 2: s // 2 + Hh,
                                t // 2: t // 2 + Wh, :]          # (Hh, Wh, Cin)
                    xs = xs.reshape(HWq, Cin).astype(jnp.bfloat16)
                    acc = acc + jnp.dot(xs, w1_ref[3 * ky + kx],
                                        preferred_element_type=jnp.float32)
            acc = acc + b1
            acc = jnp.where(acc >= 0, acc, negative_slope * acc)  # LeakyReLU
            # h parity class (py, px) sits at padded-coordinate parity
            # (1 - py, 1 - px) with a (py, px) offset inside that plane.
            hp_ref[1 - py, 1 - px, py: py + Hh, px: px + Wh, :] = (
                acc.reshape(Hh, Wh, C1))

    # ---- conv2 (3x3, stride 2, pad 1) + bias -------------------------------
    acc2 = jnp.zeros((HWq, C2), jnp.float32)
    for ky in range(3):
        for kx in range(3):
            hb = hp_ref[ky % 2, kx % 2,
                        ky // 2: ky // 2 + Hh,
                        kx // 2: kx // 2 + Wh, :]                # (Hh, Wh, C1)
            hb = hb.reshape(HWq, C1).astype(jnp.bfloat16)
            acc2 = acc2 + jnp.dot(hb, w2_ref[3 * ky + kx],
                                  preferred_element_type=jnp.float32)
    acc2 = acc2 + b2

    # Channel-major store so the wrapper's reshape to NCHW is free.
    o_ref[0] = acc2.T.astype(o_ref.dtype)                        # (C2, HWq)


# ------------------------------ JAX wrapper -------------------------------- #

def downsampling_block(x_nchw, params):
    """Forward pass of Conv2d(s1,p1) -> LeakyReLU -> Conv2d(s2,p1), NCHW I/O."""
    N, Cin, H, W = x_nchw.shape
    C1 = params["w1"].shape[0]
    C2 = params["w2"].shape[0]
    assert H % 2 == 0 and W % 2 == 0, "spatial dims must be even for stride 2"
    Hh, Wh = H // 2, W // 2
    P, Q = Hh + 1, Wh + 1

    # NCHW -> zero-padded NHWC -> parity-split (N, 2, 2, P, Q, Cin).  XLA fuses
    # this into a single layout pass over x (replaces the plain NCHW->NHWC
    # transpose of the unfused version).
    x_nhwc = jnp.transpose(x_nchw, (0, 2, 3, 1))
    x_pad = jnp.pad(x_nhwc, ((0, 0), (1, 1), (1, 1), (0, 0)))
    x_split = x_pad.reshape(N, P, 2, Q, 2, Cin).transpose(0, 2, 4, 1, 3, 5)

    # Weights to (tap, Cin, Cout) in bf16 (MXU-native); biases stay f32.
    w1 = jnp.transpose(params["w1"], (2, 3, 1, 0)).reshape(9, Cin, C1)
    w1 = w1.astype(jnp.bfloat16)
    w2 = jnp.transpose(params["w2"], (2, 3, 1, 0)).reshape(9, C1, C2)
    w2 = w2.astype(jnp.bfloat16)
    b1 = params["b1"].reshape(1, C1).astype(jnp.float32)
    b2 = params["b2"].reshape(1, C2).astype(jnp.float32)

    flops = 2 * N * (H * W * 9 * Cin * C1 + Hh * Wh * 9 * C1 * C2)
    bytes_accessed = (x_split.size * 4 + w1.size * 2 + w2.size * 2
                      + (C1 + C2) * 4 + N * C2 * Hh * Wh * 4)

    out = pl.pallas_call(
        functools.partial(_downsampling_kernel, negative_slope=0.01),
        out_shape=jax.ShapeDtypeStruct((N, C2, Hh * Wh), x_nchw.dtype),
        grid=(N,),
        in_specs=[
            pl.BlockSpec((1, 2, 2, P, Q, Cin), lambda n: (n, 0, 0, 0, 0, 0)),
            pl.BlockSpec((9, Cin, C1), lambda n: (0, 0, 0)),
            pl.BlockSpec((1, C1), lambda n: (0, 0)),
            pl.BlockSpec((9, C1, C2), lambda n: (0, 0, 0)),
            pl.BlockSpec((1, C2), lambda n: (0, 0)),
        ],
        out_specs=pl.BlockSpec((1, C2, Hh * Wh), lambda n: (n, 0, 0)),
        scratch_shapes=[pltpu.VMEM((2, 2, P, Q, C1), jnp.float32)],
        compiler_params=pltpu.CompilerParams(
            dimension_semantics=("parallel",),
            vmem_limit_bytes=64 * 1024 * 1024),
        cost_estimate=pl.CostEstimate(
            flops=flops, transcendentals=0, bytes_accessed=bytes_accessed),
    )(x_split, w1, b1, w2, b2)

    # (N, C2, Hh*Wh) -> (N, C2, Hh, Wh): pure reshape, already NCHW.
    return out.reshape(N, C2, Hh, Wh)


# ---------------------------- reference (checks) --------------------------- #

def _conv_ref(x_nhwc, w_oihw, b, stride):
    out = lax.conv_general_dilated(
        x_nhwc, jnp.transpose(w_oihw, (2, 3, 1, 0)),
        window_strides=(stride, stride), padding=((1, 1), (1, 1)),
        dimension_numbers=("NHWC", "HWIO", "NHWC"))
    return out + b.reshape(1, 1, 1, -1)


def downsampling_block_ref(x_nchw, params):
    x = jnp.transpose(x_nchw, (0, 2, 3, 1))
    h = _conv_ref(x, params["w1"], params["b1"], 1)
    h = jnp.where(h >= 0, h, 0.01 * h)
    y = _conv_ref(h, params["w2"], params["b2"], 2)
    return jnp.transpose(y, (0, 3, 1, 2))


# --------------------------------- main ------------------------------------ #

if __name__ == "__main__":
    in_c, out_c = 16, 32
    N, H, W = 2, 16, 16

    key = jax.random.PRNGKey(0)
    k_x, k_w1, k_b1, k_w2, k_b2 = jax.random.split(key, 5)

    x = jax.random.normal(k_x, (N, in_c, H, W), dtype=jnp.float32)  # NCHW

    fan1 = in_c * 9
    fan2 = out_c * 9
    params = {
        "w1": jax.random.uniform(k_w1, (out_c, in_c, 3, 3), jnp.float32,
                                 -1.0 / jnp.sqrt(fan1), 1.0 / jnp.sqrt(fan1)),
        "b1": jax.random.uniform(k_b1, (out_c,), jnp.float32,
                                 -1.0 / jnp.sqrt(fan1), 1.0 / jnp.sqrt(fan1)),
        "w2": jax.random.uniform(k_w2, (out_c, out_c, 3, 3), jnp.float32,
                                 -1.0 / jnp.sqrt(fan2), 1.0 / jnp.sqrt(fan2)),
        "b2": jax.random.uniform(k_b2, (out_c,), jnp.float32,
                                 -1.0 / jnp.sqrt(fan2), 1.0 / jnp.sqrt(fan2)),
    }

    fwd = jax.jit(downsampling_block)
    out = jax.block_until_ready(fwd(x, params))
    assert out.shape == (N, out_c, H // 2, W // 2), out.shape

    ref = jax.block_until_ready(downsampling_block_ref(x, params))
    # bf16 MXU inputs (f32 accumulation) -> relaxed tolerance vs. f32 reference.
    assert jnp.allclose(out, ref, atol=2e-2, rtol=2e-2), \
        float(jnp.max(jnp.abs(out - ref)))

    print("KERNEL_OK")
</pallas_src>

<mosaic_0001>
module attributes {stable_mosaic.version = 11 : i64} {
  func.func @_downsampling_kernel(%arg0: i32, %arg1: memref<1x2x2x9x9x16xf32, #tpu.memory_space<vmem>>, %arg2: memref<9x16x32xbf16, #tpu.memory_space<vmem>>, %arg3: memref<1x32xf32, #tpu.memory_space<vmem>>, %arg4: memref<9x32x32xbf16, #tpu.memory_space<vmem>>, %arg5: memref<1x32xf32, #tpu.memory_space<vmem>>, %arg6: memref<1x32x64xf32, #tpu.memory_space<vmem>>, %arg7: memref<2x2x9x9x32xf32, #tpu.memory_space<vmem>>) attributes {dimension_semantics = [#tpu.dimension_semantics<parallel>], iteration_bounds = array<i64: 2>, scalar_prefetch = 0 : i64, scratch_operands = 1 : i64, tpu.core_type = #tpu.core_type<tc>, window_params = [{transform_indices = @transform_0, window_bounds = array<i64: 1, 2, 2, 9, 9, 16>}, {pipeline_mode = #tpu.pipeline_mode<synchronous>, transform_indices = @transform_1, window_bounds = array<i64: 9, 16, 32>}, {pipeline_mode = #tpu.pipeline_mode<synchronous>, transform_indices = @transform_2, window_bounds = array<i64: 1, 32>}, {pipeline_mode = #tpu.pipeline_mode<synchronous>, transform_indices = @transform_3, window_bounds = array<i64: 9, 32, 32>}, {pipeline_mode = #tpu.pipeline_mode<synchronous>, transform_indices = @transform_4, window_bounds = array<i64: 1, 32>}, {transform_indices = @transform_5, window_bounds = array<i64: 1, 32, 64>}]} {
    %cst = arith.constant 0.000000e+00 : f32
    %0 = vector.broadcast %cst : f32 to vector<2x2x9x9x32xf32>
    %c0 = arith.constant 0 : index
    %c0_0 = arith.constant 0 : index
    %c0_1 = arith.constant 0 : index
    %c0_2 = arith.constant 0 : index
    %c0_3 = arith.constant 0 : index
    %1 = vector.load %arg7[%c0, %c0_0, %c0_1, %c0_2, %c0_3] : memref<2x2x9x9x32xf32, #tpu.memory_space<vmem>>, vector<2x2x9x9x32xf32>
    tpu.vector_store %arg7[%c0, %c0_0, %c0_1, %c0_2, %c0_3], %0 {strides = array<i32>} : memref<2x2x9x9x32xf32, #tpu.memory_space<vmem>>, vector<2x2x9x9x32xf32>,
    %c0_4 = arith.constant 0 : index
    %c0_5 = arith.constant 0 : index
    %2 = vector.load %arg3[%c0_4, %c0_5] : memref<1x32xf32, #tpu.memory_space<vmem>>, vector<1x32xf32>
    %c0_6 = arith.constant 0 : index
    %c0_7 = arith.constant 0 : index
    %3 = vector.load %arg5[%c0_6, %c0_7] : memref<1x32xf32, #tpu.memory_space<vmem>>, vector<1x32xf32>
    %cst_8 = arith.constant 0.000000e+00 : f32
    %4 = vector.broadcast %cst_8 : f32 to vector<64x32xf32>
    %c0_9 = arith.constant 0 : index
    %c0_10 = arith.constant 0 : index
    %c0_11 = arith.constant 0 : index
    %c0_12 = arith.constant 0 : index
    %c0_13 = arith.constant 0 : index
    %c0_14 = arith.constant 0 : index
    %5 = vector.load %arg1[%c0_9, %c0_10, %c0_11, %c0_12, %c0_13, %c0_14] : memref<1x2x2x9x9x16xf32, #tpu.memory_space<vmem>>, vector<1x1x1x8x8x16xf32>
    %6 = vector.shape_cast %5 : vector<1x1x1x8x8x16xf32> to vector<8x8x16xf32>
    %7 = vector.shape_cast %6 : vector<8x8x16xf32> to vector<64x16xf32>
    %8 = arith.truncf %7 : vector<64x16xf32> to vector<64x16xbf16>
    %c0_15 = arith.constant 0 : index
    %c0_16 = arith.constant 0 : index
    %c0_17 = arith.constant 0 : index
    %9 = vector.load %arg2[%c0_15, %c0_16, %c0_17] : memref<9x16x32xbf16, #tpu.memory_space<vmem>>, vector<1x16x32xbf16>
    %10 = vector.shape_cast %9 : vector<1x16x32xbf16> to vector<16x32xbf16>
    %cst_18 = arith.constant dense<0.000000e+00> : vector<64x32xf32>
    %11 = tpu.matmul %8, %10, %cst_18 {dimension_numbers = #tpu.dot_dimension_numbers<[1], [0], [0], [1], [0, 0, 1, 1], [], []>} : vector<64x16xbf16>, vector<16x32xbf16>, vector<64x32xf32> -> vector<64x32xf32>
    %12 = arith.addf %4, %11 : vector<64x32xf32>
    %c0_19 = arith.constant 0 : index
    %c0_20 = arith.constant 0 : index
    %c1 = arith.constant 1 : index
    %c0_21 = arith.constant 0 : index
    %c0_22 = arith.constant 0 : index
    %c0_23 = arith.constant 0 : index
    %13 = vector.load %arg1[%c0_19, %c0_20, %c1, %c0_21, %c0_22, %c0_23] : memref<1x2x2x9x9x16xf32, #tpu.memory_space<vmem>>, vector<1x1x1x8x8x16xf32>
    %14 = vector.shape_cast %13 : vector<1x1x1x8x8x16xf32> to vector<8x8x16xf32>
    %15 = vector.shape_cast %14 : vector<8x8x16xf32> to vector<64x16xf32>
    %16 = arith.truncf %15 : vector<64x16xf32> to vector<64x16xbf16>
    %c1_24 = arith.constant 1 : index
    %c0_25 = arith.constant 0 : index
    %c0_26 = arith.constant 0 : index
    %17 = vector.load %arg2[%c1_24, %c0_25, %c0_26] : memref<9x16x32xbf16, #tpu.memory_space<vmem>>, vector<1x16x32xbf16>
    %18 = vector.shape_cast %17 : vector<1x16x32xbf16> to vector<16x32xbf16>
    %cst_27 = arith.constant dense<0.000000e+00> : vector<64x32xf32>
    %19 = tpu.matmul %16, %18, %cst_27 {dimension_numbers = #tpu.dot_dimension_numbers<[1], [0], [0], [1], [0, 0, 1, 1], [], []>} : vector<64x16xbf16>, vector<16x32xbf16>, vector<64x32xf32> -> vector<64x32xf32>
    %20 = arith.addf %12, %19 : vector<64x32xf32>
    %c0_28 = arith.constant 0 : index
    %c0_29 = arith.constant 0 : index
    %c0_30 = arith.constant 0 : index
    %c0_31 = arith.constant 0 : index
    %c1_32 = arith.constant 1 : index
    %c0_33 = arith.constant 0 : index
    %21 = vector.load %arg1[%c0_28, %c0_29, %c0_30, %c0_31, %c1_32, %c0_33] : memref<1x2x2x9x9x16xf32, #tpu.memory_space<vmem>>, vector<1x1x1x8x8x16xf32>
    %22 = vector.shape_cast %21 : vector<1x1x1x8x8x16xf32> to vector<8x8x16xf32>
    %23 = vector.shape_cast %22 : vector<8x8x16xf32> to vector<64x16xf32>
    %24 = arith.truncf %23 : vector<64x16xf32> to vector<64x16xbf16>
    %c2 = arith.constant 2 : index
    %c0_34 = arith.constant 0 : index
    %c0_35 = arith.constant 0 : index
    %25 = vector.load %arg2[%c2, %c0_34, %c0_35] : memref<9x16x32xbf16, #tpu.memory_space<vmem>>, vector<1x16x32xbf16>
    %26 = vector.shape_cast %25 : vector<1x16x32xbf16> to vector<16x32xbf16>
    %cst_36 = arith.constant dense<0.000000e+00> : vector<64x32xf32>
    %27 = tpu.matmul %24, %26, %cst_36 {dimension_numbers = #tpu.dot_dimension_numbers<[1], [0], [0], [1], [0, 0, 1, 1], [], []>} : vector<64x16xbf16>, vector<16x32xbf16>, vector<64x32xf32> -> vector<64x32xf32>
    %28 = arith.addf %20, %27 : vector<64x32xf32>
    %c0_37 = arith.constant 0 : index
    %c1_38 = arith.constant 1 : index
    %c0_39 = arith.constant 0 : index
    %c0_40 = arith.constant 0 : index
    %c0_41 = arith.constant 0 : index
    %c0_42 = arith.constant 0 : index
    %29 = vector.load %arg1[%c0_37, %c1_38, %c0_39, %c0_40, %c0_41, %c0_42] : memref<1x2x2x9x9x16xf32, #tpu.memory_space<vmem>>, vector<1x1x1x8x8x16xf32>
    %30 = vector.shape_cast %29 : vector<1x1x1x8x8x16xf32> to vector<8x8x16xf32>
    %31 = vector.shape_cast %30 : vector<8x8x16xf32> to vector<64x16xf32>
    %32 = arith.truncf %31 : vector<64x16xf32> to vector<64x16xbf16>
    %c3 = arith.constant 3 : index
    %c0_43 = arith.constant 0 : index
    %c0_44 = arith.constant 0 : index
    %33 = vector.load %arg2[%c3, %c0_43, %c0_44] : memref<9x16x32xbf16, #tpu.memory_space<vmem>>, vector<1x16x32xbf16>
    %34 = vector.shape_cast %33 : vector<1x16x32xbf16> to vector<16x32xbf16>
    %cst_45 = arith.constant dense<0.000000e+00> : vector<64x32xf32>
    %35 = tpu.matmul %32, %34, %cst_45 {dimension_numbers = #tpu.dot_dimension_numbers<[1], [0], [0], [1], [0, 0, 1, 1], [], []>} : vector<64x16xbf16>, vector<16x32xbf16>, vector<64x32xf32> -> vector<64x32xf32>
    %36 = arith.addf %28, %35 : vector<64x32xf32>
    %c0_46 = arith.constant 0 : index
    %c1_47 = arith.constant 1 : index
    %c1_48 = arith.constant 1 : index
    %c0_49 = arith.constant 0 : index
    %c0_50 = arith.constant 0 : index
    %c0_51 = arith.constant 0 : index
    %37 = vector.load %arg1[%c0_46, %c1_47, %c1_48, %c0_49, %c0_50, %c0_51] : memref<1x2x2x9x9x16xf32, #tpu.memory_space<vmem>>, vector<1x1x1x8x8x16xf32>
    %38 = vector.shape_cast %37 : vector<1x1x1x8x8x16xf32> to vector<8x8x16xf32>
    %39 = vector.shape_cast %38 : vector<8x8x16xf32> to vector<64x16xf32>
    %40 = arith.truncf %39 : vector<64x16xf32> to vector<64x16xbf16>
    %c4 = arith.constant 4 : index
    %c0_52 = arith.constant 0 : index
    %c0_53 = arith.constant 0 : index
    %41 = vector.load %arg2[%c4, %c0_52, %c0_53] : memref<9x16x32xbf16, #tpu.memory_space<vmem>>, vector<1x16x32xbf16>
    %42 = vector.shape_cast %41 : vector<1x16x32xbf16> to vector<16x32xbf16>
    %cst_54 = arith.constant dense<0.000000e+00> : vector<64x32xf32>
    %43 = tpu.matmul %40, %42, %cst_54 {dimension_numbers = #tpu.dot_dimension_numbers<[1], [0], [0], [1], [0, 0, 1, 1], [], []>} : vector<64x16xbf16>, vector<16x32xbf16>, vector<64x32xf32> -> vector<64x32xf32>
    %44 = arith.addf %36, %43 : vector<64x32xf32>
    %c0_55 = arith.constant 0 : index
    %c1_56 = arith.constant 1 : index
    %c0_57 = arith.constant 0 : index
    %c0_58 = arith.constant 0 : index
    %c1_59 = arith.constant 1 : index
    %c0_60 = arith.constant 0 : index
    %45 = vector.load %arg1[%c0_55, %c1_56, %c0_57, %c0_58, %c1_59, %c0_60] : memref<1x2x2x9x9x16xf32, #tpu.memory_space<vmem>>, vector<1x1x1x8x8x16xf32>
    %46 = vector.shape_cast %45 : vector<1x1x1x8x8x16xf32> to vector<8x8x16xf32>
    %47 = vector.shape_cast %46 : vector<8x8x16xf32> to vector<64x16xf32>
    %48 = arith.truncf %47 : vector<64x16xf32> to vector<64x16xbf16>
    %c5 = arith.constant 5 : index
    %c0_61 = arith.constant 0 : index
    %c0_62 = arith.constant 0 : index
    %49 = vector.load %arg2[%c5, %c0_61, %c0_62] : memref<9x16x32xbf16, #tpu.memory_space<vmem>>, vector<1x16x32xbf16>
    %50 = vector.shape_cast %49 : vector<1x16x32xbf16> to vector<16x32xbf16>
    %cst_63 = arith.constant dense<0.000000e+00> : vector<64x32xf32>
    %51 = tpu.matmul %48, %50, %cst_63 {dimension_numbers = #tpu.dot_dimension_numbers<[1], [0], [0], [1], [0, 0, 1, 1], [], []>} : vector<64x16xbf16>, vector<16x32xbf16>, vector<64x32xf32> -> vector<64x32xf32>
    %52 = arith.addf %44, %51 : vector<64x32xf32>
    %c0_64 = arith.constant 0 : index
    %c0_65 = arith.constant 0 : index
    %c0_66 = arith.constant 0 : index
    %c1_67 = arith.constant 1 : index
    %c0_68 = arith.constant 0 : index
    %c0_69 = arith.constant 0 : index
    %53 = vector.load %arg1[%c0_64, %c0_65, %c0_66, %c1_67, %c0_68, %c0_69] : memref<1x2x2x9x9x16xf32, #tpu.memory_space<vmem>>, vector<1x1x1x8x8x16xf32>
    %54 = vector.shape_cast %53 : vector<1x1x1x8x8x16xf32> to vector<8x8x16xf32>
    %55 = vector.shape_cast %54 : vector<8x8x16xf32> to vector<64x16xf32>
    %56 = arith.truncf %55 : vector<64x16xf32> to vector<64x16xbf16>
    %c6 = arith.constant 6 : index
    %c0_70 = arith.constant 0 : index
    %c0_71 = arith.constant 0 : index
    %57 = vector.load %arg2[%c6, %c0_70, %c0_71] : memref<9x16x32xbf16, #tpu.memory_space<vmem>>, vector<1x16x32xbf16>
    %58 = vector.shape_cast %57 : vector<1x16x32xbf16> to vector<16x32xbf16>
    %cst_72 = arith.constant dense<0.000000e+00> : vector<64x32xf32>
    %59 = tpu.matmul %56, %58, %cst_72 {dimension_numbers = #tpu.dot_dimension_numbers<[1], [0], [0], [1], [0, 0, 1, 1], [], []>} : vector<64x16xbf16>, vector<16x32xbf16>, vector<64x32xf32> -> vector<64x32xf32>
    %60 = arith.addf %52, %59 : vector<64x32xf32>
    %c0_73 = arith.constant 0 : index
    %c0_74 = arith.constant 0 : index
    %c1_75 = arith.constant 1 : index
    %c1_76 = arith.constant 1 : index
    %c0_77 = arith.constant 0 : index
    %c0_78 = arith.constant 0 : index
    %61 = vector.load %arg1[%c0_73, %c0_74, %c1_75, %c1_76, %c0_77, %c0_78] : memref<1x2x2x9x9x16xf32, #tpu.memory_space<vmem>>, vector<1x1x1x8x8x16xf32>
    %62 = vector.shape_cast %61 : vector<1x1x1x8x8x16xf32> to vector<8x8x16xf32>
    %63 = vector.shape_cast %62 : vector<8x8x16xf32> to vector<64x16xf32>
    %64 = arith.truncf %63 : vector<64x16xf32> to vector<64x16xbf16>
    %c7 = arith.constant 7 : index
    %c0_79 = arith.constant 0 : index
    %c0_80 = arith.constant 0 : index
    %65 = vector.load %arg2[%c7, %c0_79, %c0_80] : memref<9x16x32xbf16, #tpu.memory_space<vmem>>, vector<1x16x32xbf16>
    %66 = vector.shape_cast %65 : vector<1x16x32xbf16> to vector<16x32xbf16>
    %cst_81 = arith.constant dense<0.000000e+00> : vector<64x32xf32>
    %67 = tpu.matmul %64, %66, %cst_81 {dimension_numbers = #tpu.dot_dimension_numbers<[1], [0], [0], [1], [0, 0, 1, 1], [], []>} : vector<64x16xbf16>, vector<16x32xbf16>, vector<64x32xf32> -> vector<64x32xf32>
    %68 = arith.addf %60, %67 : vector<64x32xf32>
    %c0_82 = arith.constant 0 : index
    %c0_83 = arith.constant 0 : index
    %c0_84 = arith.constant 0 : index
    %c1_85 = arith.constant 1 : index
    %c1_86 = arith.constant 1 : index
    %c0_87 = arith.constant 0 : index
    %69 = vector.load %arg1[%c0_82, %c0_83, %c0_84, %c1_85, %c1_86, %c0_87] : memref<1x2x2x9x9x16xf32, #tpu.memory_space<vmem>>, vector<1x1x1x8x8x16xf32>
    %70 = vector.shape_cast %69 : vector<1x1x1x8x8x16xf32> to vector<8x8x16xf32>
    %71 = vector.shape_cast %70 : vector<8x8x16xf32> to vector<64x16xf32>
    %72 = arith.truncf %71 : vector<64x16xf32> to vector<64x16xbf16>
    %c8 = arith.constant 8 : index
    %c0_88 = arith.constant 0 : index
    %c0_89 = arith.constant 0 : index
    %73 = vector.load %arg2[%c8, %c0_88, %c0_89] : memref<9x16x32xbf16, #tpu.memory_space<vmem>>, vector<1x16x32xbf16>
    %74 = vector.shape_cast %73 : vector<1x16x32xbf16> to vector<16x32xbf16>
    %cst_90 = arith.constant dense<0.000000e+00> : vector<64x32xf32>
    %75 = tpu.matmul %72, %74, %cst_90 {dimension_numbers = #tpu.dot_dimension_numbers<[1], [0], [0], [1], [0, 0, 1, 1], [], []>} : vector<64x16xbf16>, vector<16x32xbf16>, vector<64x32xf32> -> vector<64x32xf32>
    %76 = arith.addf %68, %75 : vector<64x32xf32>
    %77 = vector.broadcast %2 : vector<1x32xf32> to vector<64x32xf32>
    %78 = arith.addf %76, %77 : vector<64x32xf32>
    %cst_91 = arith.constant 0.000000e+00 : f32
    %79 = vector.broadcast %cst_91 : f32 to vector<64x32xf32>
    %80 = arith.cmpf oge, %78, %79 : vector<64x32xf32>
    %cst_92 = arith.constant 0.00999999977 : f32
    %81 = vector.broadcast %cst_92 : f32 to vector<64x32xf32>
    %82 = arith.mulf %81, %78 : vector<64x32xf32>
    %83 = arith.select %80, %78, %82 : vector<64x32xi1>, vector<64x32xf32>
    %84 = vector.shape_cast %83 : vector<64x32xf32> to vector<8x8x32xf32>
    %c1_93 = arith.constant 1 : index
    %c1_94 = arith.constant 1 : index
    %c0_95 = arith.constant 0 : index
    %c0_96 = arith.constant 0 : index
    %c0_97 = arith.constant 0 : index
    %85 = vector.load %arg7[%c1_93, %c1_94, %c0_95, %c0_96, %c0_97] : memref<2x2x9x9x32xf32, #tpu.memory_space<vmem>>, vector<1x1x8x8x32xf32>
    %86 = vector.shape_cast %85 : vector<1x1x8x8x32xf32> to vector<8x8x32xf32>
    %87 = vector.shape_cast %84 : vector<8x8x32xf32> to vector<1x1x8x8x32xf32>
    tpu.vector_store %arg7[%c1_93, %c1_94, %c0_95, %c0_96, %c0_97], %87 {strides = array<i32>} : memref<2x2x9x9x32xf32, #tpu.memory_space<vmem>>, vector<1x1x8x8x32xf32>,
    %cst_98 = arith.constant 0.000000e+00 : f32
    %88 = vector.broadcast %cst_98 : f32 to vector<64x32xf32>
    %c0_99 = arith.constant 0 : index
    %c0_100 = arith.constant 0 : index
    %c1_101 = arith.constant 1 : index
    %c0_102 = arith.constant 0 : index
    %c0_103 = arith.constant 0 : index
    %c0_104 = arith.constant 0 : index
    %89 = vector.load %arg1[%c0_99, %c0_100, %c1_101, %c0_102, %c0_103, %c0_104] : memref<1x2x2x9x9x16xf32, #tpu.memory_space<vmem>>, vector<1x1x1x8x8x16xf32>
    %90 = vector.shape_cast %89 : vector<1x1x1x8x8x16xf32> to vector<8x8x16xf32>
    %91 = vector.shape_cast %90 : vector<8x8x16xf32> to vector<64x16xf32>
    %92 = arith.truncf %91 : vector<64x16xf32> to vector<64x16xbf16>
    %c0_105 = arith.constant 0 : index
    %c0_106 = arith.constant 0 : index
    %c0_107 = arith.constant 0 : index
    %93 = vector.load %arg2[%c0_105, %c0_106, %c0_107] : memref<9x16x32xbf16, #tpu.memory_space<vmem>>, vector<1x16x32xbf16>
    %94 = vector.shape_cast %93 : vector<1x16x32xbf16> to vector<16x32xbf16>
    %cst_108 = arith.constant dense<0.000000e+00> : vector<64x32xf32>
    %95 = tpu.matmul %92, %94, %cst_108 {dimension_numbers = #tpu.dot_dimension_numbers<[1], [0], [0], [1], [0, 0, 1, 1], [], []>} : vector<64x16xbf16>, vector<16x32xbf16>, vector<64x32xf32> -> vector<64x32xf32>
    %96 = arith.addf %88, %95 : vector<64x32xf32>
    %c0_109 = arith.constant 0 : index
    %c0_110 = arith.constant 0 : index
    %c0_111 = arith.constant 0 : index
    %c0_112 = arith.constant 0 : index
    %c1_113 = arith.constant 1 : index
    %c0_114 = arith.constant 0 : index
    %97 = vector.load %arg1[%c0_109, %c0_110, %c0_111, %c0_112, %c1_113, %c0_114] : memref<1x2x2x9x9x16xf32, #tpu.memory_space<vmem>>, vector<1x1x1x8x8x16xf32>
    %98 = vector.shape_cast %97 : vector<1x1x1x8x8x16xf32> to vector<8x8x16xf32>
    %99 = vector.shape_cast %98 : vector<8x8x16xf32> to vector<64x16xf32>
    %100 = arith.truncf %99 : vector<64x16xf32> to vector<64x16xbf16>
    %c1_115 = arith.constant 1 : index
    %c0_116 = arith.constant 0 : index
    %c0_117 = arith.constant 0 : index
    %101 = vector.load %arg2[%c1_115, %c0_116, %c0_117] : memref<9x16x32xbf16, #tpu.memory_space<vmem>>, vector<1x16x32xbf16>
    %102 = vector.shape_cast %101 : vector<1x16x32xbf16> to vector<16x32xbf16>
    %cst_118 = arith.constant dense<0.000000e+00> : vector<64x32xf32>
    %103 = tpu.matmul %100, %102, %cst_118 {dimension_numbers = #tpu.dot_dimension_numbers<[1], [0], [0], [1], [0, 0, 1, 1], [], []>} : vector<64x16xbf16>, vector<16x32xbf16>, vector<64x32xf32> -> vector<64x32xf32>
    %104 = arith.addf %96, %103 : vector<64x32xf32>
    %c0_119 = arith.constant 0 : index
    %c0_120 = arith.constant 0 : index
    %c1_121 = arith.constant 1 : index
    %c0_122 = arith.constant 0 : index
    %c1_123 = arith.constant 1 : index
    %c0_124 = arith.constant 0 : index
    %105 = vector.load %arg1[%c0_119, %c0_120, %c1_121, %c0_122, %c1_123, %c0_124] : memref<1x2x2x9x9x16xf32, #tpu.memory_space<vmem>>, vector<1x1x1x8x8x16xf32>
    %106 = vector.shape_cast %105 : vector<1x1x1x8x8x16xf32> to vector<8x8x16xf32>
    %107 = vector.shape_cast %106 : vector<8x8x16xf32> to vector<64x16xf32>
    %108 = arith.truncf %107 : vector<64x16xf32> to vector<64x16xbf16>
    %c2_125 = arith.constant 2 : index
    %c0_126 = arith.constant 0 : index
    %c0_127 = arith.constant 0 : index
    %109 = vector.load %arg2[%c2_125, %c0_126, %c0_127] : memref<9x16x32xbf16, #tpu.memory_space<vmem>>, vector<1x16x32xbf16>
    %110 = vector.shape_cast %109 : vector<1x16x32xbf16> to vector<16x32xbf16>
    %cst_128 = arith.constant dense<0.000000e+00> : vector<64x32xf32>
    %111 = tpu.matmul %108, %110, %cst_128 {dimension_numbers = #tpu.dot_dimension_numbers<[1], [0], [0], [1], [0, 0, 1, 1], [], []>} : vector<64x16xbf16>, vector<16x32xbf16>, vector<64x32xf32> -> vector<64x32xf32>
    %112 = arith.addf %104, %111 : vector<64x32xf32>
    %c0_129 = arith.constant 0 : index
    %c1_130 = arith.constant 1 : index
    %c1_131 = arith.constant 1 : index
    %c0_132 = arith.constant 0 : index
    %c0_133 = arith.constant 0 : index
    %c0_134 = arith.constant 0 : index
    %113 = vector.load %arg1[%c0_129, %c1_130, %c1_131, %c0_132, %c0_133, %c0_134] : memref<1x2x2x9x9x16xf32, #tpu.memory_space<vmem>>, vector<1x1x1x8x8x16xf32>
    %114 = vector.shape_cast %113 : vector<1x1x1x8x8x16xf32> to vector<8x8x16xf32>
    %115 = vector.shape_cast %114 : vector<8x8x16xf32> to vector<64x16xf32>
    %116 = arith.truncf %115 : vector<64x16xf32> to vector<64x16xbf16>
    %c3_135 = arith.constant 3 : index
    %c0_136 = arith.constant 0 : index
    %c0_137 = arith.constant 0 : index
    %117 = vector.load %arg2[%c3_135, %c0_136, %c0_137] : memref<9x16x32xbf16, #tpu.memory_space<vmem>>, vector<1x16x32xbf16>
    %118 = vector.shape_cast %117 : vector<1x16x32xbf16> to vector<16x32xbf16>
    %cst_138 = arith.constant dense<0.000000e+00> : vector<64x32xf32>
    %119 = tpu.matmul %116, %118, %cst_138 {dimension_numbers = #tpu.dot_dimension_numbers<[1], [0], [0], [1], [0, 0, 1, 1], [], []>} : vector<64x16xbf16>, vector<16x32xbf16>, vector<64x32xf32> -> vector<64x32xf32>
    %120 = arith.addf %112, %119 : vector<64x32xf32>
    %c0_139 = arith.constant 0 : index
    %c1_140 = arith.constant 1 : index
    %c0_141 = arith.constant 0 : index
    %c0_142 = arith.constant 0 : index
    %c1_143 = arith.constant 1 : index
    %c0_144 = arith.constant 0 : index
    %121 = vector.load %arg1[%c0_139, %c1_140, %c0_141, %c0_142, %c1_143, %c0_144] : memref<1x2x2x9x9x16xf32, #tpu.memory_space<vmem>>, vector<1x1x1x8x8x16xf32>
    %122 = vector.shape_cast %121 : vector<1x1x1x8x8x16xf32> to vector<8x8x16xf32>
    %123 = vector.shape_cast %122 : vector<8x8x16xf32> to vector<64x16xf32>
    %124 = arith.truncf %123 : vector<64x16xf32> to vector<64x16xbf16>
    %c4_145 = arith.constant 4 : index
    %c0_146 = arith.constant 0 : index
    %c0_147 = arith.constant 0 : index
    %125 = vector.load %arg2[%c4_145, %c0_146, %c0_147] : memref<9x16x32xbf16, #tpu.memory_space<vmem>>, vector<1x16x32xbf16>
    %126 = vector.shape_cast %125 : vector<1x16x32xbf16> to vector<16x32xbf16>
    %cst_148 = arith.constant dense<0.000000e+00> : vector<64x32xf32>
    %127 = tpu.matmul %124, %126, %cst_148 {dimension_numbers = #tpu.dot_dimension_numbers<[1], [0], [0], [1], [0, 0, 1, 1], [], []>} : vector<64x16xbf16>, vector<16x32xbf16>, vector<64x32xf32> -> vector<64x32xf32>
    %128 = arith.addf %120, %127 : vector<64x32xf32>
    %c0_149 = arith.constant 0 : index
    %c1_150 = arith.constant 1 : index
    %c1_151 = arith.constant 1 : index
    %c0_152 = arith.constant 0 : index
    %c1_153 = arith.constant 1 : index
    %c0_154 = arith.constant 0 : index
    %129 = vector.load %arg1[%c0_149, %c1_150, %c1_151, %c0_152, %c1_153, %c0_154] : memref<1x2x2x9x9x16xf32, #tpu.memory_space<vmem>>, vector<1x1x1x8x8x16xf32>
    %130 = vector.shape_cast %129 : vector<1x1x1x8x8x16xf32> to vector<8x8x16xf32>
    %131 = vector.shape_cast %130 : vector<8x8x16xf32> to vector<64x16xf32>
    %132 = arith.truncf %131 : vector<64x16xf32> to vector<64x16xbf16>
    %c5_155 = arith.constant 5 : index
    %c0_156 = arith.constant 0 : index
    %c0_157 = arith.constant 0 : index
    %133 = vector.load %arg2[%c5_155, %c0_156, %c0_157] : memref<9x16x32xbf16, #tpu.memory_space<vmem>>, vector<1x16x32xbf16>
    %134 = vector.shape_cast %133 : vector<1x16x32xbf16> to vector<16x32xbf16>
    %cst_158 = arith.constant dense<0.000000e+00> : vector<64x32xf32>
    %135 = tpu.matmul %132, %134, %cst_158 {dimension_numbers = #tpu.dot_dimension_numbers<[1], [0], [0], [1], [0, 0, 1, 1], [], []>} : vector<64x16xbf16>, vector<16x32xbf16>, vector<64x32xf32> -> vector<64x32xf32>
    %136 = arith.addf %128, %135 : vector<64x32xf32>
    %c0_159 = arith.constant 0 : index
    %c0_160 = arith.constant 0 : index
    %c1_161 = arith.constant 1 : index
    %c1_162 = arith.constant 1 : index
    %c0_163 = arith.constant 0 : index
    %c0_164 = arith.constant 0 : index
    %137 = vector.load %arg1[%c0_159, %c0_160, %c1_161, %c1_162, %c0_163, %c0_164] : memref<1x2x2x9x9x16xf32, #tpu.memory_space<vmem>>, vector<1x1x1x8x8x16xf32>
    %138 = vector.shape_cast %137 : vector<1x1x1x8x8x16xf32> to vector<8x8x16xf32>
    %139 = vector.shape_cast %138 : vector<8x8x16xf32> to vector<64x16xf32>
    %140 = arith.truncf %139 : vector<64x16xf32> to vector<64x16xbf16>
    %c6_165 = arith.constant 6 : index
    %c0_166 = arith.constant 0 : index
    %c0_167 = arith.constant 0 : index
    %141 = vector.load %arg2[%c6_165, %c0_166, %c0_167] : memref<9x16x32xbf16, #tpu.memory_space<vmem>>, vector<1x16x32xbf16>
    %142 = vector.shape_cast %141 : vector<1x16x32xbf16> to vector<16x32xbf16>
    %cst_168 = arith.constant dense<0.000000e+00> : vector<64x32xf32>
    %143 = tpu.matmul %140, %142, %cst_168 {dimension_numbers = #tpu.dot_dimension_numbers<[1], [0], [0], [1], [0, 0, 1, 1], [], []>} : vector<64x16xbf16>, vector<16x32xbf16>, vector<64x32xf32> -> vector<64x32xf32>
    %144 = arith.addf %136, %143 : vector<64x32xf32>
    %c0_169 = arith.constant 0 : index
    %c0_170 = arith.constant 0 : index
    %c0_171 = arith.constant 0 : index
    %c1_172 = arith.constant 1 : index
    %c1_173 = arith.constant 1 : index
    %c0_174 = arith.constant 0 : index
    %145 = vector.load %arg1[%c0_169, %c0_170, %c0_171, %c1_172, %c1_173, %c0_174] : memref<1x2x2x9x9x16xf32, #tpu.memory_space<vmem>>, vector<1x1x1x8x8x16xf32>
    %146 = vector.shape_cast %145 : vector<1x1x1x8x8x16xf32> to vector<8x8x16xf32>
    %147 = vector.shape_cast %146 : vector<8x8x16xf32> to vector<64x16xf32>
    %148 = arith.truncf %147 : vector<64x16xf32> to vector<64x16xbf16>
    %c7_175 = arith.constant 7 : index
    %c0_176 = arith.constant 0 : index
    %c0_177 = arith.constant 0 : index
    %149 = vector.load %arg2[%c7_175, %c0_176, %c0_177] : memref<9x16x32xbf16, #tpu.memory_space<vmem>>, vector<1x16x32xbf16>
    %150 = vector.shape_cast %149 : vector<1x16x32xbf16> to vector<16x32xbf16>
    %cst_178 = arith.constant dense<0.000000e+00> : vector<64x32xf32>
    %151 = tpu.matmul %148, %150, %cst_178 {dimension_numbers = #tpu.dot_dimension_numbers<[1], [0], [0], [1], [0, 0, 1, 1], [], []>} : vector<64x16xbf16>, vector<16x32xbf16>, vector<64x32xf32> -> vector<64x32xf32>
    %152 = arith.addf %144, %151 : vector<64x32xf32>
    %c0_179 = arith.constant 0 : index
    %c0_180 = arith.constant 0 : index
    %c1_181 = arith.constant 1 : index
    %c1_182 = arith.constant 1 : index
    %c1_183 = arith.constant 1 : index
    %c0_184 = arith.constant 0 : index
    %153 = vector.load %arg1[%c0_179, %c0_180, %c1_181, %c1_182, %c1_183, %c0_184] : memref<1x2x2x9x9x16xf32, #tpu.memory_space<vmem>>, vector<1x1x1x8x8x16xf32>
    %154 = vector.shape_cast %153 : vector<1x1x1x8x8x16xf32> to vector<8x8x16xf32>
    %155 = vector.shape_cast %154 : vector<8x8x16xf32> to vector<64x16xf32>
    %156 = arith.truncf %155 : vector<64x16xf32> to vector<64x16xbf16>
    %c8_185 = arith.constant 8 : index
    %c0_186 = arith.constant 0 : index
    %c0_187 = arith.constant 0 : index
    %157 = vector.load %arg2[%c8_185, %c0_186, %c0_187] : memref<9x16x32xbf16, #tpu.memory_space<vmem>>, vector<1x16x32xbf16>
    %158 = vector.shape_cast %157 : vector<1x16x32xbf16> to vector<16x32xbf16>
    %cst_188 = arith.constant dense<0.000000e+00> : vector<64x32xf32>
    %159 = tpu.matmul %156, %158, %cst_188 {dimension_numbers = #tpu.dot_dimension_numbers<[1], [0], [0], [1], [0, 0, 1, 1], [], []>} : vector<64x16xbf16>, vector<16x32xbf16>, vector<64x32xf32> -> vector<64x32xf32>
    %160 = arith.addf %152, %159 : vector<64x32xf32>
    %161 = vector.broadcast %2 : vector<1x32xf32> to vector<64x32xf32>
    %162 = arith.addf %160, %161 : vector<64x32xf32>
    %cst_189 = arith.constant 0.000000e+00 : f32
    %163 = vector.broadcast %cst_189 : f32 to vector<64x32xf32>
    %164 = arith.cmpf oge, %162, %163 : vector<64x32xf32>
    %cst_190 = arith.constant 0.00999999977 : f32
    %165 = vector.broadcast %cst_190 : f32 to vector<64x32xf32>
    %166 = arith.mulf %165, %162 : vector<64x32xf32>
    %167 = arith.select %164, %162, %166 : vector<64x32xi1>, vector<64x32xf32>
    %168 = vector.shape_cast %167 : vector<64x32xf32> to vector<8x8x32xf32>
    %c1_191 = arith.constant 1 : index
    %c0_192 = arith.constant 0 : index
    %c0_193 = arith.constant 0 : index
    %c1_194 = arith.constant 1 : index
    %c0_195 = arith.constant 0 : index
    %169 = vector.load %arg7[%c1_191, %c0_192, %c0_193, %c1_194, %c0_195] : memref<2x2x9x9x32xf32, #tpu.memory_space<vmem>>, vector<1x1x8x8x32xf32>
    %170 = vector.shape_cast %169 : vector<1x1x8x8x32xf32> to vector<8x8x32xf32>
    %171 = vector.shape_cast %168 : vector<8x8x32xf32> to vector<1x1x8x8x32xf32>
    tpu.vector_store %arg7[%c1_191, %c0_192, %c0_193, %c1_194, %c0_195], %171 {strides = array<i32>} : memref<2x2x9x9x32xf32, #tpu.memory_space<vmem>>, vector<1x1x8x8x32xf32>,
    %cst_196 = arith.constant 0.000000e+00 : f32
    %172 = vector.broadcast %cst_196 : f32 to vector<64x32xf32>
    %c0_197 = arith.constant 0 : index
    %c1_198 = arith.constant 1 : index
    %c0_199 = arith.constant 0 : index
    %c0_200 = arith.constant 0 : index
    %c0_201 = arith.constant 0 : index
    %c0_202 = arith.constant 0 : index
    %173 = vector.load %arg1[%c0_197, %c1_198, %c0_199, %c0_200, %c0_201, %c0_202] : memref<1x2x2x9x9x16xf32, #tpu.memory_space<vmem>>, vector<1x1x1x8x8x16xf32>
    %174 = vector.shape_cast %173 : vector<1x1x1x8x8x16xf32> to vector<8x8x16xf32>
    %175 = vector.shape_cast %174 : vector<8x8x16xf32> to vector<64x16xf32>
    %176 = arith.truncf %175 : vector<64x16xf32> to vector<64x16xbf16>
    %c0_203 = arith.constant 0 : index
    %c0_204 = arith.constant 0 : index
    %c0_205 = arith.constant 0 : index
    %177 = vector.load %arg2[%c0_203, %c0_204, %c0_205] : memref<9x16x32xbf16, #tpu.memory_space<vmem>>, vector<1x16x32xbf16>
    %178 = vector.shape_cast %177 : vector<1x16x32xbf16> to vector<16x32xbf16>
    %cst_206 = arith.constant dense<0.000000e+00> : vector<64x32xf32>
    %179 = tpu.matmul %176, %178, %cst_206 {dimension_numbers = #tpu.dot_dimension_numbers<[1], [0], [0], [1], [0, 0, 1, 1], [], []>} : vector<64x16xbf16>, vector<16x32xbf16>, vector<64x32xf32> -> vector<64x32xf32>
    %180 = arith.addf %172, %179 : vector<64x32xf32>
    %c0_207 = arith.constant 0 : index
    %c1_208 = arith.constant 1 : index
    %c1_209 = arith.constant 1 : index
    %c0_210 = arith.constant 0 : index
    %c0_211 = arith.constant 0 : index
    %c0_212 = arith.constant 0 : index
    %181 = vector.load %arg1[%c0_207, %c1_208, %c1_209, %c0_210, %c0_211, %c0_212] : memref<1x2x2x9x9x16xf32, #tpu.memory_space<vmem>>, vector<1x1x1x8x8x16xf32>
    %182 = vector.shape_cast %181 : vector<1x1x1x8x8x16xf32> to vector<8x8x16xf32>
    %183 = vector.shape_cast %182 : vector<8x8x16xf32> to vector<64x16xf32>
    %184 = arith.truncf %183 : vector<64x16xf32> to vector<64x16xbf16>
    %c1_213 = arith.constant 1 : index
    %c0_214 = arith.constant 0 : index
    %c0_215 = arith.constant 0 : index
    %185 = vector.load %arg2[%c1_213, %c0_214, %c0_215] : memref<9x16x32xbf16, #tpu.memory_space<vmem>>, vector<1x16x32xbf16>
    %186 = vector.shape_cast %185 : vector<1x16x32xbf16> to vector<16x32xbf16>
    %cst_216 = arith.constant dense<0.000000e+00> : vector<64x32xf32>
    %187 = tpu.matmul %184, %186, %cst_216 {dimension_numbers = #tpu.dot_dimension_numbers<[1], [0], [0], [1], [0, 0, 1, 1], [], []>} : vector<64x16xbf16>, vector<16x32xbf16>, vector<64x32xf32> -> vector<64x32xf32>
    %188 = arith.addf %180, %187 : vector<64x32xf32>
    %c0_217 = arith.constant 0 : index
    %c1_218 = arith.constant 1 : index
    %c0_219 = arith.constant 0 : index
    %c0_220 = arith.constant 0 : index
    %c1_221 = arith.constant 1 : index
    %c0_222 = arith.constant 0 : index
    %189 = vector.load %arg1[%c0_217, %c1_218, %c0_219, %c0_220, %c1_221, %c0_222] : memref<1x2x2x9x9x16xf32, #tpu.memory_space<vmem>>, vector<1x1x1x8x8x16xf32>
    %190 = vector.shape_cast %189 : vector<1x1x1x8x8x16xf32> to vector<8x8x16xf32>
    %191 = vector.shape_cast %190 : vector<8x8x16xf32> to vector<64x16xf32>
    %192 = arith.truncf %191 : vector<64x16xf32> to vector<64x16xbf16>
    %c2_223 = arith.constant 2 : index
    %c0_224 = arith.constant 0 : index
    %c0_225 = arith.constant 0 : index
    %193 = vector.load %arg2[%c2_223, %c0_224, %c0_225] : memref<9x16x32xbf16, #tpu.memory_space<vmem>>, vector<1x16x32xbf16>
    %194 = vector.shape_cast %193 : vector<1x16x32xbf16> to vector<16x32xbf16>
    %cst_226 = arith.constant dense<0.000000e+00> : vector<64x32xf32>
    %195 = tpu.matmul %192, %194, %cst_226 {dimension_numbers = #tpu.dot_dimension_numbers<[1], [0], [0], [1], [0, 0, 1, 1], [], []>} : vector<64x16xbf16>, vector<16x32xbf16>, vector<64x32xf32> -> vector<64x32xf32>
    %196 = arith.addf %188, %195 : vector<64x32xf32>
    %c0_227 = arith.constant 0 : index
    %c0_228 = arith.constant 0 : index
    %c0_229 = arith.constant 0 : index
    %c1_230 = arith.constant 1 : index
    %c0_231 = arith.constant 0 : index
    %c0_232 = arith.constant 0 : index
    %197 = vector.load %arg1[%c0_227, %c0_228, %c0_229, %c1_230, %c0_231, %c0_232] : memref<1x2x2x9x9x16xf32, #tpu.memory_space<vmem>>, vector<1x1x1x8x8x16xf32>
    %198 = vector.shape_cast %197 : vector<1x1x1x8x8x16xf32> to vector<8x8x16xf32>
    %199 = vector.shape_cast %198 : vector<8x8x16xf32> to vector<64x16xf32>
    %200 = arith.truncf %199 : vector<64x16xf32> to vector<64x16xbf16>
    %c3_233 = arith.constant 3 : index
    %c0_234 = arith.constant 0 : index
    %c0_235 = arith.constant 0 : index
    %201 = vector.load %arg2[%c3_233, %c0_234, %c0_235] : memref<9x16x32xbf16, #tpu.memory_space<vmem>>, vector<1x16x32xbf16>
    %202 = vector.shape_cast %201 : vector<1x16x32xbf16> to vector<16x32xbf16>
    %cst_236 = arith.constant dense<0.000000e+00> : vector<64x32xf32>
    %203 = tpu.matmul %200, %202, %cst_236 {dimension_numbers = #tpu.dot_dimension_numbers<[1], [0], [0], [1], [0, 0, 1, 1], [], []>} : vector<64x16xbf16>, vector<16x32xbf16>, vector<64x32xf32> -> vector<64x32xf32>
    %204 = arith.addf %196, %203 : vector<64x32xf32>
    %c0_237 = arith.constant 0 : index
    %c0_238 = arith.constant 0 : index
    %c1_239 = arith.constant 1 : index
    %c1_240 = arith.constant 1 : index
    %c0_241 = arith.constant 0 : index
    %c0_242 = arith.constant 0 : index
    %205 = vector.load %arg1[%c0_237, %c0_238, %c1_239, %c1_240, %c0_241, %c0_242] : memref<1x2x2x9x9x16xf32, #tpu.memory_space<vmem>>, vector<1x1x1x8x8x16xf32>
    %206 = vector.shape_cast %205 : vector<1x1x1x8x8x16xf32> to vector<8x8x16xf32>
    %207 = vector.shape_cast %206 : vector<8x8x16xf32> to vector<64x16xf32>
    %208 = arith.truncf %207 : vector<64x16xf32> to vector<64x16xbf16>
    %c4_243 = arith.constant 4 : index
    %c0_244 = arith.constant 0 : index
    %c0_245 = arith.constant 0 : index
    %209 = vector.load %arg2[%c4_243, %c0_244, %c0_245] : memref<9x16x32xbf16, #tpu.memory_space<vmem>>, vector<1x16x32xbf16>
    %210 = vector.shape_cast %209 : vector<1x16x32xbf16> to vector<16x32xbf16>
    %cst_246 = arith.constant dense<0.000000e+00> : vector<64x32xf32>
    %211 = tpu.matmul %208, %210, %cst_246 {dimension_numbers = #tpu.dot_dimension_numbers<[1], [0], [0], [1], [0, 0, 1, 1], [], []>} : vector<64x16xbf16>, vector<16x32xbf16>, vector<64x32xf32> -> vector<64x32xf32>
    %212 = arith.addf %204, %211 : vector<64x32xf32>
    %c0_247 = arith.constant 0 : index
    %c0_248 = arith.constant 0 : index
    %c0_249 = arith.constant 0 : index
    %c1_250 = arith.constant 1 : index
    %c1_251 = arith.constant 1 : index
    %c0_252 = arith.constant 0 : index
    %213 = vector.load %arg1[%c0_247, %c0_248, %c0_249, %c1_250, %c1_251, %c0_252] : memref<1x2x2x9x9x16xf32, #tpu.memory_space<vmem>>, vector<1x1x1x8x8x16xf32>
    %214 = vector.shape_cast %213 : vector<1x1x1x8x8x16xf32> to vector<8x8x16xf32>
    %215 = vector.shape_cast %214 : vector<8x8x16xf32> to vector<64x16xf32>
    %216 = arith.truncf %215 : vector<64x16xf32> to vector<64x16xbf16>
    %c5_253 = arith.constant 5 : index
    %c0_254 = arith.constant 0 : index
    %c0_255 = arith.constant 0 : index
    %217 = vector.load %arg2[%c5_253, %c0_254, %c0_255] : memref<9x16x32xbf16, #tpu.memory_space<vmem>>, vector<1x16x32xbf16>
    %218 = vector.shape_cast %217 : vector<1x16x32xbf16> to vector<16x32xbf16>
    %cst_256 = arith.constant dense<0.000000e+00> : vector<64x32xf32>
    %219 = tpu.matmul %216, %218, %cst_256 {dimension_numbers = #tpu.dot_dimension_numbers<[1], [0], [0], [1], [0, 0, 1, 1], [], []>} : vector<64x16xbf16>, vector<16x32xbf16>, vector<64x32xf32> -> vector<64x32xf32>
    %220 = arith.addf %212, %219 : vector<64x32xf32>
    %c0_257 = arith.constant 0 : index
    %c1_258 = arith.constant 1 : index
    %c0_259 = arith.constant 0 : index
    %c1_260 = arith.constant 1 : index
    %c0_261 = arith.constant 0 : index
    %c0_262 = arith.constant 0 : index
    %221 = vector.load %arg1[%c0_257, %c1_258, %c0_259, %c1_260, %c0_261, %c0_262] : memref<1x2x2x9x9x16xf32, #tpu.memory_space<vmem>>, vector<1x1x1x8x8x16xf32>
    %222 = vector.shape_cast %221 : vector<1x1x1x8x8x16xf32> to vector<8x8x16xf32>
    %223 = vector.shape_cast %222 : vector<8x8x16xf32> to vector<64x16xf32>
    %224 = arith.truncf %223 : vector<64x16xf32> to vector<64x16xbf16>
    %c6_263 = arith.constant 6 : index
    %c0_264 = arith.constant 0 : index
    %c0_265 = arith.constant 0 : index
    %225 = vector.load %arg2[%c6_263, %c0_264, %c0_265] : memref<9x16x32xbf16, #tpu.memory_space<vmem>>, vector<1x16x32xbf16>
    %226 = vector.shape_cast %225 : vector<1x16x32xbf16> to vector<16x32xbf16>
    %cst_266 = arith.constant dense<0.000000e+00> : vector<64x32xf32>
    %227 = tpu.matmul %224, %226, %cst_266 {dimension_numbers = #tpu.dot_dimension_numbers<[1], [0], [0], [1], [0, 0, 1, 1], [], []>} : vector<64x16xbf16>, vector<16x32xbf16>, vector<64x32xf32> -> vector<64x32xf32>
    %228 = arith.addf %220, %227 : vector<64x32xf32>
    %c0_267 = arith.constant 0 : index
    %c1_268 = arith.constant 1 : index
    %c1_269 = arith.constant 1 : index
    %c1_270 = arith.constant 1 : index
    %c0_271 = arith.constant 0 : index
    %c0_272 = arith.constant 0 : index
    %229 = vector.load %arg1[%c0_267, %c1_268, %c1_269, %c1_270, %c0_271, %c0_272] : memref<1x2x2x9x9x16xf32, #tpu.memory_space<vmem>>, vector<1x1x1x8x8x16xf32>
    %230 = vector.shape_cast %229 : vector<1x1x1x8x8x16xf32> to vector<8x8x16xf32>
    %231 = vector.shape_cast %230 : vector<8x8x16xf32> to vector<64x16xf32>
    %232 = arith.truncf %231 : vector<64x16xf32> to vector<64x16xbf16>
    %c7_273 = arith.constant 7 : index
    %c0_274 = arith.constant 0 : index
    %c0_275 = arith.constant 0 : index
    %233 = vector.load %arg2[%c7_273, %c0_274, %c0_275] : memref<9x16x32xbf16, #tpu.memory_space<vmem>>, vector<1x16x32xbf16>
    %234 = vector.shape_cast %233 : vector<1x16x32xbf16> to vector<16x32xbf16>
    %cst_276 = arith.constant dense<0.000000e+00> : vector<64x32xf32>
    %235 = tpu.matmul %232, %234, %cst_276 {dimension_numbers = #tpu.dot_dimension_numbers<[1], [0], [0], [1], [0, 0, 1, 1], [], []>} : vector<64x16xbf16>, vector<16x32xbf16>, vector<64x32xf32> -> vector<64x32xf32>
    %236 = arith.addf %228, %235 : vector<64x32xf32>
    %c0_277 = arith.constant 0 : index
    %c1_278 = arith.constant 1 : index
    %c0_279 = arith.constant 0 : index
    %c1_280 = arith.constant 1 : index
    %c1_281 = arith.constant 1 : index
    %c0_282 = arith.constant 0 : index
    %237 = vector.load %arg1[%c0_277, %c1_278, %c0_279, %c1_280, %c1_281, %c0_282] : memref<1x2x2x9x9x16xf32, #tpu.memory_space<vmem>>, vector<1x1x1x8x8x16xf32>
    %238 = vector.shape_cast %237 : vector<1x1x1x8x8x16xf32> to vector<8x8x16xf32>
    %239 = vector.shape_cast %238 : vector<8x8x16xf32> to vector<64x16xf32>
    %240 = arith.truncf %239 : vector<64x16xf32> to vector<64x16xbf16>
    %c8_283 = arith.constant 8 : index
    %c0_284 = arith.constant 0 : index
    %c0_285 = arith.constant 0 : index
    %241 = vector.load %arg2[%c8_283, %c0_284, %c0_285] : memref<9x16x32xbf16, #tpu.memory_space<vmem>>, vector<1x16x32xbf16>
    %242 = vector.shape_cast %241 : vector<1x16x32xbf16> to vector<16x32xbf16>
    %cst_286 = arith.constant dense<0.000000e+00> : vector<64x32xf32>
    %243 = tpu.matmul %240, %242, %cst_286 {dimension_numbers = #tpu.dot_dimension_numbers<[1], [0], [0], [1], [0, 0, 1, 1], [], []>} : vector<64x16xbf16>, vector<16x32xbf16>, vector<64x32xf32> -> vector<64x32xf32>
    %244 = arith.addf %236, %243 : vector<64x32xf32>
    %245 = vector.broadcast %2 : vector<1x32xf32> to vector<64x32xf32>
    %246 = arith.addf %244, %245 : vector<64x32xf32>
    %cst_287 = arith.constant 0.000000e+00 : f32
    %247 = vector.broadcast %cst_287 : f32 to vector<64x32xf32>
    %248 = arith.cmpf oge, %246, %247 : vector<64x32xf32>
    %cst_288 = arith.constant 0.00999999977 : f32
    %249 = vector.broadcast %cst_288 : f32 to vector<64x32xf32>
    %250 = arith.mulf %249, %246 : vector<64x32xf32>
    %251 = arith.select %248, %246, %250 : vector<64x32xi1>, vector<64x32xf32>
    %252 = vector.shape_cast %251 : vector<64x32xf32> to vector<8x8x32xf32>
    %c0_289 = arith.constant 0 : index
    %c1_290 = arith.constant 1 : index
    %c1_291 = arith.constant 1 : index
    %c0_292 = arith.constant 0 : index
    %c0_293 = arith.constant 0 : index
    %253 = vector.load %arg7[%c0_289, %c1_290, %c1_291, %c0_292, %c0_293] : memref<2x2x9x9x32xf32, #tpu.memory_space<vmem>>, vector<1x1x8x8x32xf32>
    %254 = vector.shape_cast %253 : vector<1x1x8x8x32xf32> to vector<8x8x32xf32>
    %255 = vector.shape_cast %252 : vector<8x8x32xf32> to vector<1x1x8x8x32xf32>
    tpu.vector_store %arg7[%c0_289, %c1_290, %c1_291, %c0_292, %c0_293], %255 {strides = array<i32>} : memref<2x2x9x9x32xf32, #tpu.memory_space<vmem>>, vector<1x1x8x8x32xf32>,
    %cst_294 = arith.constant 0.000000e+00 : f32
    %256 = vector.broadcast %cst_294 : f32 to vector<64x32xf32>
    %c0_295 = arith.constant 0 : index
    %c1_296 = arith.constant 1 : index
    %c1_297 = arith.constant 1 : index
    %c0_298 = arith.constant 0 : index
    %c0_299 = arith.constant 0 : index
    %c0_300 = arith.constant 0 : index
    %257 = vector.load %arg1[%c0_295, %c1_296, %c1_297, %c0_298, %c0_299, %c0_300] : memref<1x2x2x9x9x16xf32, #tpu.memory_space<vmem>>, vector<1x1x1x8x8x16xf32>
    %258 = vector.shape_cast %257 : vector<1x1x1x8x8x16xf32> to vector<8x8x16xf32>
    %259 = vector.shape_cast %258 : vector<8x8x16xf32> to vector<64x16xf32>
    %260 = arith.truncf %259 : vector<64x16xf32> to vector<64x16xbf16>
    %c0_301 = arith.constant 0 : index
    %c0_302 = arith.constant 0 : index
    %c0_303 = arith.constant 0 : index
    %261 = vector.load %arg2[%c0_301, %c0_302, %c0_303] : memref<9x16x32xbf16, #tpu.memory_space<vmem>>, vector<1x16x32xbf16>
    %262 = vector.shape_cast %261 : vector<1x16x32xbf16> to vector<16x32xbf16>
    %cst_304 = arith.constant dense<0.000000e+00> : vector<64x32xf32>
    %263 = tpu.matmul %260, %262, %cst_304 {dimension_numbers = #tpu.dot_dimension_numbers<[1], [0], [0], [1], [0, 0, 1, 1], [], []>} : vector<64x16xbf16>, vector<16x32xbf16>, vector<64x32xf32> -> vector<64x32xf32>
    %264 = arith.addf %256, %263 : vector<64x32xf32>
    %c0_305 = arith.constant 0 : index
    %c1_306 = arith.constant 1 : index
    %c0_307 = arith.constant 0 : index
    %c0_308 = arith.constant 0 : index
    %c1_309 = arith.constant 1 : index
    %c0_310 = arith.constant 0 : index
    %265 = vector.load %arg1[%c0_305, %c1_306, %c0_307, %c0_308, %c1_309, %c0_310] : memref<1x2x2x9x9x16xf32, #tpu.memory_space<vmem>>, vector<1x1x1x8x8x16xf32>
    %266 = vector.shape_cast %265 : vector<1x1x1x8x8x16xf32> to vector<8x8x16xf32>
    %267 = vector.shape_cast %266 : vector<8x8x16xf32> to vector<64x16xf32>
    %268 = arith.truncf %267 : vector<64x16xf32> to vector<64x16xbf16>
    %c1_311 = arith.constant 1 : index
    %c0_312 = arith.constant 0 : index
    %c0_313 = arith.constant 0 : index
    %269 = vector.load %arg2[%c1_311, %c0_312, %c0_313] : memref<9x16x32xbf16, #tpu.memory_space<vmem>>, vector<1x16x32xbf16>
    %270 = vector.shape_cast %269 : vector<1x16x32xbf16> to vector<16x32xbf16>
    %cst_314 = arith.constant dense<0.000000e+00> : vector<64x32xf32>
    %271 = tpu.matmul %268, %270, %cst_314 {dimension_numbers = #tpu.dot_dimension_numbers<[1], [0], [0], [1], [0, 0, 1, 1], [], []>} : vector<64x16xbf16>, vector<16x32xbf16>, vector<64x32xf32> -> vector<64x32xf32>
    %272 = arith.addf %264, %271 : vector<64x32xf32>
    %c0_315 = arith.constant 0 : index
    %c1_316 = arith.constant 1 : index
    %c1_317 = arith.constant 1 : index
    %c0_318 = arith.constant 0 : index
    %c1_319 = arith.constant 1 : index
    %c0_320 = arith.constant 0 : index
    %273 = vector.load %arg1[%c0_315, %c1_316, %c1_317, %c0_318, %c1_319, %c0_320] : memref<1x2x2x9x9x16xf32, #tpu.memory_space<vmem>>, vector<1x1x1x8x8x16xf32>
    %274 = vector.shape_cast %273 : vector<1x1x1x8x8x16xf32> to vector<8x8x16xf32>
    %275 = vector.shape_cast %274 : vector<8x8x16xf32> to vector<64x16xf32>
    %276 = arith.truncf %275 : vector<64x16xf32> to vector<64x16xbf16>
    %c2_321 = arith.constant 2 : index
    %c0_322 = arith.constant 0 : index
    %c0_323 = arith.constant 0 : index
    %277 = vector.load %arg2[%c2_321, %c0_322, %c0_323] : memref<9x16x32xbf16, #tpu.memory_space<vmem>>, vector<1x16x32xbf16>
    %278 = vector.shape_cast %277 : vector<1x16x32xbf16> to vector<16x32xbf16>
    %cst_324 = arith.constant dense<0.000000e+00> : vector<64x32xf32>
    %279 = tpu.matmul %276, %278, %cst_324 {dimension_numbers = #tpu.dot_dimension_numbers<[1], [0], [0], [1], [0, 0, 1, 1], [], []>} : vector<64x16xbf16>, vector<16x32xbf16>, vector<64x32xf32> -> vector<64x32xf32>
    %280 = arith.addf %272, %279 : vector<64x32xf32>
    %c0_325 = arith.constant 0 : index
    %c0_326 = arith.constant 0 : index
    %c1_327 = arith.constant 1 : index
    %c1_328 = arith.constant 1 : index
    %c0_329 = arith.constant 0 : index
    %c0_330 = arith.constant 0 : index
    %281 = vector.load %arg1[%c0_325, %c0_326, %c1_327, %c1_328, %c0_329, %c0_330] : memref<1x2x2x9x9x16xf32, #tpu.memory_space<vmem>>, vector<1x1x1x8x8x16xf32>
    %282 = vector.shape_cast %281 : vector<1x1x1x8x8x16xf32> to vector<8x8x16xf32>
    %283 = vector.shape_cast %282 : vector<8x8x16xf32> to vector<64x16xf32>
    %284 = arith.truncf %283 : vector<64x16xf32> to vector<64x16xbf16>
    %c3_331 = arith.constant 3 : index
    %c0_332 = arith.constant 0 : index
    %c0_333 = arith.constant 0 : index
    %285 = vector.load %arg2[%c3_331, %c0_332, %c0_333] : memref<9x16x32xbf16, #tpu.memory_space<vmem>>, vector<1x16x32xbf16>
    %286 = vector.shape_cast %285 : vector<1x16x32xbf16> to vector<16x32xbf16>
    %cst_334 = arith.constant dense<0.000000e+00> : vector<64x32xf32>
    %287 = tpu.matmul %284, %286, %cst_334 {dimension_numbers = #tpu.dot_dimension_numbers<[1], [0], [0], [1], [0, 0, 1, 1], [], []>} : vector<64x16xbf16>, vector<16x32xbf16>, vector<64x32xf32> -> vector<64x32xf32>
    %288 = arith.addf %280, %287 : vector<64x32xf32>
    %c0_335 = arith.constant 0 : index
    %c0_336 = arith.constant 0 : index
    %c0_337 = arith.constant 0 : index
    %c1_338 = arith.constant 1 : index
    %c1_339 = arith.constant 1 : index
    %c0_340 = arith.constant 0 : index
    %289 = vector.load %arg1[%c0_335, %c0_336, %c0_337, %c1_338, %c1_339, %c0_340] : memref<1x2x2x9x9x16xf32, #tpu.memory_space<vmem>>, vector<1x1x1x8x8x16xf32>
    %290 = vector.shape_cast %289 : vector<1x1x1x8x8x16xf32> to vector<8x8x16xf32>
    %291 = vector.shape_cast %290 : vector<8x8x16xf32> to vector<64x16xf32>
    %292 = arith.truncf %291 : vector<64x16xf32> to vector<64x16xbf16>
    %c4_341 = arith.constant 4 : index
    %c0_342 = arith.constant 0 : index
    %c0_343 = arith.constant 0 : index
    %293 = vector.load %arg2[%c4_341, %c0_342, %c0_343] : memref<9x16x32xbf16, #tpu.memory_space<vmem>>, vector<1x16x32xbf16>
    %294 = vector.shape_cast %293 : vector<1x16x32xbf16> to vector<16x32xbf16>
    %cst_344 = arith.constant dense<0.000000e+00> : vector<64x32xf32>
    %295 = tpu.matmul %292, %294, %cst_344 {dimension_numbers = #tpu.dot_dimension_numbers<[1], [0], [0], [1], [0, 0, 1, 1], [], []>} : vector<64x16xbf16>, vector<16x32xbf16>, vector<64x32xf32> -> vector<64x32xf32>
    %296 = arith.addf %288, %295 : vector<64x32xf32>
    %c0_345 = arith.constant 0 : index
    %c0_346 = arith.constant 0 : index
    %c1_347 = arith.constant 1 : index
    %c1_348 = arith.constant 1 : index
    %c1_349 = arith.constant 1 : index
    %c0_350 = arith.constant 0 : index
    %297 = vector.load %arg1[%c0_345, %c0_346, %c1_347, %c1_348, %c1_349, %c0_350] : memref<1x2x2x9x9x16xf32, #tpu.memory_space<vmem>>, vector<1x1x1x8x8x16xf32>
    %298 = vector.shape_cast %297 : vector<1x1x1x8x8x16xf32> to vector<8x8x16xf32>
    %299 = vector.shape_cast %298 : vector<8x8x16xf32> to vector<64x16xf32>
    %300 = arith.truncf %299 : vector<64x16xf32> to vector<64x16xbf16>
    %c5_351 = arith.constant 5 : index
    %c0_352 = arith.constant 0 : index
    %c0_353 = arith.constant 0 : index
    %301 = vector.load %arg2[%c5_351, %c0_352, %c0_353] : memref<9x16x32xbf16, #tpu.memory_space<vmem>>, vector<1x16x32xbf16>
    %302 = vector.shape_cast %301 : vector<1x16x32xbf16> to vector<16x32xbf16>
    %cst_354 = arith.constant dense<0.000000e+00> : vector<64x32xf32>
    %303 = tpu.matmul %300, %302, %cst_354 {dimension_numbers = #tpu.dot_dimension_numbers<[1], [0], [0], [1], [0, 0, 1, 1], [], []>} : vector<64x16xbf16>, vector<16x32xbf16>, vector<64x32xf32> -> vector<64x32xf32>
    %304 = arith.addf %296, %303 : vector<64x32xf32>
    %c0_355 = arith.constant 0 : index
    %c1_356 = arith.constant 1 : index
    %c1_357 = arith.constant 1 : index
    %c1_358 = arith.constant 1 : index
    %c0_359 = arith.constant 0 : index
    %c0_360 = arith.constant 0 : index
    %305 = vector.load %arg1[%c0_355, %c1_356, %c1_357, %c1_358, %c0_359, %c0_360] : memref<1x2x2x9x9x16xf32, #tpu.memory_space<vmem>>, vector<1x1x1x8x8x16xf32>
    %306 = vector.shape_cast %305 : vector<1x1x1x8x8x16xf32> to vector<8x8x16xf32>
    %307 = vector.shape_cast %306 : vector<8x8x16xf32> to vector<64x16xf32>
    %308 = arith.truncf %307 : vector<64x16xf32> to vector<64x16xbf16>
    %c6_361 = arith.constant 6 : index
    %c0_362 = arith.constant 0 : index
    %c0_363 = arith.constant 0 : index
    %309 = vector.load %arg2[%c6_361, %c0_362, %c0_363] : memref<9x16x32xbf16, #tpu.memory_space<vmem>>, vector<1x16x32xbf16>
    %310 = vector.shape_cast %309 : vector<1x16x32xbf16> to vector<16x32xbf16>
    %cst_364 = arith.constant dense<0.000000e+00> : vector<64x32xf32>
    %311 = tpu.matmul %308, %310, %cst_364 {dimension_numbers = #tpu.dot_dimension_numbers<[1], [0], [0], [1], [0, 0, 1, 1], [], []>} : vector<64x16xbf16>, vector<16x32xbf16>, vector<64x32xf32> -> vector<64x32xf32>
    %312 = arith.addf %304, %311 : vector<64x32xf32>
    %c0_365 = arith.constant 0 : index
    %c1_366 = arith.constant 1 : index
    %c0_367 = arith.constant 0 : index
    %c1_368 = arith.constant 1 : index
    %c1_369 = arith.constant 1 : index
    %c0_370 = arith.constant 0 : index
    %313 = vector.load %arg1[%c0_365, %c1_366, %c0_367, %c1_368, %c1_369, %c0_370] : memref<1x2x2x9x9x16xf32, #tpu.memory_space<vmem>>, vector<1x1x1x8x8x16xf32>
    %314 = vector.shape_cast %313 : vector<1x1x1x8x8x16xf32> to vector<8x8x16xf32>
    %315 = vector.shape_cast %314 : vector<8x8x16xf32> to vector<64x16xf32>
    %316 = arith.truncf %315 : vector<64x16xf32> to vector<64x16xbf16>
    %c7_371 = arith.constant 7 : index
    %c0_372 = arith.constant 0 : index
    %c0_373 = arith.constant 0 : index
    %317 = vector.load %arg2[%c7_371, %c0_372, %c0_373] : memref<9x16x32xbf16, #tpu.memory_space<vmem>>, vector<1x16x32xbf16>
    %318 = vector.shape_cast %317 : vector<1x16x32xbf16> to vector<16x32xbf16>
    %cst_374 = arith.constant dense<0.000000e+00> : vector<64x32xf32>
    %319 = tpu.matmul %316, %318, %cst_374 {dimension_numbers = #tpu.dot_dimension_numbers<[1], [0], [0], [1], [0, 0, 1, 1], [], []>} : vector<64x16xbf16>, vector<16x32xbf16>, vector<64x32xf32> -> vector<64x32xf32>
    %320 = arith.addf %312, %319 : vector<64x32xf32>
    %c0_375 = arith.constant 0 : index
    %c1_376 = arith.constant 1 : index
    %c1_377 = arith.constant 1 : index
    %c1_378 = arith.constant 1 : index
    %c1_379 = arith.constant 1 : index
    %c0_380 = arith.constant 0 : index
    %321 = vector.load %arg1[%c0_375, %c1_376, %c1_377, %c1_378, %c1_379, %c0_380] : memref<1x2x2x9x9x16xf32, #tpu.memory_space<vmem>>, vector<1x1x1x8x8x16xf32>
    %322 = vector.shape_cast %321 : vector<1x1x1x8x8x16xf32> to vector<8x8x16xf32>
    %323 = vector.shape_cast %322 : vector<8x8x16xf32> to vector<64x16xf32>
    %324 = arith.truncf %323 : vector<64x16xf32> to vector<64x16xbf16>
    %c8_381 = arith.constant 8 : index
    %c0_382 = arith.constant 0 : index
    %c0_383 = arith.constant 0 : index
    %325 = vector.load %arg2[%c8_381, %c0_382, %c0_383] : memref<9x16x32xbf16, #tpu.memory_space<vmem>>, vector<1x16x32xbf16>
    %326 = vector.shape_cast %325 : vector<1x16x32xbf16> to vector<16x32xbf16>
    %cst_384 = arith.constant dense<0.000000e+00> : vector<64x32xf32>
    %327 = tpu.matmul %324, %326, %cst_384 {dimension_numbers = #tpu.dot_dimension_numbers<[1], [0], [0], [1], [0, 0, 1, 1], [], []>} : vector<64x16xbf16>, vector<16x32xbf16>, vector<64x32xf32> -> vector<64x32xf32>
    %328 = arith.addf %320, %327 : vector<64x32xf32>
    %329 = vector.broadcast %2 : vector<1x32xf32> to vector<64x32xf32>
    %330 = arith.addf %328, %329 : vector<64x32xf32>
    %cst_385 = arith.constant 0.000000e+00 : f32
    %331 = vector.broadcast %cst_385 : f32 to vector<64x32xf32>
    %332 = arith.cmpf oge, %330, %331 : vector<64x32xf32>
    %cst_386 = arith.constant 0.00999999977 : f32
    %333 = vector.broadcast %cst_386 : f32 to vector<64x32xf32>
    %334 = arith.mulf %333, %330 : vector<64x32xf32>
    %335 = arith.select %332, %330, %334 : vector<64x32xi1>, vector<64x32xf32>
    %336 = vector.shape_cast %335 : vector<64x32xf32> to vector<8x8x32xf32>
    %c0_387 = arith.constant 0 : index
    %c0_388 = arith.constant 0 : index
    %c1_389 = arith.constant 1 : index
    %c1_390 = arith.constant 1 : index
    %c0_391 = arith.constant 0 : index
    %337 = vector.load %arg7[%c0_387, %c0_388, %c1_389, %c1_390, %c0_391] : memref<2x2x9x9x32xf32, #tpu.memory_space<vmem>>, vector<1x1x8x8x32xf32>
    %338 = vector.shape_cast %337 : vector<1x1x8x8x32xf32> to vector<8x8x32xf32>
    %339 = vector.shape_cast %336 : vector<8x8x32xf32> to vector<1x1x8x8x32xf32>
    tpu.vector_store %arg7[%c0_387, %c0_388, %c1_389, %c1_390, %c0_391], %339 {strides = array<i32>} : memref<2x2x9x9x32xf32, #tpu.memory_space<vmem>>, vector<1x1x8x8x32xf32>,
    %cst_392 = arith.constant 0.000000e+00 : f32
    %340 = vector.broadcast %cst_392 : f32 to vector<64x32xf32>
    %c0_393 = arith.constant 0 : index
    %c0_394 = arith.constant 0 : index
    %c0_395 = arith.constant 0 : index
    %c0_396 = arith.constant 0 : index
    %c0_397 = arith.constant 0 : index
    %341 = vector.load %arg7[%c0_393, %c0_394, %c0_395, %c0_396, %c0_397] : memref<2x2x9x9x32xf32, #tpu.memory_space<vmem>>, vector<1x1x8x8x32xf32>
    %342 = vector.shape_cast %341 : vector<1x1x8x8x32xf32> to vector<8x8x32xf32>
    %343 = vector.shape_cast %342 : vector<8x8x32xf32> to vector<64x32xf32>
    %344 = arith.truncf %343 : vector<64x32xf32> to vector<64x32xbf16>
    %c0_398 = arith.constant 0 : index
    %c0_399 = arith.constant 0 : index
    %c0_400 = arith.constant 0 : index
    %345 = vector.load %arg4[%c0_398, %c0_399, %c0_400] : memref<9x32x32xbf16, #tpu.memory_space<vmem>>, vector<1x32x32xbf16>
    %346 = vector.shape_cast %345 : vector<1x32x32xbf16> to vector<32x32xbf16>
    %cst_401 = arith.constant dense<0.000000e+00> : vector<64x32xf32>
    %347 = tpu.matmul %344, %346, %cst_401 {dimension_numbers = #tpu.dot_dimension_numbers<[1], [0], [0], [1], [0, 0, 1, 1], [], []>} : vector<64x32xbf16>, vector<32x32xbf16>, vector<64x32xf32> -> vector<64x32xf32>
    %348 = arith.addf %340, %347 : vector<64x32xf32>
    %c0_402 = arith.constant 0 : index
    %c1_403 = arith.constant 1 : index
    %c0_404 = arith.constant 0 : index
    %c0_405 = arith.constant 0 : index
    %c0_406 = arith.constant 0 : index
    %349 = vector.load %arg7[%c0_402, %c1_403, %c0_404, %c0_405, %c0_406] : memref<2x2x9x9x32xf32, #tpu.memory_space<vmem>>, vector<1x1x8x8x32xf32>
    %350 = vector.shape_cast %349 : vector<1x1x8x8x32xf32> to vector<8x8x32xf32>
    %351 = vector.shape_cast %350 : vector<8x8x32xf32> to vector<64x32xf32>
    %352 = arith.truncf %351 : vector<64x32xf32> to vector<64x32xbf16>
    %c1_407 = arith.constant 1 : index
    %c0_408 = arith.constant 0 : index
    %c0_409 = arith.constant 0 : index
    %353 = vector.load %arg4[%c1_407, %c0_408, %c0_409] : memref<9x32x32xbf16, #tpu.memory_space<vmem>>, vector<1x32x32xbf16>
    %354 = vector.shape_cast %353 : vector<1x32x32xbf16> to vector<32x32xbf16>
    %cst_410 = arith.constant dense<0.000000e+00> : vector<64x32xf32>
    %355 = tpu.matmul %352, %354, %cst_410 {dimension_numbers = #tpu.dot_dimension_numbers<[1], [0], [0], [1], [0, 0, 1, 1], [], []>} : vector<64x32xbf16>, vector<32x32xbf16>, vector<64x32xf32> -> vector<64x32xf32>
    %356 = arith.addf %348, %355 : vector<64x32xf32>
    %c0_411 = arith.constant 0 : index
    %c0_412 = arith.constant 0 : index
    %c0_413 = arith.constant 0 : index
    %c1_414 = arith.constant 1 : index
    %c0_415 = arith.constant 0 : index
    %357 = vector.load %arg7[%c0_411, %c0_412, %c0_413, %c1_414, %c0_415] : memref<2x2x9x9x32xf32, #tpu.memory_space<vmem>>, vector<1x1x8x8x32xf32>
    %358 = vector.shape_cast %357 : vector<1x1x8x8x32xf32> to vector<8x8x32xf32>
    %359 = vector.shape_cast %358 : vector<8x8x32xf32> to vector<64x32xf32>
    %360 = arith.truncf %359 : vector<64x32xf32> to vector<64x32xbf16>
    %c2_416 = arith.constant 2 : index
    %c0_417 = arith.constant 0 : index
    %c0_418 = arith.constant 0 : index
    %361 = vector.load %arg4[%c2_416, %c0_417, %c0_418] : memref<9x32x32xbf16, #tpu.memory_space<vmem>>, vector<1x32x32xbf16>
    %362 = vector.shape_cast %361 : vector<1x32x32xbf16> to vector<32x32xbf16>
    %cst_419 = arith.constant dense<0.000000e+00> : vector<64x32xf32>
    %363 = tpu.matmul %360, %362, %cst_419 {dimension_numbers = #tpu.dot_dimension_numbers<[1], [0], [0], [1], [0, 0, 1, 1], [], []>} : vector<64x32xbf16>, vector<32x32xbf16>, vector<64x32xf32> -> vector<64x32xf32>
    %364 = arith.addf %356, %363 : vector<64x32xf32>
    %c1_420 = arith.constant 1 : index
    %c0_421 = arith.constant 0 : index
    %c0_422 = arith.constant 0 : index
    %c0_423 = arith.constant 0 : index
    %c0_424 = arith.constant 0 : index
    %365 = vector.load %arg7[%c1_420, %c0_421, %c0_422, %c0_423, %c0_424] : memref<2x2x9x9x32xf32, #tpu.memory_space<vmem>>, vector<1x1x8x8x32xf32>
    %366 = vector.shape_cast %365 : vector<1x1x8x8x32xf32> to vector<8x8x32xf32>
    %367 = vector.shape_cast %366 : vector<8x8x32xf32> to vector<64x32xf32>
    %368 = arith.truncf %367 : vector<64x32xf32> to vector<64x32xbf16>
    %c3_425 = arith.constant 3 : index
    %c0_426 = arith.constant 0 : index
    %c0_427 = arith.constant 0 : index
    %369 = vector.load %arg4[%c3_425, %c0_426, %c0_427] : memref<9x32x32xbf16, #tpu.memory_space<vmem>>, vector<1x32x32xbf16>
    %370 = vector.shape_cast %369 : vector<1x32x32xbf16> to vector<32x32xbf16>
    %cst_428 = arith.constant dense<0.000000e+00> : vector<64x32xf32>
    %371 = tpu.matmul %368, %370, %cst_428 {dimension_numbers = #tpu.dot_dimension_numbers<[1], [0], [0], [1], [0, 0, 1, 1], [], []>} : vector<64x32xbf16>, vector<32x32xbf16>, vector<64x32xf32> -> vector<64x32xf32>
    %372 = arith.addf %364, %371 : vector<64x32xf32>
    %c1_429 = arith.constant 1 : index
    %c1_430 = arith.constant 1 : index
    %c0_431 = arith.constant 0 : index
    %c0_432 = arith.constant 0 : index
    %c0_433 = arith.constant 0 : index
    %373 = vector.load %arg7[%c1_429, %c1_430, %c0_431, %c0_432, %c0_433] : memref<2x2x9x9x32xf32, #tpu.memory_space<vmem>>, vector<1x1x8x8x32xf32>
    %374 = vector.shape_cast %373 : vector<1x1x8x8x32xf32> to vector<8x8x32xf32>
    %375 = vector.shape_cast %374 : vector<8x8x32xf32> to vector<64x32xf32>
    %376 = arith.truncf %375 : vector<64x32xf32> to vector<64x32xbf16>
    %c4_434 = arith.constant 4 : index
    %c0_435 = arith.constant 0 : index
    %c0_436 = arith.constant 0 : index
    %377 = vector.load %arg4[%c4_434, %c0_435, %c0_436] : memref<9x32x32xbf16, #tpu.memory_space<vmem>>, vector<1x32x32xbf16>
    %378 = vector.shape_cast %377 : vector<1x32x32xbf16> to vector<32x32xbf16>
    %cst_437 = arith.constant dense<0.000000e+00> : vector<64x32xf32>
    %379 = tpu.matmul %376, %378, %cst_437 {dimension_numbers = #tpu.dot_dimension_numbers<[1], [0], [0], [1], [0, 0, 1, 1], [], []>} : vector<64x32xbf16>, vector<32x32xbf16>, vector<64x32xf32> -> vector<64x32xf32>
    %380 = arith.addf %372, %379 : vector<64x32xf32>
    %c1_438 = arith.constant 1 : index
    %c0_439 = arith.constant 0 : index
    %c0_440 = arith.constant 0 : index
    %c1_441 = arith.constant 1 : index
    %c0_442 = arith.constant 0 : index
    %381 = vector.load %arg7[%c1_438, %c0_439, %c0_440, %c1_441, %c0_442] : memref<2x2x9x9x32xf32, #tpu.memory_space<vmem>>, vector<1x1x8x8x32xf32>
    %382 = vector.shape_cast %381 : vector<1x1x8x8x32xf32> to vector<8x8x32xf32>
    %383 = vector.shape_cast %382 : vector<8x8x32xf32> to vector<64x32xf32>
    %384 = arith.truncf %383 : vector<64x32xf32> to vector<64x32xbf16>
    %c5_443 = arith.constant 5 : index
    %c0_444 = arith.constant 0 : index
    %c0_445 = arith.constant 0 : index
    %385 = vector.load %arg4[%c5_443, %c0_444, %c0_445] : memref<9x32x32xbf16, #tpu.memory_space<vmem>>, vector<1x32x32xbf16>
    %386 = vector.shape_cast %385 : vector<1x32x32xbf16> to vector<32x32xbf16>
    %cst_446 = arith.constant dense<0.000000e+00> : vector<64x32xf32>
    %387 = tpu.matmul %384, %386, %cst_446 {dimension_numbers = #tpu.dot_dimension_numbers<[1], [0], [0], [1], [0, 0, 1, 1], [], []>} : vector<64x32xbf16>, vector<32x32xbf16>, vector<64x32xf32> -> vector<64x32xf32>
    %388 = arith.addf %380, %387 : vector<64x32xf32>
    %c0_447 = arith.constant 0 : index
    %c0_448 = arith.constant 0 : index
    %c1_449 = arith.constant 1 : index
    %c0_450 = arith.constant 0 : index
    %c0_451 = arith.constant 0 : index
    %389 = vector.load %arg7[%c0_447, %c0_448, %c1_449, %c0_450, %c0_451] : memref<2x2x9x9x32xf32, #tpu.memory_space<vmem>>, vector<1x1x8x8x32xf32>
    %390 = vector.shape_cast %389 : vector<1x1x8x8x32xf32> to vector<8x8x32xf32>
    %391 = vector.shape_cast %390 : vector<8x8x32xf32> to vector<64x32xf32>
    %392 = arith.truncf %391 : vector<64x32xf32> to vector<64x32xbf16>
    %c6_452 = arith.constant 6 : index
    %c0_453 = arith.constant 0 : index
    %c0_454 = arith.constant 0 : index
    %393 = vector.load %arg4[%c6_452, %c0_453, %c0_454] : memref<9x32x32xbf16, #tpu.memory_space<vmem>>, vector<1x32x32xbf16>
    %394 = vector.shape_cast %393 : vector<1x32x32xbf16> to vector<32x32xbf16>
    %cst_455 = arith.constant dense<0.000000e+00> : vector<64x32xf32>
    %395 = tpu.matmul %392, %394, %cst_455 {dimension_numbers = #tpu.dot_dimension_numbers<[1], [0], [0], [1], [0, 0, 1, 1], [], []>} : vector<64x32xbf16>, vector<32x32xbf16>, vector<64x32xf32> -> vector<64x32xf32>
    %396 = arith.addf %388, %395 : vector<64x32xf32>
    %c0_456 = arith.constant 0 : index
    %c1_457 = arith.constant 1 : index
    %c1_458 = arith.constant 1 : index
    %c0_459 = arith.constant 0 : index
    %c0_460 = arith.constant 0 : index
    %397 = vector.load %arg7[%c0_456, %c1_457, %c1_458, %c0_459, %c0_460] : memref<2x2x9x9x32xf32, #tpu.memory_space<vmem>>, vector<1x1x8x8x32xf32>
    %398 = vector.shape_cast %397 : vector<1x1x8x8x32xf32> to vector<8x8x32xf32>
    %399 = vector.shape_cast %398 : vector<8x8x32xf32> to vector<64x32xf32>
    %400 = arith.truncf %399 : vector<64x32xf32> to vector<64x32xbf16>
    %c7_461 = arith.constant 7 : index
    %c0_462 = arith.constant 0 : index
    %c0_463 = arith.constant 0 : index
    %401 = vector.load %arg4[%c7_461, %c0_462, %c0_463] : memref<9x32x32xbf16, #tpu.memory_space<vmem>>, vector<1x32x32xbf16>
    %402 = vector.shape_cast %401 : vector<1x32x32xbf16> to vector<32x32xbf16>
    %cst_464 = arith.constant dense<0.000000e+00> : vector<64x32xf32>
    %403 = tpu.matmul %400, %402, %cst_464 {dimension_numbers = #tpu.dot_dimension_numbers<[1], [0], [0], [1], [0, 0, 1, 1], [], []>} : vector<64x32xbf16>, vector<32x32xbf16>, vector<64x32xf32> -> vector<64x32xf32>
    %404 = arith.addf %396, %403 : vector<64x32xf32>
    %c0_465 = arith.constant 0 : index
    %c0_466 = arith.constant 0 : index
    %c1_467 = arith.constant 1 : index
    %c1_468 = arith.constant 1 : index
    %c0_469 = arith.constant 0 : index
    %405 = vector.load %arg7[%c0_465, %c0_466, %c1_467, %c1_468, %c0_469] : memref<2x2x9x9x32xf32, #tpu.memory_space<vmem>>, vector<1x1x8x8x32xf32>
    %406 = vector.shape_cast %405 : vector<1x1x8x8x32xf32> to vector<8x8x32xf32>
    %407 = vector.shape_cast %406 : vector<8x8x32xf32> to vector<64x32xf32>
    %408 = arith.truncf %407 : vector<64x32xf32> to vector<64x32xbf16>
    %c8_470 = arith.constant 8 : index
    %c0_471 = arith.constant 0 : index
    %c0_472 = arith.constant 0 : index
    %409 = vector.load %arg4[%c8_470, %c0_471, %c0_472] : memref<9x32x32xbf16, #tpu.memory_space<vmem>>, vector<1x32x32xbf16>
    %410 = vector.shape_cast %409 : vector<1x32x32xbf16> to vector<32x32xbf16>
    %cst_473 = arith.constant dense<0.000000e+00> : vector<64x32xf32>
    %411 = tpu.matmul %408, %410, %cst_473 {dimension_numbers = #tpu.dot_dimension_numbers<[1], [0], [0], [1], [0, 0, 1, 1], [], []>} : vector<64x32xbf16>, vector<32x32xbf16>, vector<64x32xf32> -> vector<64x32xf32>
    %412 = arith.addf %404, %411 : vector<64x32xf32>
    %413 = vector.broadcast %3 : vector<1x32xf32> to vector<64x32xf32>
    %414 = arith.addf %412, %413 : vector<64x32xf32>
    %415 = tpu.transpose %414, [1, 0] : vector<64x32xf32> -> vector<32x64xf32>
    %c0_474 = arith.constant 0 : index
    %c0_475 = arith.constant 0 : index
    %c0_476 = arith.constant 0 : index
    %416 = vector.load %arg6[%c0_474, %c0_475, %c0_476] : memref<1x32x64xf32, #tpu.memory_space<vmem>>, vector<1x32x64xf32>
    %417 = vector.shape_cast %416 : vector<1x32x64xf32> to vector<32x64xf32>
    %418 = vector.shape_cast %415 : vector<32x64xf32> to vector<1x32x64xf32>
    tpu.vector_store %arg6[%c0_474, %c0_475, %c0_476], %418 {strides = array<i32>} : memref<1x32x64xf32, #tpu.memory_space<vmem>>, vector<1x32x64xf32>,
    return
  }
  func.func @transform_0(%arg0: i32) -> (i32, i32, i32, i32, i32, i32) {
    %c0_i32 = arith.constant 0 : i32
    %c0_i32_0 = arith.constant 0 : i32
    %c0_i32_1 = arith.constant 0 : i32
    %c0_i32_2 = arith.constant 0 : i32
    %c0_i32_3 = arith.constant 0 : i32
    %c0_i32_4 = arith.constant 0 : i32
    return %arg0, %c0_i32, %c0_i32_0, %c0_i32_1, %c0_i32_2, %c0_i32_3 : i32, i32, i32, i32, i32, i32
  }
  func.func @transform_1(%arg0: i32) -> (i32, i32, i32) {
    %c0_i32 = arith.constant 0 : i32
    %c0_i32_0 = arith.constant 0 : i32
    %c0_i32_1 = arith.constant 0 : i32
    %c0_i32_2 = arith.constant 0 : i32
    return %c0_i32, %c0_i32_0, %c0_i32_1 : i32, i32, i32
  }
  func.func @transform_2(%arg0: i32) -> (i32, i32) {
    %c0_i32 = arith.constant 0 : i32
    %c0_i32_0 = arith.constant 0 : i32
    %c0_i32_1 = arith.constant 0 : i32
    return %c0_i32, %c0_i32_0 : i32, i32
  }
  func.func @transform_3(%arg0: i32) -> (i32, i32, i32) {
    %c0_i32 = arith.constant 0 : i32
    %c0_i32_0 = arith.constant 0 : i32
    %c0_i32_1 = arith.constant 0 : i32
    %c0_i32_2 = arith.constant 0 : i32
    return %c0_i32, %c0_i32_0, %c0_i32_1 : i32, i32, i32
  }
  func.func @transform_4(%arg0: i32) -> (i32, i32) {
    %c0_i32 = arith.constant 0 : i32
    %c0_i32_0 = arith.constant 0 : i32
    %c0_i32_1 = arith.constant 0 : i32
    return %c0_i32, %c0_i32_0 : i32, i32
  }
  func.func @transform_5(%arg0: i32) -> (i32, i32, i32) {
    %c0_i32 = arith.constant 0 : i32
    %c0_i32_0 = arith.constant 0 : i32
    %c0_i32_1 = arith.constant 0 : i32
    return %arg0, %c0_i32, %c0_i32_0 : i32, i32, i32
  }
}

</mosaic_0001>

<bundles_post_ra>
// kernel: downsampling_block.1
= control target key start
LH: loop header
LB: loop body
LE: loop exit
PB: predicated region body
PF: predicated region fallthrough
CT: control target
= control target key end

     0   :  { %10 = vsyncpa [#allocation4], 0  ;;  %s8620_s0 = inlined_call_operand.hbm [shape: f32[2,2,2,9,9,16], index: 0, kind: input, shape index: {}]   ;;  %s8621_s1 = inlined_call_operand.hbm [shape: bf16[9,16,32], index: 1, kind: input, shape index: {}]   ;;  %s8622_s2 = inlined_call_operand.hbm [shape: f32[1,32], index: 2, kind: input, shape index: {}]   ;;  %s8623_s3 = inlined_call_operand.hbm [shape: bf16[9,32,32], index: 3, kind: input, shape index: {}]   ;;  %s8624_s4 = inlined_call_operand.hbm [shape: f32[1,32], index: 4, kind: input, shape index: {}]   ;;  %s8625_s5 = inlined_call_operand.hbm [shape: f32[2,32,64], index: 5, kind: output, shape index: {}]  }
   0x1   :  { %12 = vsyncpa [#allocation4 + $0x1], 0 }
   0x2   :  { %13 = vsyncpa [#allocation7], 0 }
   0x3   :  { %14 = vsyncpa [#allocation10], 0 }
   0x4   :  { %15 = vsyncpa [#allocation5], 0 }
   0x5   :  { %17 = vsyncpa [#allocation5 + $0x1], 0  ;;  %s7418_s18 = smov 0   ;;  %s7420_s19 = smov 0  }
   0x6   :  { %s7422_s20 = smov 0   ;;  %s7424_s21 = smov 0  }
   0x7 LB: > { %s7439_s22 = sadd.s32 4294967295, %s7373_s21   ;;  %s5462_s23 = sadd.s32 4294967294, %s7373_s21   ;;  %s7373_s21 = sphi %s7424_s21, %s8657_s21   ;;  %s7369_s20 = sphi %s7422_s20, %s8656_s20   ;;  %s7365_s19 = sphi %s7420_s19, %s8655_s19   ;;  %s7361_s18 = sphi %s7418_s18, %s8654_s18  }
   0x8   : > { %p43_p0 = scmp.ne.s32.totalorder %s7365_s19, %s7361_s18  ;;  %p8626_p1 = scmp.eq.s32.totalorder %s7439_s22, 0 }
   0x9   : > { %p157_p3 = scmp.eq.s32.totalorder %s5462_s23, 1  ;;  %p5463_p5 = scmp.ge.s32.totalorder %s7373_s21, 1 }
   0xa   : > { %p7448_p4 = por %p8626_p1, %p43_p0  ;;  %p164_p7 = scmp.lt.s32.totalorder %s7373_s21, 3 }
   0xb   : > { %p7453_p6 = por %p157_p3, %p43_p0  ;;  %s7375_s27 = smov [#allocation6]  }
   0xc   : > { %s8630_s24 = scalar_select %p7448_p4, 1, 0 }
   0xd   : > { %s8631_s25 = scalar_select %p7453_p6, 1, 0 }
   0xe   : > { %p7458_p8 = pnand %p5463_p5, %p164_p7  ;;  %s176_s28 = sshll.u32 %s7375_s27, 4  ;;  %s7462_s28 = int_to_ptr.vmem [resolvable:$true] %s176_s28 }
   0xf   : > { %s7376_s30 = smov [#allocation9]   ;;  %s7377_s7 = smov [#allocation8]  }
  0x10   : > { %s8632_s26 = scalar_select %p7458_p8, 1, 0 }
  0x11   : > { %p7029_p9 = pneg %p7458_p8  ;;  %s200_s6 = sshll.u32 %s7376_s30, 4  ;;  %s7473_s6 = int_to_ptr.vmem [resolvable:$true] %s200_s6 }
  0x12   : > { %s7475_s8 = sshll.u32 %s7377_s7, 4  ;;  %s7157_s11 = scalar_lea.hbm %s8621_s1, 1152  ;;  %s191_s8 = int_to_ptr.vmem [resolvable:$true] %s7475_s8 }
  0x13   : > { %p7469_p11 = pnand %p7029_p9, %p8626_p1  ;;  %p7158_p12 = scmp.ne.s32.totalorder %s8621_s1, %s7157_s11 }
  0x14   : > { %p7164_p5 = scmp.lt.u32.totalorder %s7157_s11, %s8621_s1 }
  0x15   : > { %p7485_p13 = pneg %p7469_p11 }
  0x17   : > { %p7160_p0 = pnand %p7485_p13, %p7158_p12 }
  0x19   : > { %p7161_p3 = pneg %p7160_p0 }
  0x1b   : > { %p7166_p7 = pnand %p7164_p5, %p7161_p3 }
  0x1d   : > { %7169 = shalt.err (!%p7166_p7)
}
  0x1e   : > { %s7170_s17 = scalar_lea.vmem %s7462_s28, 1152  ;;  %p7178_p2 = scmp.lt.s32.totalorder %s7462_s28, %s7462_s28 }
  0x1f   : > { %p7171_p9 = scmp.ne.s32.totalorder %s7462_s28, %s7170_s17  ;;  %p7179_p6 = scmp.lt.s32.totalorder %s7170_s17, %s7170_s17 }
  0x21   : > { %p7173_p10 = pnand %p7171_p9, %p7485_p13  ;;  %p7180_p12 = por %p7179_p6, %p7178_p2 }
  0x23   : > { %p7174_p1 = pneg %p7173_p10 }
  0x25   : > { %p7181_p0 = pnand %p7180_p12, %p7174_p1 }
  0x27   : > { %7184 = shalt.err (!%p7181_p0)
}
  0x28   : > { %s7378_s23 = smov 64   ;;  %s7379_s27 = smov 4  }
  0x29   : > { %7032 = dma.hbm_to_vmem [thread:$0]  (!%p7469_p11), %s8621_s1, 1152, %s7462_s28, [#allocation7], %s7378_s23, %s7378_s23, %s7379_s27  }
  0x2a   : > { %s7185_s11 = scalar_lea.hbm %s8623_s3, 2304 }
  0x2b   : > { %p7186_p2 = scmp.ne.s32.totalorder %s8623_s3, %s7185_s11  ;;  %p7192_p10 = scmp.lt.u32.totalorder %s7185_s11, %s8623_s3 }
  0x2d   : > { %p7188_p1 = pnand %p7186_p2, %p7485_p13 }
  0x2f   : > { %p7189_p6 = pneg %p7188_p1 }
  0x31   : > { %p7194_p3 = pnand %p7192_p10, %p7189_p6 }
  0x33   : > { %7197 = shalt.err (!%p7194_p3)
}
  0x34   : > { %s7198_s28 = scalar_lea.vmem %s7473_s6, 2304  ;;  %p7206_p12 = scmp.lt.s32.totalorder %s7473_s6, %s7473_s6 }
  0x35   : > { %p7199_p5 = scmp.ne.s32.totalorder %s7473_s6, %s7198_s28  ;;  %p7207_p0 = scmp.lt.s32.totalorder %s7198_s28, %s7198_s28 }
  0x37   : > { %p7201_p7 = pnand %p7199_p5, %p7485_p13  ;;  %p7208_p2 = por %p7207_p0, %p7206_p12 }
  0x39   : > { %p7202_p9 = pneg %p7201_p7 }
  0x3b   : > { %p7209_p1 = pnand %p7208_p2, %p7202_p9 }
  0x3d   : > { %7212 = shalt.err (!%p7209_p1)
}
  0x3e   : > { %7038 = dma.hbm_to_vmem [thread:$0]  (!%p7469_p11), %s8623_s3, 2304, %s7473_s6, [#allocation10], %s7378_s23, %s7378_s23, %s7379_s27  }
  0x3f   : > { %s7213_s10 = scalar_lea.hbm %s8622_s2, 16 }
  0x40   : > { %p7214_p6 = scmp.ne.s32.totalorder %s8622_s2, %s7213_s10  ;;  %p7220_p5 = scmp.lt.u32.totalorder %s7213_s10, %s8622_s2 }
  0x42   : > { %p7216_p10 = pnand %p7214_p6, %p7485_p13 }
  0x44   : > { %p7217_p3 = pneg %p7216_p10 }
  0x46   : > { %p7222_p7 = pnand %p7220_p5, %p7217_p3 }
  0x48   : > { %7225 = shalt.err (!%p7222_p7)
}
  0x49   : > { %s7226_s16 = scalar_lea.vmem %s191_s8, 16  ;;  %s7233_s6 = scalar_lea.vmem %s191_s8, 32 }
  0x4a   : > { %p7227_p9 = scmp.ne.s32.totalorder %s191_s8, %s7226_s16  ;;  %p7234_p2 = scmp.lt.s32.totalorder %s191_s8, %s191_s8 }
  0x4b   : > { %p7235_p1 = scmp.lt.s32.totalorder %s7233_s6, %s7226_s16 }
  0x4c   : > { %p7229_p12 = pnand %p7227_p9, %p7485_p13 }
  0x4d   : > { %p7236_p4 = por %p7235_p1, %p7234_p2 }
  0x4e   : > { %p7230_p0 = pneg %p7229_p12 }
  0x50   : > { %p7237_p8 = pnand %p7236_p4, %p7230_p0 }
  0x52   : > { %7240 = shalt.err (!%p7237_p8)
}
  0x53   : > { %7035 = dma.hbm_to_vmem [thread:$0]  (!%p7469_p11), %s8622_s2, 16, %s191_s8, [#allocation7]  }
  0x54   : > { %s7380_s28 = smov [#allocation11]   ;;  %s7241_s9 = scalar_lea.hbm %s8624_s4, 16 }
  0x55   : > { %s214_s17 = sshll.u32 %s7380_s28, 4  ;;  %p7242_p6 = scmp.ne.s32.totalorder %s8624_s4, %s7241_s9  ;;  %s215_s17 = int_to_ptr.vmem [resolvable:$true] %s214_s17 }
  0x56   : > { %p7248_p10 = scmp.lt.u32.totalorder %s7241_s9, %s8624_s4 }
  0x57   : > { %p7244_p4 = pnand %p7242_p6, %p7485_p13 }
  0x59   : > { %p7245_p8 = pneg %p7244_p4 }
  0x5b   : > { %p7250_p3 = pnand %p7248_p10, %p7245_p8 }
  0x5d   : > { %7253 = shalt.err (!%p7250_p3)
}
  0x5e   : > { %s7254_s8 = scalar_lea.vmem %s215_s17, 16  ;;  %s7261_s15 = scalar_lea.vmem %s215_s17, 32 }
  0x5f   : > { %p7255_p5 = scmp.ne.s32.totalorder %s215_s17, %s7254_s8  ;;  %p7262_p12 = scmp.lt.s32.totalorder %s215_s17, %s215_s17 }
  0x60   : > { %p7263_p0 = scmp.lt.s32.totalorder %s7261_s15, %s7254_s8 }
  0x61   : > { %p7257_p7 = pnand %p7255_p5, %p7485_p13 }
  0x62   : > { %p7264_p2 = por %p7263_p0, %p7262_p12 }
  0x63   : > { %p7258_p9 = pneg %p7257_p7 }
  0x65   : > { %p7265_p1 = pnand %p7264_p2, %p7258_p9 }
  0x67   : > { %7268 = shalt.err (!%p7265_p1)
}
  0x68   : > { %7041 = dma.hbm_to_vmem [thread:$0]  (!%p7469_p11), %s8624_s4, 16, %s215_s17, [#allocation10]  }
  0x69   : > { %s7567_s14 = sadd.s32 1, %s7373_s21   ;;  %s30_s23 = sadd.s32 1, %s7369_s20 }
  0x6a   : > { %s27_s29 = ssub.s32 %s7373_s21, %s7567_s14  ;;  %p37_p13 = scmp.ne.s32.totalorder %s7369_s20, %s7365_s19 }
  0x6b   : > { %p28_p6 = scmp.eq.s32.totalorder %s27_s29, 0  ;;  %p38_p4 = scmp.eq.s32.totalorder %s7373_s21, 0 }
  0x6c   : > { %p8635_p8 = scmp.eq.s32.totalorder %s7439_s22, 1  ;;  %p7054_p3 = scmp.lt.s32.totalorder %s7373_s21, 2 }
  0x6d   : > { %s7583_s28 = scalar_select %p28_p6, %s7369_s20, %s30_s23  }
  0x6e   : > { %p7577_p10 = por %p8635_p8, %p37_p13  ;;  %p39_p5 = por %p38_p4, %p37_p13 }
  0x6f   : > { %s225_s30 = sand.u32 1, %s7369_s20   ;;  %s7007_s17 = smul.u32 9216, %s7373_s21 }
  0x70   : > { %s7006_s7 = smul.u32 576, %s225_s30  ;;  %p7587_p11 = pnand %p7054_p3, %p39_p5 }
  0x71   : > { %s7594_s12 = scalar_lea.hbm %s8620_s0, %s7007_s17  ;;  %s7598_s15 = scalar_lea.sflag [#allocation4], %s225_s30 }
  0x72   : > { %s229_s13 = scalar_lea.vmem [#allocation3], %s7006_s7  ;;  %s7269_s16 = scalar_lea.hbm %s7594_s12, 9216 }
  0x73   : > { %s236_s8 = sshll.u32 %s229_s13, 4  ;;  %p7270_p7 = scmp.ne.s32.totalorder %s7594_s12, %s7269_s16  ;;  %s7596_s8 = int_to_ptr.vmem [resolvable:$true] %s236_s8 }
  0x74   : > { %p7271_p9 = pneg %p7587_p11  ;;  %s7274_s29 = scalar_lea.hbm %s8620_s0, 18432 }
  0x75   : > { %p7275_p2 = scmp.lt.u32.totalorder %s7594_s12, %s8620_s0  ;;  %p7276_p1 = scmp.lt.u32.totalorder %s7274_s29, %s7269_s16 }
  0x76   : > { %p7272_p12 = pnand %p7271_p9, %p7270_p7  ;;  %p7278_p6 = scmp.lt.u32.totalorder %s7269_s16, %s7594_s12 }
  0x77   : > { %p7277_p13 = por %p7276_p1, %p7275_p2 }
  0x78   : > { %p7273_p0 = pneg %p7272_p12 }
  0x79   : > { %p7279_p4 = por %p7278_p6, %p7277_p13 }
  0x7b   : > { %p7280_p8 = pnand %p7279_p4, %p7273_p0 }
  0x7d   : > { %7283 = shalt.err (!%p7280_p8)
}
  0x7e   : > { %s7284_s30 = scalar_lea.vmem %s7596_s8, 9216  ;;  %s7381_s7 = smov [#allocation3]  }
  0x7f   : > { %p7285_p3 = scmp.ne.s32.totalorder %s7596_s8, %s7284_s30  ;;  %s7289_s11 = sshll.u32 %s7381_s7, 4  ;;  %s7290_s11 = int_to_ptr.vmem [resolvable:$false] %s7289_s11 }
  0x80   : > { %s7291_s13 = scalar_lea.vmem %s7290_s11, 18432  ;;  %p7292_p12 = scmp.lt.s32.totalorder %s7596_s8, %s7290_s11 }
  0x81   : > { %p7287_p5 = pnand %p7285_p3, %p7271_p9  ;;  %p7293_p2 = scmp.lt.s32.totalorder %s7291_s13, %s7284_s30 }
  0x83   : > { %p7288_p7 = pneg %p7287_p5  ;;  %p7294_p1 = por %p7293_p2, %p7292_p12 }
  0x85   : > { %p7295_p13 = pnand %p7294_p1, %p7288_p7 }
  0x87   : > { %7298 = shalt.err (!%p7295_p13)
}
  0x88   : > { %s7382_s16 = smov 128   ;;  %s7383_s6 = smov 8  }
  0x89   : > { %7045 = dma.hbm_to_vmem [thread:$0]  (!%p7587_p11), %s7594_s12, 9216, %s7596_s8, %s7598_s15, %s7382_s16, %s7382_s16, %s7383_s6  }
  0x8a   : > { %p8638_p9 = scmp.ne.s32.totalorder %s8632_s26, 0 }
  0x8c   : > { %248 = sbr.rel (%p8638_p9) target bundleno = 1227 (0x4cb), region = 40 }
  0x93   : > { %s7629_s23 = sand.u32 1, %s7365_s19   ;;  %p8639_p0 = scmp.ne.s32.totalorder %s8630_s24, 0 }
  0x94   : > { %s7008_s29 = smul.u32 576, %s7629_s23  ;;  %s251_s17 = scalar_lea.sflag [#allocation4], %s7629_s23 }
  0x96   : > { %s7633_s10 = scalar_lea.vmem [#allocation3], %s7008_s29 }
  0x97   : > { %7344 = dma.done.wait (%p8639_p0), %s251_s17, 9216  }
  0x98   : > { %7346 = vsyncadd (%p8639_p0), %s251_s17, 4294958080  ;;  %p8640_p11 = scmp.eq.s32.totalorder %s7439_s22, 0 }
  0x9a   : > { %7348 = dma.done.wait (%p8640_p11), [#allocation7], 1168   ;;  %p8641_p6 = pmov %p8640_p11 }
  0x9c   : > { %7350 = vsyncadd (%p8641_p6), [#allocation7], 4294966128  ;;  %p8642_p4 = pmov %p8641_p6 }
  0x9e   : > { %7352 = dma.done.wait (%p8642_p4), [#allocation10], 2320   ;;  %p8643_p8 = pmov %p8642_p4 }
  0x9f   : > { %vm298_vm0 = vcmask 261120   ;;  %vm300_vm1 = vcmask 253952   ;;  %v7384_v0 = vmov 0.0   ;;  %v7103_v1 = vld [vmem:[#allocation6 + $0x8] sm:$0xff]   ;;  %v7698_v2 = vld [vmem:[#allocation6 + $0x20] sm:$0xff]   ;;  %v5476_v3 = vld [vmem:[%s7633_s10 + $0x90] sm:$0xff] }
  0xa0   : > { %7354 = vsyncadd (%p8643_p8), [#allocation10], 4294964976  ;;  %299 = vst.msk [vmem:[#allocation2] sm:$0xff] %vm298_vm0, %v7384_v0  ;;  %6216 = vmatprep.subr.bf16.mxu1 %v7103_v1  ;;  %v7702_v4 = vld [vmem:[%s7633_s10 + $0xa0] sm:$0xff]  ;;  %vm410_vm2 = vcmask 130048   ;;  %v5512_v5 = vld [vmem:[%s7633_s10 + $0x1b0] sm:$0xff]  ;;  %6256 = vmatprep.subr.bf16.mxu0 %v7698_v2 }
  0xa1   : > { %301 = vst.msk [vmem:[#allocation2 + $0x8] sm:$0x1] %vm300_vm1, %v7384_v0  ;;  %303 = vst.msk [vmem:[#allocation2 + $0x18] sm:$0x1] %vm300_vm1, %v7384_v0  ;;  %6217 = vmatpush3.bf16.msra.mxu1 %v7103_v1  ;;  %v7707_v6 = vpack.c.bf16 %v7702_v4, %v5476_v3  ;;  %v7710_v7 = vld [vmem:[%s7633_s10 + $0x1c0] sm:$0xff]  ;;  %v7713_v8 = vld [vmem:[%s7633_s10 + $0xb0] sm:$0xff]  ;;  %6257 = vmatpush3.bf16.msra.mxu0 %v7698_v2 }
  0xa2   : > { %302 = vst.msk [vmem:[#allocation2 + $0x10] sm:$0xff] %vm298_vm0, %v7384_v0  ;;  %304 = vst.msk [vmem:[#allocation2 + $0x20] sm:$0xff] %vm298_vm0, %v7384_v0  ;;  %v7716_v9 = vld [vmem:[%s7633_s10 + $0xc0] sm:$0xff]  ;;  %v7720_v10 = vpack.c.bf16 %v7710_v7, %v5512_v5  ;;  %v7729_v13 = vld [vmem:[%s7633_s10 + $0x1d0] sm:$0xff]  ;;  %s5475_s24 = sshll.u32 %s7629_s23, 5  ;;  %s5981_s12 = sshll.u32 %s7439_s22, 9 }
  0xa3   : > { %305 = vst.msk [vmem:[#allocation2 + $0x28] sm:$0x1] %vm300_vm1, %v7384_v0  ;;  %307 = vst.msk [vmem:[#allocation2 + $0x38] sm:$0x1] %vm300_vm1, %v7384_v0  ;;  %v7724_v11 = vpack.c.bf16 %v7716_v9, %v7713_v8  ;;  %v7105_v12 = vld [vmem:[#allocation6] sm:$0xff]   ;;  %6218 = vmatprep.mubr.msk.bf16.mxu1 %vm410_vm2, %v7707_v6  ;;  %v7735_v15 = vld [vmem:[%s7633_s10 + $0xd0] sm:$0xff]  ;;  %s8576_s30 = scalar_lea.hbm %s8625_s5, %s5981_s12 }
  0xa4   : > { %306 = vst.msk [vmem:[#allocation2 + $0x30] sm:$0xff] %vm298_vm0, %v7384_v0  ;;  %308 = vst.msk [vmem:[#allocation2 + $0x40] sm:$0xff] %vm298_vm0, %v7384_v0  ;;  %v7732_v14 = vld [vmem:[%s7633_s10 + $0x1e0] sm:$0xff]  ;;  %6258 = vmatprep.mubr.msk.bf16.mxu0 %vm410_vm2, %v7720_v10  ;;  %v7749_v18 = vld [vmem:[%s7633_s10 + $0xf0] sm:$0xff]  ;;  %6226 = vmatprep.subr.bf16.mxu1 %v7105_v12  ;;  %s296_s26 = scalar_lea.vmem [#allocation12], %s5475_s24  ;;  %s5338_s7 = scalar_lea.sflag [#allocation5], %s7629_s23 }
  0xa5   : > { %309 = vst.msk [vmem:[#allocation2 + $0x48] sm:$0x1] %vm300_vm1, %v7384_v0  ;;  %311 = vst.msk [vmem:[#allocation2 + $0x58] sm:$0x1] %vm300_vm1, %v7384_v0  ;;  %6219 = vmatmul.mubr.msk.bf16.vlgmr.msra.gmra.mrb[0].mxu1 %vm410_vm2, %v7724_v11  ;;  %v7743_v16 = vpack.c.bf16 %v7732_v14, %v7729_v13  ;;  %v7746_v17 = vld [vmem:[%s7633_s10 + $0xe0] sm:$0xff]  ;;  %v7106_v21 = vld [vmem:[#allocation6 + $0x28] sm:$0xff]  }
  0xa6   : > { %310 = vst.msk [vmem:[#allocation2 + $0x50] sm:$0xff] %vm298_vm0, %v7384_v0  ;;  %312 = vst.msk [vmem:[#allocation2 + $0x60] sm:$0xff] %vm298_vm0, %v7384_v0  ;;  %v7752_v19 = vld [vmem:[%s7633_s10 + $0x100] sm:$0xff]  ;;  %v7756_v20 = vpack.c.bf16 %v7746_v17, %v7735_v15  ;;  %6227 = vmatpush3.bf16.msra.mxu1 %v7105_v12  ;;  %v7762_v23 = vld [vmem:[%s7633_s10 + $0x131] sm:$0xff]  ;;  %6266 = vmatprep.subr.bf16.mxu0 %v7106_v21  ;;  %s5351_s9 = sshll.u32 %s296_s26, 4  ;;  %s7385_s22 = smov [#allocation12]   ;;  %s8571_s9 = int_to_ptr.vmem [resolvable:$true] %s5351_s9 }
  0xa7   : > { %313 = vst.msk [vmem:[#allocation2 + $0x68] sm:$0x1] %vm300_vm1, %v7384_v0  ;;  %315 = vst.msk [vmem:[#allocation2 + $0x78] sm:$0x1] %vm300_vm1, %v7384_v0  ;;  %6259 = vmatmul.mubr.msk.bf16.vlgmr.msra.gmra.mrb[0].mxu0 %vm410_vm2, %v7743_v16  ;;  %v5525_v22 = vld [vmem:[%s7633_s10 + $0x121] sm:$0xff]  ;;  %v375_v26 = vld [vmem:[%s7633_s10 + $0x10] sm:$0xff]  ;;  %v7773_v27 = vpack.c.bf16 %v7752_v19, %v7749_v18 }
  0xa8   : > { %314 = vst.msk [vmem:[#allocation2 + $0x70] sm:$0xff] %vm298_vm0, %v7384_v0  ;;  %316 = vst.msk [vmem:[#allocation2 + $0x80] sm:$0xff] %vm298_vm0, %v7384_v0  ;;  %6222 = vmatprep.mubr.msk.bf16.mxu1 %vm410_vm2, %v7756_v20  ;;  %v7767_v24 = vpack.c.bf16 %v7762_v23, %v5525_v22  ;;  %v374_v25 = vld [vmem:[%s7633_s10] sm:$0xff]  ;;  %6267 = vmatpush3.bf16.msra.mxu0 %v7106_v21  ;;  %v7107_v29 = vld [vmem:[#allocation6 + $0x10] sm:$0xff]   ;;  %v7873_v22 = vpack.c.bf16 %v7713_v8, %v7702_v4  ;;  %s7299_s11 = scalar_lea.vmem %s8571_s9, 512  ;;  %s7303_s13 = sshll.u32 %s7385_s22, 4  ;;  %s7304_s13 = int_to_ptr.vmem [resolvable:$false] %s7303_s13 }
  0xa9   : > { %317 = vst.msk [vmem:[#allocation2 + $0x88] sm:$0x1] %vm300_vm1, %v7384_v0  ;;  %337 = vst.msk [vmem:[#allocation2 + $0x128] sm:$0x1] %vm300_vm1, %v7384_v0  ;;  %v382_v28 = vpack.c.bf16 %v375_v26, %v374_v25  ;;  %v7778_v30 = vld [vmem:[%s7633_s10 + $0x141] sm:$0xff]  ;;  %v7781_v31 = vld [vmem:[%s7633_s10 + $0x151] sm:$0xff]  ;;  %6236 = vmatprep.subr.bf16.mxu1 %v7107_v29  ;;  %p7300_p3 = scmp.ne.s32.totalorder %s8571_s9, %s7299_s11  ;;  %p7306_p12 = scmp.lt.s32.totalorder %s8571_s9, %s7304_s13 }
  0xaa   : > { %318 = vst.msk [vmem:[#allocation2 + $0x90] sm:$0xff] %vm298_vm0, %v7384_v0  ;;  %320 = vst.msk [vmem:[#allocation2 + $0xa0] sm:$0xff] %vm298_vm0, %v7384_v0  ;;  %6268 = vmatprep.mubr.msk.bf16.mxu0 %vm410_vm2, %v7767_v24  ;;  %v7784_v32 = vld [vmem:[%s7633_s10 + $0x161] sm:$0xff]  ;;  %v7789_v33 = vld [vmem:[%s7633_s10 + $0x171] sm:$0xff]  ;;  %v7796_v37 = vpack.c.bf16 %v7781_v31, %v7778_v30  ;;  %s7305_s16 = scalar_lea.vmem %s7304_s13, 1024 }
  0xab   : > { %322 = vst.msk [vmem:[#allocation2 + $0xb0] sm:$0xff] %vm298_vm0, %v7384_v0  ;;  %324 = vst.msk [vmem:[#allocation2 + $0xc0] sm:$0xff] %vm298_vm0, %v7384_v0  ;;  %v376_v34 = vld [vmem:[%s7633_s10 + $0x20] sm:$0xff]  ;;  %v377_v35 = vld [vmem:[%s7633_s10 + $0x30] sm:$0xff]  ;;  %v7802_v40 = vpack.c.bf16 %v7789_v33, %v7784_v32  ;;  %p7301_p5 = pnand %p7300_p3, %p7577_p10  ;;  %p7307_p2 = scmp.lt.s32.totalorder %s7305_s16, %s7299_s11 }
  0xac   : > { %326 = vst.msk [vmem:[#allocation2 + $0xd0] sm:$0xff] %vm298_vm0, %v7384_v0  ;;  %328 = vst.msk [vmem:[#allocation2 + $0xe0] sm:$0xff] %vm298_vm0, %v7384_v0  ;;  %v7108_v36 = vld [vmem:[#allocation6 + $0x30] sm:$0xff]   ;;  %v378_v38 = vld [vmem:[%s7633_s10 + $0x40] sm:$0xff]  ;;  %v383_v41 = vpack.c.bf16 %v377_v35, %v376_v34  ;;  %v7826_v52 = vpack.c.bf16 %v376_v34, %v375_v26 }
  0xad   : > { %330 = vst.msk [vmem:[#allocation2 + $0xf0] sm:$0xff] %vm298_vm0, %v7384_v0  ;;  %332 = vst.msk [vmem:[#allocation2 + $0x100] sm:$0xff] %vm298_vm0, %v7384_v0  ;;  %6223 = vmatmul.mubr.msk.bf16.gmra.mrb[4].mxu1 %vm410_vm2, %v7773_v27  ;;  %v379_v39 = vld [vmem:[%s7633_s10 + $0x50] sm:$0xff]  ;;  %6276 = vmatprep.subr.bf16.mxu0 %v7108_v36  ;;  %v7109_v43 = vld [vmem:[#allocation6 + $0x18] sm:$0xff]   ;;  %v7842_v57 = vpack.c.bf16 %v378_v38, %v377_v35  ;;  %v7904_v35 = vpack.c.bf16 %v7735_v15, %v7716_v9  ;;  %p7302_p7 = pneg %p7301_p5  ;;  %p7308_p1 = por %p7307_p2, %p7306_p12 }
  0xae   : > { %334 = vst.msk [vmem:[#allocation2 + $0x110] sm:$0xff] %vm298_vm0, %v7384_v0  ;;  %336 = vst.msk [vmem:[#allocation2 + $0x120] sm:$0xff] %vm298_vm0, %v7384_v0  ;;  %6228 = vmatprep.mubr.msk.bf16.mxu1 %vm410_vm2, %v382_v28  ;;  %v384_v42 = vpack.c.bf16 %v379_v39, %v378_v38  ;;  %v7110_v44 = vld [vmem:[#allocation6 + $0x38] sm:$0xff]   ;;  %v7809_v45 = vld [vmem:[%s7633_s10 + $0x181] sm:$0xff] }
  0xaf   : > { %338 = vst.msk [vmem:[#allocation2 + $0x130] sm:$0xff] %vm298_vm0, %v7384_v0  ;;  %340 = vst.msk [vmem:[#allocation2 + $0x140] sm:$0xff] %vm298_vm0, %v7384_v0  ;;  %v7812_v46 = vld [vmem:[%s7633_s10 + $0x191] sm:$0xff]  ;;  %v380_v47 = vld [vmem:[%s7633_s10 + $0x60] sm:$0xff]  ;;  %p7309_p13 = pnand %p7308_p1, %p7302_p7 }
  0xb0   : > { %339 = vst.msk [vmem:[#allocation2 + $0x138] sm:$0x1] %vm300_vm1, %v7384_v0  ;;  %341 = vst.msk [vmem:[#allocation2 + $0x148] sm:$0x1] %vm300_vm1, %v7384_v0  ;;  %v381_v48 = vld [vmem:[%s7633_s10 + $0x70] sm:$0xff]  ;;  %v7820_v49 = vpack.c.bf16 %v7812_v46, %v7809_v45  ;;  %v571_v50 = vld [vmem:[%s7633_s10 + $0x1] sm:$0xff]  ;;  %v7846_v60 = vpack.c.bf16 %v380_v47, %v379_v39 }
  0xb1   : > { %342 = vst.msk [vmem:[#allocation2 + $0x150] sm:$0xff] %vm298_vm0, %v7384_v0  ;;  %344 = vst.msk [vmem:[#allocation2 + $0x160] sm:$0xff] %vm298_vm0, %v7384_v0  ;;  %v7824_v51 = vld [vmem:[%s7633_s10 + $0x11] sm:$0xff]  ;;  %v385_v53 = vpack.c.bf16 %v381_v48, %v380_v47  ;;  %v573_v55 = vld [vmem:[%s7633_s10 + $0x21] sm:$0xff] }
  0xb2   : > { %343 = vst.msk [vmem:[#allocation2 + $0x158] sm:$0x1] %vm300_vm1, %v7384_v0  ;;  %345 = vst.msk [vmem:[#allocation2 + $0x168] sm:$0x1] %vm300_vm1, %v7384_v0  ;;  %v7829_v54 = vpack.c.bf16 %v7824_v51, %v571_v50  ;;  %v7840_v56 = vld [vmem:[%s7633_s10 + $0x31] sm:$0xff]  ;;  %v575_v58 = vld [vmem:[%s7633_s10 + $0x41] sm:$0xff]  ;;  %v7948_v50 = vpack.c.bf16 %v573_v55, %v7824_v51 }
  0xb3   : > { %346 = vst.msk [vmem:[#allocation2 + $0x170] sm:$0xff] %vm298_vm0, %v7384_v0  ;;  %348 = vst.msk [vmem:[#allocation2 + $0x180] sm:$0xff] %vm298_vm0, %v7384_v0  ;;  %6269 = vmatmul.mubr.msk.bf16.vlgmr.msra.gmra.mrb[0].mxu0 %vm410_vm2, %v7796_v37  ;;  %v576_v59 = vld [vmem:[%s7633_s10 + $0x51] sm:$0xff]  ;;  %v7849_v61 = vpack.c.bf16 %v7840_v56, %v573_v55  ;;  %v7111_v62 = vld [vmem:[#allocation6 + $0x40] sm:$0xff]   ;;  %v7969_v51 = vpack.c.bf16 %v575_v58, %v7840_v56 }
  0xb4   : > { %347 = vst.msk [vmem:[#allocation2 + $0x178] sm:$0x1] %vm300_vm1, %v7384_v0  ;;  %349 = vst.msk [vmem:[#allocation2 + $0x188] sm:$0x1] %vm300_vm1, %v7384_v0  ;;  %6272 = vmatprep.mubr.msk.bf16.mxu0 %vm410_vm2, %v7802_v40  ;;  %6277 = vmatpush3.bf16.msra.mxu0 %v7108_v36  ;;  %v7851_v63 = vpack.c.bf16 %v576_v59, %v575_v58  ;;  %v577_v1 = vld [vmem:[%s7633_s10 + $0x61] sm:$0xff]  ;;  %v578_v3 = vld [vmem:[%s7633_s10 + $0x71] sm:$0xff]  ;;  %v7908_v36 = vpack.c.bf16 %v7749_v18, %v7746_v17 }
  0xb5   : > { %350 = vst.msk [vmem:[#allocation2 + $0x190] sm:$0xff] %vm298_vm0, %v7384_v0  ;;  %354 = vst.msk [vmem:[#allocation2 + $0x1b0] sm:$0xff] %vm298_vm0, %v7384_v0  ;;  %6229 = vmatmul.mubr.msk.bf16.vlgmr.msra.gmra.mrb[0].mxu1 %vm410_vm2, %v383_v41  ;;  %6286 = vmatprep.subr.bf16.mxu0 %v7110_v44  ;;  %v5499_v12 = vld [vmem:[%s7633_s10 + $0x120] sm:$0xff]  ;;  %v7868_v21 = vld [vmem:[%s7633_s10 + $0x130] sm:$0xff]  ;;  %v7875_v25 = vpack.c.bf16 %v578_v3, %v577_v1  ;;  %v7971_v55 = vpack.c.bf16 %v577_v1, %v576_v59 }
  0xb6   : > { %351 = vst.msk [vmem:[#allocation2 + $0x198] sm:$0x1] %vm300_vm1, %v7384_v0  ;;  %8644 = vst [vmem:[#allocation17_spill] sm:$0xff] %v7812_v46  ;;  %6237 = vmatpush3.bf16.msra.mxu1 %v7107_v29  ;;  %6232 = vmatprep.mubr.msk.bf16.mxu1 %vm410_vm2, %v384_v42  ;;  %v7878_v26 = vpack.c.bf16 %v7868_v21, %v5499_v12  ;;  %v7881_v28 = vld [vmem:[%s7633_s10 + $0x140] sm:$0xff]  ;;  %v7890_v34 = vld [vmem:[%s7633_s10 + $0x150] sm:$0xff] }
  0xb7   : > { %356 = vst.msk [vmem:[#allocation2 + $0x1c0] sm:$0xff] %vm298_vm0, %v7384_v0  ;;  %358 = vst.msk [vmem:[#allocation2 + $0x1d0] sm:$0xff] %vm298_vm0, %v7384_v0  ;;  %6246 = vmatprep.subr.bf16.mxu1 %v7109_v43  ;;  %v7895_v4 = vld [vmem:[%s7633_s10 + $0x160] sm:$0xff]  ;;  %v7898_v8 = vld [vmem:[%s7633_s10 + $0x170] sm:$0xff]  ;;  %v7915_v39 = vpack.c.bf16 %v7890_v34, %v7881_v28 }
  0xb8   : > { %360 = vst.msk [vmem:[#allocation2 + $0x1e0] sm:$0xff] %vm298_vm0, %v7384_v0  ;;  %362 = vst.msk [vmem:[#allocation2 + $0x1f0] sm:$0xff] %vm298_vm0, %v7384_v0  ;;  %v7911_v38 = vld [vmem:[%s7633_s10 + $0x180] sm:$0xff]  ;;  %v7112_v41 = vld [vmem:[#allocation6 + $0x8] sm:$0xff]   ;;  %v7922_v9 = vpack.c.bf16 %v7898_v8, %v7895_v4 }
  0xb9   : > { %364 = vst.msk [vmem:[#allocation2 + $0x200] sm:$0xff] %vm298_vm0, %v7384_v0  ;;  %366 = vst.msk [vmem:[#allocation2 + $0x210] sm:$0xff] %vm298_vm0, %v7384_v0  ;;  %v7113_v42 = vld [vmem:[#allocation6 + $0x8] sm:$0xff]   ;;  %v7931_v17 = vld [vmem:[%s7633_s10 + $0x190] sm:$0xff] }
  0xba   : > { %368 = vst.msk [vmem:[#allocation2 + $0x220] sm:$0xff] %vm298_vm0, %v7384_v0  ;;  %v5545_v0 = vld [vmem:[%s7633_s10 + $0x80] sm:$0xff]  ;;  %v7936_v18 = vld [vmem:[%s7633_s10 + $0x1f0] sm:$0xff] }
  0xbb   : > { %6273 = vmatmul.mubr.msk.bf16.gmra.mrb[4].mxu0 %vm410_vm2, %v7820_v49  ;;  %v7864_v5 = vpack.c.bf16 %v5545_v0, %v381_v48  ;;  %v7939_v47 = vld [vmem:[%s7633_s10 + $0x200] sm:$0xff]  ;;  %v7976_v12 = vld [vmem:[%s7633_s10 + $0x210] sm:$0xff] }
  0xbc   : > { %6278 = vmatprep.mubr.msk.bf16.mxu0 %vm410_vm2, %v7826_v52  ;;  %v5571_v58 = vld [vmem:[%s7633_s10 + $0x81] sm:$0xff]  ;;  %v5600_v15 = vld [vmem:[%s7633_s10 + $0xd1] sm:$0xff] }
  0xbd   : > { %6233 = vmatmul.mubr.msk.bf16.gmra.mrb[4].mxu1 %vm410_vm2, %v385_v53  ;;  %v7952_v53 = vpack.c.bf16 %v7931_v17, %v7911_v38  ;;  %v7992_v1 = vpack.c.bf16 %v5571_v58, %v578_v3  ;;  %v7114_v0 = vld [vmem:[#allocation6] sm:$0xff]   ;;  %v5602_v29 = vld [vmem:[%s7633_s10 + $0xf1] sm:$0xff] }
  0xbe   : > { %6238 = vmatprep.mubr.msk.bf16.mxu1 %vm410_vm2, %v7829_v54  ;;  %v5597_v56 = vld [vmem:[%s7633_s10 + $0xa1] sm:$0xff] }
  0xc3   : > { %6279 = vmatmul.mubr.msk.bf16.vlgmr.msra.gmra.mrb[0].mxu0 %vm410_vm2, %v7842_v57 }
  0xc4   : > { %6282 = vmatprep.mubr.msk.bf16.mxu0 %vm410_vm2, %v7846_v60  ;;  %6287 = vmatpush3.bf16.msra.mxu0 %v7110_v44  ;;  %v5558_v44 = vld [vmem:[%s7633_s10 + $0x110] sm:$0xff] }
  0xc5   : > { %6239 = vmatmul.mubr.msk.bf16.vlgmr.msra.gmra.mrb[0].mxu1 %vm410_vm2, %v7849_v61  ;;  %6296 = vmatprep.subr.bf16.mxu0 %v7111_v62  ;;  %v7945_v48 = vpack.c.bf16 %v5558_v44, %v7752_v19  ;;  %v7979_v44 = vld [vmem:[%s7633_s10 + $0x220] sm:$0xff]  ;;  %v5598_v19 = vld [vmem:[%s7633_s10 + $0xb1] sm:$0xff] }
  0xc6   : > { %6247 = vmatpush3.bf16.msra.mxu1 %v7109_v43  ;;  %6242 = vmatprep.mubr.msk.bf16.mxu1 %vm410_vm2, %v7851_v63  ;;  %v7990_v59 = vpack.c.bf16 %v7979_v44, %v7976_v12  ;;  %v8004_v3 = vpack.c.bf16 %v5598_v19, %v5597_v56  ;;  %v5601_v43 = vld [vmem:[%s7633_s10 + $0xe1] sm:$0xff] }
  0xc7   : > { %6684 = vmatprep.subr.bf16.mxu1 %v7698_v2  ;;  %v8018_v46 = vpack.c.bf16 %v5602_v29, %v5601_v43 }
  0xcb   : > { %6283 = vmatmul.mubr.msk.bf16.gmra.mrb[4].mxu0 %vm410_vm2, %v7864_v5 }
  0xcc   : > { %6288 = vmatprep.mubr.msk.bf16.mxu0 %vm410_vm2, %v7873_v22 }
  0xcd   : > { %6243 = vmatmul.mubr.msk.bf16.gmra.mrb[4].mxu1 %vm410_vm2, %v7875_v25 }
  0xce   : > { %6248 = vmatprep.mubr.msk.bf16.mxu1 %vm410_vm2, %v7878_v26 }
  0xd3   : > { %6289 = vmatmul.mubr.msk.bf16.vlgmr.msra.gmra.mrb[0].mxu0 %vm410_vm2, %v7904_v35 }
  0xd4   : > { %6292 = vmatprep.mubr.msk.bf16.mxu0 %vm410_vm2, %v7908_v36  ;;  %6297 = vmatpush3.bf16.msra.mxu0 %v7111_v62  ;;  %v7115_v62 = vld [vmem:[#allocation6] sm:$0xff]  }
  0xd5   : > { %6249 = vmatmul.mubr.msk.bf16.vlgmr.msra.gmra.mrb[0].mxu1 %vm410_vm2, %v7915_v39  ;;  %6396 = vmatprep.subr.bf16.mxu0 %v7113_v42 }
  0xd6   : > { %6685 = vmatpush3.bf16.msra.mxu1 %v7698_v2  ;;  %6252 = vmatprep.mubr.msk.bf16.mxu1 %vm410_vm2, %v7922_v9  ;;  %v7956_v2 = vpack.c.bf16 %v7939_v47, %v7936_v18 }
  0xd7   : > { %6306 = vmatprep.subr.bf16.mxu1 %v7112_v41 }
  0xdb   : > { %6293 = vmatmul.mubr.msk.bf16.gmra.mrb[4].mxu0 %vm410_vm2, %v7945_v48 }
  0xdc   : > { %6298 = vmatprep.mubr.msk.bf16.mxu0 %vm410_vm2, %v7948_v50 }
  0xdd   : > { %6253 = vmatmul.mubr.msk.bf16.gmra.mrb[4].mxu1 %vm410_vm2, %v7952_v53 }
  0xde   : > { %6262 = vmatprep.mubr.msk.bf16.mxu1 %vm410_vm2, %v7956_v2 }
  0xe3   : > { %6299 = vmatmul.mubr.msk.bf16.vlgmr.msra.gmra.mrb[0].mxu0 %vm410_vm2, %v7969_v51 }
  0xe4   : > { %6302 = vmatprep.mubr.msk.bf16.mxu0 %vm410_vm2, %v7971_v55  ;;  %6397 = vmatpush3.bf16.msra.mxu0 %v7113_v42  ;;  %v5599_v42 = vld [vmem:[%s7633_s10 + $0xc1] sm:$0xff] }
  0xe5   : > { %6406 = vmatprep.subr.bf16.mxu0 %v7115_v62  ;;  %v8008_v58 = vpack.c.bf16 %v5600_v15, %v5599_v42 }
  0xe9   : > { %6263 = vmatmul.mubr.msk.bf16.vlgmr.msra.gmra.mrb[4].mxu1 %vm410_vm2, %v7990_v59 }
  0xea   : > { %6307 = vmatpush3.bf16.msra.mxu1 %v7112_v41  ;;  %6308 = vmatprep.mubr.msk.bf16.mxu1 %vm410_vm2, %v7829_v54  ;;  %v7116_v41 = vld [vmem:[#allocation6 + $0x10] sm:$0xff]  }
  0xeb   : > { %6303 = vmatmul.mubr.msk.bf16.gmra.mrb[4].mxu0 %vm410_vm2, %v7992_v1  ;;  %6316 = vmatprep.subr.bf16.mxu1 %v7114_v0  ;;  %v7117_v54 = vld [vmem:[#allocation6 + $0x10] sm:$0xff]  }
  0xec   : > { %6398 = vmatprep.mubr.msk.bf16.mxu0 %vm410_vm2, %v7720_v10 }
  0xf1   : > { %6309 = vmatmul.mubr.msk.bf16.vlgmr.msra.gmra.mrb[8].mxu1 %vm410_vm2, %v7849_v61  ;;  %v7118_v61 = vld [vmem:[#allocation6 + $0x18] sm:$0xff]  }
  0xf2   : > { %6317 = vmatpush3.bf16.msra.mxu1 %v7114_v0  ;;  %6312 = vmatprep.mubr.msk.bf16.mxu1 %vm410_vm2, %v7851_v63  ;;  %v7119_v63 = vld [vmem:[#allocation6 + $0x18] sm:$0xff]   ;;  %v8130_v0 = vld [vmem:[%s7633_s10 + $0x221] sm:$0xff] }
  0xf3   : > { %6399 = vmatmul.mubr.msk.bf16.vlgmr.msra.gmra.mrb[8].mxu0 %vm410_vm2, %v7743_v16  ;;  %6326 = vmatprep.subr.bf16.mxu1 %v7116_v41 }
  0xf4   : > { %6402 = vmatprep.mubr.msk.bf16.mxu0 %vm410_vm2, %v7956_v2  ;;  %6407 = vmatpush3.bf16.msra.mxu0 %v7115_v62  ;;  %v8127_v62 = vld [vmem:[%s7633_s10 + $0x211] sm:$0xff] }
  0xf5   : > { %6416 = vmatprep.subr.bf16.mxu0 %v7117_v54 }
  0xf9   : > { %6313 = vmatmul.mubr.msk.bf16.gmra.mrb[12].mxu1 %vm410_vm2, %v7875_v25  ;;  %v5596_v25 = vld [vmem:[%s7633_s10 + $0x91] sm:$0xff] }
  0xfa   : > { %6318 = vmatprep.mubr.msk.bf16.mxu1 %vm410_vm2, %v7707_v6  ;;  %v1566_v6 = vpack.c.bf16 %v5597_v56, %v5596_v25  ;;  %v8138_v56 = vpack.c.bf16 %v8130_v0, %v8127_v62  ;;  %v8248_v25 = vld [vmem:[%s7633_s10 + $0x191] sm:$0xff] }
  0xfb   : > { %6403 = vmatmul.mubr.msk.bf16.gmra.mrb[12].mxu0 %vm410_vm2, %v7990_v59 }
  0xfc   : > { %6408 = vmatprep.mubr.msk.bf16.mxu0 %vm410_vm2, %v7878_v26  ;;  %v7120_v26 = vld [vmem:[#allocation6 + $0x20] sm:$0xff]  }
 0x101   : > { %6319 = vmatmul.mubr.msk.bf16.vlgmr.msra.gmra.mrb[8].mxu1 %vm410_vm2, %v7724_v11  ;;  %v1567_v11 = vpack.c.bf16 %v5599_v42, %v5598_v19  ;;  %v7127_v19 = vld [vmem:[#allocation6 + $0x38] sm:$0xff]   ;;  %v8645_v42 = vpack.c.bf16 %v7881_v28, %v7868_v21  ;;  %v8647_v21 = vpack.c.bf16 %v7911_v38, %v7898_v8  ;;  %v5772_v28 = vld [vmem:[%s7633_s10 + $0x1a0] sm:$0xff]  ;;  %v8649_v8 = vpack.c.bf16 %v7936_v18, %v7732_v14 }
 0x102   : > { %6327 = vmatpush3.bf16.msra.mxu1 %v7116_v41  ;;  %6322 = vmatprep.mubr.msk.bf16.mxu1 %vm410_vm2, %v7756_v20  ;;  %v1568_v20 = vpack.c.bf16 %v5601_v43, %v5600_v15  ;;  %v7122_v43 = vld [vmem:[#allocation6 + $0x28] sm:$0xff]   ;;  %v7128_v41 = vld [vmem:[#allocation6 + $0x40] sm:$0xff]   ;;  %v3168_v14 = vpack.c.bf16 %v7778_v30, %v7762_v23  ;;  %v3169_v38 = vpack.c.bf16 %v7784_v32, %v7781_v31  ;;  %v5681_v23 = vld [vmem:[%s7633_s10 + $0x111] sm:$0xff] }
 0x103   : > { %6409 = vmatmul.mubr.msk.bf16.vlgmr.msra.gmra.mrb[8].mxu0 %vm410_vm2, %v7915_v39  ;;  %6336 = vmatprep.subr.bf16.mxu1 %v7118_v61  ;;  %v7121_v39 = vld [vmem:[#allocation6 + $0x20] sm:$0xff]   ;;  %v7123_v15 = vld [vmem:[#allocation6 + $0x28] sm:$0xff]   ;;  %v3170_v18 = vpack.c.bf16 %v7809_v45, %v7789_v33  ;;  %v8210_v31 = vld [vmem:[%s7633_s10 + $0x131] sm:$0xff] }
 0x104   : > { %6412 = vmatprep.mubr.msk.bf16.mxu0 %vm410_vm2, %v7922_v9  ;;  %6417 = vmatpush3.bf16.msra.mxu0 %v7117_v54  ;;  %v8049_v9 = vld [vmem:[%s7633_s10 + $0x101] sm:$0xff] }
 0x105   : > { %6426 = vmatprep.subr.bf16.mxu0 %v7119_v63  ;;  %v7129_v54 = vld [vmem:[#allocation6 + $0x40] sm:$0xff]   ;;  %v8217_v33 = vpack.c.bf16 %v5681_v23, %v8049_v9 }
 0x106   : > { %v5812_v30 = vld [vmem:[%s7633_s10 + $0x121] sm:$0xff] }
 0x107   : > { %v8214_v32 = vld [vmem:[%s7633_s10 + $0x1a1] sm:$0xff]  ;;  %v3328_v45 = vpack.c.bf16 %v8210_v31, %v5812_v30 }
 0x109   : > { %6323 = vmatmul.mubr.msk.bf16.gmra.mrb[12].mxu1 %vm410_vm2, %v7773_v27  ;;  %v1569_v27 = vpack.c.bf16 %v8049_v9, %v5602_v29  ;;  %v8263_v9 = vld [vmem:[%s7633_s10 + $0x1e0] sm:$0xff] }
 0x10a   : > { %6328 = vmatprep.mubr.msk.bf16.mxu1 %vm410_vm2, %v1566_v6  ;;  %v5804_v6 = vld [vmem:[%s7633_s10 + $0x1b0] sm:$0xff] }
 0x10b   : > { %6413 = vmatmul.mubr.msk.bf16.gmra.mrb[12].mxu0 %vm410_vm2, %v7952_v53  ;;  %v7126_v53 = vld [vmem:[#allocation6 + $0x38] sm:$0xff]  }
 0x10c   : > { %6418 = vmatprep.mubr.msk.bf16.mxu0 %vm410_vm2, %v7767_v24 }
 0x111   : > { %6329 = vmatmul.mubr.msk.bf16.vlgmr.msra.gmra.mrb[8].mxu1 %vm410_vm2, %v1567_v11  ;;  %v8252_v11 = vld [vmem:[%s7633_s10 + $0x1c0] sm:$0xff] }
 0x112   : > { %6337 = vmatpush3.bf16.msra.mxu1 %v7118_v61  ;;  %6332 = vmatprep.mubr.msk.bf16.mxu1 %vm410_vm2, %v1568_v20  ;;  %v7132_v61 = vld [vmem:[#allocation6 + $0x10] sm:$0xff]  }
 0x113   : > { %6419 = vmatmul.mubr.msk.bf16.vlgmr.msra.gmra.mrb[8].mxu0 %vm410_vm2, %v7796_v37  ;;  %6346 = vmatprep.subr.bf16.mxu1 %v7120_v26 }
 0x114   : > { %6422 = vmatprep.mubr.msk.bf16.mxu0 %vm410_vm2, %v7802_v40  ;;  %6427 = vmatpush3.bf16.msra.mxu0 %v7119_v63  ;;  %v8245_v63 = vld [vmem:[%s7633_s10 + $0x181] sm:$0xff] }
 0x115   : > { %6436 = vmatprep.subr.bf16.mxu0 %v7121_v39  ;;  %v3331_v20 = vpack.c.bf16 %v8248_v25, %v8245_v63 }
 0x119   : > { %6333 = vmatmul.mubr.msk.bf16.gmra.mrb[12].mxu1 %vm410_vm2, %v1569_v27 }
 0x11a   : > { %6338 = vmatprep.mubr.msk.bf16.mxu1 %vm410_vm2, %v7720_v10  ;;  %v7124_v10 = vld [vmem:[#allocation6 + $0x30] sm:$0xff]  }
 0x11b   : > { %6423 = vmatmul.mubr.msk.bf16.gmra.mrb[12].mxu0 %vm410_vm2, %v7820_v49 }
 0x11c   : > { %6428 = vmatprep.mubr.msk.bf16.mxu0 %vm410_vm2, %v7826_v52  ;;  %v8087_v52 = vld [vmem:[%s7633_s10 + $0x1c1] sm:$0xff] }
 0x121   : > { %6339 = vmatmul.mubr.msk.bf16.vlgmr.msra.gmra.mrb[8].mxu1 %vm410_vm2, %v7743_v16  ;;  %v7125_v16 = vld [vmem:[#allocation6 + $0x30] sm:$0xff]  }
 0x122   : > { %6347 = vmatpush3.bf16.msra.mxu1 %v7120_v26  ;;  %6342 = vmatprep.mubr.msk.bf16.mxu1 %vm410_vm2, %v7956_v2  ;;  %v3314_v26 = vpack.c.bf16 %v8252_v11, %v5804_v6  ;;  %v5860_v6 = vld [vmem:[%s7633_s10 + $0x51] sm:$0xff] }
 0x123   : > { %6429 = vmatmul.mubr.msk.bf16.vlgmr.msra.gmra.mrb[8].mxu0 %vm410_vm2, %v7842_v57  ;;  %6356 = vmatprep.subr.bf16.mxu1 %v7122_v43  ;;  %v8102_v57 = vld [vmem:[%s7633_s10 + $0x1e1] sm:$0xff] }
 0x124   : > { %6432 = vmatprep.mubr.msk.bf16.mxu0 %vm410_vm2, %v7846_v60  ;;  %6437 = vmatpush3.bf16.msra.mxu0 %v7121_v39  ;;  %v8107_v60 = vld [vmem:[%s7633_s10 + $0x1f1] sm:$0xff] }
 0x125   : > { %6446 = vmatprep.subr.bf16.mxu0 %v7123_v15  ;;  %v8260_v39 = vld [vmem:[%s7633_s10 + $0x1d0] sm:$0xff] }
 0x126   : > { %v3315_v27 = vpack.c.bf16 %v8263_v9, %v8260_v39 }
 0x129   : > { %6343 = vmatmul.mubr.msk.bf16.gmra.mrb[12].mxu1 %vm410_vm2, %v7990_v59 }
 0x12a   : > { %6348 = vmatprep.mubr.msk.bf16.mxu1 %vm410_vm2, %v7767_v24  ;;  %v5635_v24 = vld [vmem:[%s7633_s10 + $0x1b1] sm:$0xff] }
 0x12b   : > { %6433 = vmatmul.mubr.msk.bf16.gmra.mrb[12].mxu0 %vm410_vm2, %v7864_v5  ;;  %v8110_v5 = vld [vmem:[%s7633_s10 + $0x201] sm:$0xff] }
 0x12c   : > { %6438 = vmatprep.mubr.msk.bf16.mxu0 %vm410_vm2, %v7873_v22  ;;  %v8120_v29 = vpack.c.bf16 %v8110_v5, %v8107_v60 }
 0x131   : > { %6349 = vmatmul.mubr.msk.bf16.vlgmr.msra.gmra.mrb[8].mxu1 %vm410_vm2, %v7796_v37  ;;  %v8092_v37 = vpack.c.bf16 %v8087_v52, %v5635_v24 }
 0x132   : > { %6357 = vmatpush3.bf16.msra.mxu1 %v7122_v43  ;;  %6352 = vmatprep.mubr.msk.bf16.mxu1 %vm410_vm2, %v7802_v40  ;;  %v8099_v40 = vld [vmem:[%s7633_s10 + $0x1d1] sm:$0xff] }
 0x133   : > { %6439 = vmatmul.mubr.msk.bf16.vlgmr.msra.gmra.mrb[8].mxu0 %vm410_vm2, %v7904_v35  ;;  %6366 = vmatprep.subr.bf16.mxu1 %v7124_v10  ;;  %v7133_v43 = vld [vmem:[#allocation6 + $0x18] sm:$0xff]  }
 0x134   : > { %6442 = vmatprep.mubr.msk.bf16.mxu0 %vm410_vm2, %v7908_v36  ;;  %6447 = vmatpush3.bf16.msra.mxu0 %v7123_v15  ;;  %v7134_v15 = vld [vmem:[#allocation6 + $0x20] sm:$0xff]  }
 0x135   : > { %6456 = vmatprep.subr.bf16.mxu0 %v7125_v16 }
 0x139   : > { %6353 = vmatmul.mubr.msk.bf16.gmra.mrb[12].mxu1 %vm410_vm2, %v7820_v49  ;;  %v8116_v49 = vpack.c.bf16 %v8102_v57, %v8099_v40 }
 0x13a   : > { %6358 = vmatprep.mubr.msk.bf16.mxu1 %vm410_vm2, %v8092_v37 }
 0x13b   : > { %6443 = vmatmul.mubr.msk.bf16.gmra.mrb[12].mxu0 %vm410_vm2, %v7945_v48 }
 0x13c   : > { %6448 = vmatprep.mubr.msk.bf16.mxu0 %vm410_vm2, %v7948_v50 }
 0x141   : > { %6359 = vmatmul.mubr.msk.bf16.vlgmr.msra.gmra.mrb[8].mxu1 %vm410_vm2, %v8116_v49 }
 0x142   : > { %6367 = vmatpush3.bf16.msra.mxu1 %v7124_v10  ;;  %6362 = vmatprep.mubr.msk.bf16.mxu1 %vm410_vm2, %v8120_v29  ;;  %v5844_v10 = vld [vmem:[%s7633_s10 + $0xb0] sm:$0xff] }
 0x143   : > { %6449 = vmatmul.mubr.msk.bf16.vlgmr.msra.gmra.mrb[8].mxu0 %vm410_vm2, %v7969_v51  ;;  %6376 = vmatprep.subr.bf16.mxu1 %v7126_v53 }
 0x144   : > { %6452 = vmatprep.mubr.msk.bf16.mxu0 %vm410_vm2, %v7971_v55  ;;  %6457 = vmatpush3.bf16.msra.mxu0 %v7125_v16 }
 0x145   : > { %6466 = vmatprep.subr.bf16.mxu0 %v7127_v19 }
 0x149   : > { %6363 = vmatmul.mubr.msk.bf16.gmra.mrb[12].mxu1 %vm410_vm2, %v8138_v56 }
 0x14a   : > { %6368 = vmatprep.mubr.msk.bf16.mxu1 %vm410_vm2, %v7873_v22  ;;  %v8646_v22 = vpack.c.bf16 %v7895_v4, %v7890_v34  ;;  %v8648_v34 = vpack.c.bf16 %v7729_v13, %v7710_v7  ;;  %v7130_v4 = vld [vmem:[#allocation6 + $0x8] sm:$0xff]   ;;  %v8186_v7 = vld [vmem:[%s7633_s10 + $0x230] sm:$0xff] }
 0x14b   : > { %6453 = vmatmul.mubr.msk.bf16.gmra.mrb[12].mxu0 %vm410_vm2, %v7992_v1  ;;  %v3066_v13 = vpack.c.bf16 %v8186_v7, %v7979_v44 }
 0x14c   : > { %6458 = vmatprep.mubr.msk.bf16.mxu0 %vm410_vm2, %v8645_v42  ;;  %v5848_v42 = vld [vmem:[%s7633_s10 + $0xf0] sm:$0xff] }
 0x151   : > { %6369 = vmatmul.mubr.msk.bf16.vlgmr.msra.gmra.mrb[8].mxu1 %vm410_vm2, %v7904_v35  ;;  %v2960_v35 = vpack.c.bf16 %v5772_v28, %v7931_v17  ;;  %v7131_v17 = vld [vmem:[#allocation6] sm:$0xff]   ;;  %v5856_v28 = vld [vmem:[%s7633_s10 + $0x11] sm:$0xff] }
 0x152   : > { %6377 = vmatpush3.bf16.msra.mxu1 %v7126_v53  ;;  %6372 = vmatprep.mubr.msk.bf16.mxu1 %vm410_vm2, %v7908_v36  ;;  %v8650_v36 = vpack.c.bf16 %v7976_v12, %v7939_v47  ;;  %v8651_v47 = vld [vmem:[#allocation17_spill] sm:$0xff]  ;;  %v8236_v12 = vld [vmem:[%s7633_s10 + $0x171] sm:$0xff] }
 0x153   : > { %6459 = vmatmul.mubr.msk.bf16.vlgmr.msra.gmra.mrb[8].mxu0 %vm410_vm2, %v8646_v22  ;;  %6386 = vmatprep.subr.bf16.mxu1 %v7128_v41  ;;  %v5846_v53 = vld [vmem:[%s7633_s10 + $0xd0] sm:$0xff]  ;;  %v8287_v22 = vld [vmem:[#allocation6 + $0x28] sm:$0xff]  }
 0x154   : > { %6462 = vmatprep.mubr.msk.bf16.mxu0 %vm410_vm2, %v8647_v21  ;;  %6467 = vmatpush3.bf16.msra.mxu0 %v7127_v19  ;;  %v5850_v21 = vld [vmem:[%s7633_s10 + $0x110] sm:$0xff] }
 0x155   : > { %6476 = vmatprep.subr.bf16.mxu0 %v7129_v54 }
 0x159   : > { %6373 = vmatmul.mubr.msk.bf16.gmra.mrb[12].mxu1 %vm410_vm2, %v7945_v48  ;;  %v3171_v48 = vpack.c.bf16 %v8214_v32, %v8651_v47 }
 0x15a   : > { %6378 = vmatprep.mubr.msk.bf16.mxu1 %vm410_vm2, %v7948_v50  ;;  %v8226_v50 = vld [vmem:[%s7633_s10 + $0x141] sm:$0xff] }
 0x15b   : > { %6463 = vmatmul.mubr.msk.bf16.gmra.mrb[12].mxu0 %vm410_vm2, %v2960_v35  ;;  %v5857_v35 = vld [vmem:[%s7633_s10 + $0x21] sm:$0xff] }
 0x15c   : > { %6468 = vmatprep.mubr.msk.bf16.mxu0 %vm410_vm2, %v8648_v34 }
 0x161   : > { %6379 = vmatmul.mubr.msk.bf16.vlgmr.msra.gmra.mrb[8].mxu1 %vm410_vm2, %v7969_v51  ;;  %v8229_v51 = vld [vmem:[%s7633_s10 + $0x151] sm:$0xff] }
 0x162   : > { %6387 = vmatpush3.bf16.msra.mxu1 %v7128_v41  ;;  %6382 = vmatprep.mubr.msk.bf16.mxu1 %vm410_vm2, %v7971_v55  ;;  %v8233_v55 = vld [vmem:[%s7633_s10 + $0x161] sm:$0xff]  ;;  %v3329_v44 = vpack.c.bf16 %v8229_v51, %v8226_v50 }
 0x163   : > { %6469 = vmatmul.mubr.msk.bf16.vlgmr.msra.gmra.mrb[8].mxu0 %vm410_vm2, %v8649_v8  ;;  %6486 = vmatprep.subr.bf16.mxu1 %v7130_v4 }
 0x164   : > { %6472 = vmatprep.mubr.msk.bf16.mxu0 %vm410_vm2, %v8650_v36  ;;  %6477 = vmatpush3.bf16.msra.mxu0 %v7129_v54  ;;  %v3718_v36 = vpack.c.bf16 %v5857_v35, %v5856_v28 }
 0x169   : > { %6383 = vmatmul.mubr.msk.bf16.gmra.mrb[12].mxu1 %vm410_vm2, %v7992_v1  ;;  %v3330_v1 = vpack.c.bf16 %v8236_v12, %v8233_v55 }
 0x16a   : > { %6388 = vmatprep.mubr.msk.bf16.mxu1 %vm410_vm2, %v8004_v3 }
 0x16b   : > { %6473 = vmatmul.mubr.msk.bf16.gmra.mrb[12].mxu0 %vm410_vm2, %v3066_v13 }
 0x16c   : > { %6478 = vmatprep.mubr.msk.bf16.mxu0 %vm410_vm2, %v3168_v14 }
 0x171   : > { %6389 = vmatmul.mubr.msk.bf16.vlgmr.msra.gmra.mrb[8].mxu1 %vm410_vm2, %v8008_v58 }
 0x172   : > { %6487 = vmatpush3.bf16.msra.mxu1 %v7130_v4  ;;  %6392 = vmatprep.mubr.msk.bf16.mxu1 %vm410_vm2, %v8018_v46  ;;  %v8296_v4 = vld [vmem:[#allocation8] ss:$0 sm:$0xff] }
 0x173   : > { %6479 = vmatmul.mubr.msk.bf16.vlgmr.msra.gmra.mrb[8].mxu0 %vm410_vm2, %v3169_v38  ;;  %6496 = vmatprep.subr.bf16.mxu1 %v7131_v17 }
 0x174   : > { %6482 = vmatprep.mubr.msk.bf16.mxu0 %vm410_vm2, %v3170_v18 }
 0x179   : > { %6393 = vmatmul.mubr.msk.bf16.gmra.mrb[12].mxu1 %vm410_vm2, %v8217_v33 }
 0x17a   : > { %6488 = vmatprep.mubr.msk.bf16.mxu1 %vm410_vm2, %v3328_v45 }
 0x17b   : > { %6483 = vmatmul.mubr.msk.bf16.gmra.mrb[12].mxu0 %vm410_vm2, %v3171_v48  ;;  %v5858_v48 = vld [vmem:[%s7633_s10 + $0x31] sm:$0xff] }
 0x181   : > { %6489 = vmatmul.mubr.msk.bf16.vlgmr.msra.gmra.mrb[16].mxu1 %vm410_vm2, %v3329_v44  ;;  %v5859_v44 = vld [vmem:[%s7633_s10 + $0x41] sm:$0xff] }
 0x182   : > { %6497 = vmatpush3.bf16.msra.mxu1 %v7131_v17  ;;  %6492 = vmatprep.mubr.msk.bf16.mxu1 %vm410_vm2, %v3330_v1 }
 0x183   : > { %6506 = vmatprep.subr.bf16.mxu1 %v7132_v61 }
 0x189   : > { %6493 = vmatmul.mubr.msk.bf16.gmra.mrb[20].mxu1 %vm410_vm2, %v3331_v20  ;;  %v5861_v20 = vld [vmem:[%s7633_s10 + $0x61] sm:$0xff] }
 0x18a   : > { %6498 = vmatprep.mubr.msk.bf16.mxu1 %vm410_vm2, %v3314_v26 }
 0x191   : > { %6499 = vmatmul.mubr.msk.bf16.vlgmr.msra.gmra.mrb[16].mxu1 %vm410_vm2, %v3315_v27 }
 0x192   : > { %6507 = vmatpush3.bf16.msra.mxu1 %v7132_v61  ;;  %6502 = vmatprep.mubr.msk.bf16.mxu1 %vm410_vm2, %v7956_v2  ;;  %v5843_v2 = vld [vmem:[%s7633_s10 + $0xa0] sm:$0xff] }
 0x193   : > { %6516 = vmatprep.subr.bf16.mxu1 %v7133_v43  ;;  %v3613_v16 = vpack.c.bf16 %v5844_v10, %v5843_v2 }
 0x199   : > { %6503 = vmatmul.mubr.msk.bf16.gmra.mrb[20].mxu1 %vm410_vm2, %v7990_v59 }
 0x19a   : > { %6508 = vmatprep.mubr.msk.bf16.mxu1 %vm410_vm2, %v8092_v37 }
 0x1a1   : > { %6509 = vmatmul.mubr.msk.bf16.vlgmr.msra.gmra.mrb[16].mxu1 %vm410_vm2, %v8116_v49  ;;  %v5845_v49 = vld [vmem:[%s7633_s10 + $0xc0] sm:$0xff] }
 0x1a2   : > { %6517 = vmatpush3.bf16.msra.mxu1 %v7133_v43  ;;  %6512 = vmatprep.mubr.msk.bf16.mxu1 %vm410_vm2, %v8120_v29  ;;  %v5847_v29 = vld [vmem:[%s7633_s10 + $0xe0] sm:$0xff]  ;;  %v3614_v41 = vpack.c.bf16 %v5846_v53, %v5845_v49  ;;  %v3720_v53 = vpack.c.bf16 %v5861_v20, %v5860_v6  ;;  %v7137_v6 = vld [vmem:[#allocation6 + $0x38] sm:$0xff]  }
 0x1a3   : > { %6526 = vmatprep.subr.bf16.mxu1 %v7134_v15  ;;  %v3615_v54 = vpack.c.bf16 %v5848_v42, %v5847_v29  ;;  %v7139_v20 = vld [vmem:[#allocation9 + $0x10] sm:$0xff]  }
 0x1a4   : > { %6576 = vmatprep.subr.bf16.mxu0 %v7139_v20 }
 0x1a5   : > { %6577 = vmatpush3.bf16.msra.mxu0 %v7139_v20 }
 0x1a8   : > { %v6250_v24 = vpop.f32.mrb[0].mxu1 }
 0x1a9   : > { %v745_v59 = vpop.f32.mrb[1].mxu1  ;;  %6513 = vmatmul.mubr.msk.bf16.gmra.mrb[20].mxu1 %vm410_vm2, %v8138_v56  ;;  %v5849_v56 = vld [vmem:[%s7633_s10 + $0x100] sm:$0xff] }
 0x1aa   : > { %v6251_v37 = vpop.f32.mrb[2].mxu1  ;;  %6518 = vmatprep.mubr.msk.bf16.mxu1 %vm410_vm2, %v3613_v16  ;;  %v3616_v34 = vpack.c.bf16 %v5850_v21, %v5849_v56  ;;  %v3719_v16 = vpack.c.bf16 %v5859_v44, %v5858_v48 }
 0x1ab   : > { %v748_v19 = vpop.f32.mrb[3].mxu1 }
 0x1b1   : > { %6519 = vmatmul.mubr.msk.bf16.vlgmr.msra.gmra.mrb[16].mxu1 %vm410_vm2, %v3614_v41 }
 0x1b2   : > { %6527 = vmatpush3.bf16.msra.mxu1 %v7134_v15  ;;  %6522 = vmatprep.mubr.msk.bf16.mxu1 %vm410_vm2, %v3615_v54  ;;  %v7136_v54 = vld [vmem:[#allocation6 + $0x30] sm:$0xff]  }
 0x1b3   : > { %6536 = vmatprep.subr.bf16.mxu1 %v8287_v22 }
 0x1b6   : > { %v6300_v8 = vpop.f32.mrb[0].mxu0 }
 0x1b7   : > { %v6686_v13 = vadd.f32 %v6300_v8, %v6250_v24  ;;  %v1278_v14 = vpop.f32.mrb[1].mxu0 }
 0x1b8   : > { %v6687_v38 = vadd.f32 %v1278_v14, %v745_v59  ;;  %v6301_v17 = vpop.f32.mrb[2].mxu0  ;;  %v5862_v14 = vld [vmem:[%s7633_s10 + $0x71] sm:$0xff] }
 0x1b9   : > { %v1325_v18 = vadd.f32 %v6686_v13, %v8296_v4  ;;  %v6688_v23 = vadd.f32 %v6301_v17, %v6251_v37  ;;  %v1281_v30 = vpop.f32.mrb[3].mxu0  ;;  %6523 = vmatmul.mubr.msk.bf16.gmra.mrb[20].mxu1 %vm410_vm2, %v3616_v34 }
 0x1ba   : > { %v1323_v45 = vadd.f32 %v6687_v38, %v8296_v4  ;;  %v6689_v47 = vadd.f32 %v1281_v30, %v748_v19  ;;  %6528 = vmatprep.mubr.msk.bf16.mxu1 %vm410_vm2, %v3718_v36  ;;  %v5863_v38 = vld [vmem:[%s7633_s10 + $0x81] sm:$0xff] }
 0x1bb   : > { %vm1333_vm3 = vcmp.ge.f32.partialorder %v1325_v18, 0.0  ;;  %v1341_v1 = vmul.f32 0.01, %v1325_v18  ;;  %v1326_v61 = vadd.f32 %v6688_v23, %v8296_v4  ;;  %v3721_v48 = vpack.c.bf16 %v5863_v38, %v5862_v14 }
 0x1bc   : > { %vm1331_vm4 = vcmp.ge.f32.partialorder %v1323_v45, 0.0  ;;  %v1339_v26 = vmul.f32 0.01, %v1323_v45  ;;  %v1324_v27 = vadd.f32 %v6689_v47, %v8296_v4  ;;  %v6264_v43 = vpop.f32.mrb[4].mxu1 }
 0x1bd   : > { %v1349_v15 = vsel %vm1333_vm3, %v1325_v18, %v1341_v1  ;;  %vm1334_vm5 = vcmp.ge.f32.partialorder %v1326_v61, 0.0  ;;  %v1342_v2 = vmul.f32 0.01, %v1326_v61  ;;  %v868_v10 = vpop.f32.mrb[5].mxu1 }
 0x1be   : > { %1358 = vst.msk [vmem:[#allocation2 + $0x1d0] sm:$0xff] %vm298_vm0, %v1349_v15  ;;  %v1347_v24 = vsel %vm1331_vm4, %v1323_v45, %v1339_v26  ;;  %vm1332_vm6 = vcmp.ge.f32.partialorder %v1324_v27, 0.0  ;;  %v1340_v59 = vmul.f32 0.01, %v1324_v27  ;;  %v6304_v37 = vpop.f32.mrb[4].mxu0  ;;  %v6265_v49 = vpop.f32.mrb[6].mxu1 }
 0x1bf   : > { %1356 = vst.msk [vmem:[#allocation2 + $0x1b0] sm:$0xff] %vm298_vm0, %v1347_v24  ;;  %v1350_v19 = vsel %vm1334_vm5, %v1326_v61, %v1342_v2  ;;  %v6690_v29 = vadd.f32 %v6304_v37, %v6264_v43  ;;  %v1294_v42 = vpop.f32.mrb[5].mxu0  ;;  %v871_v41 = vpop.f32.mrb[7].mxu1  ;;  %v7140_v26 = vld [vmem:[#allocation9 + $0x18] sm:$0xff]   ;;  %v5887_v43 = vld [vmem:[%s7633_s10 + $0x210] sm:$0xff] }
 0x1c0   : > { %1359 = vst.msk [vmem:[#allocation2 + $0x1e0] sm:$0xff] %vm298_vm0, %v1350_v19  ;;  %v1348_v56 = vsel %vm1332_vm6, %v1324_v27, %v1340_v59  ;;  %v6691_v21 = vadd.f32 %v1294_v42, %v868_v10  ;;  %v6305_v28 = vpop.f32.mrb[6].mxu0  ;;  %v3928_v27 = vpack.c.bf16 %v8260_v39, %v8252_v11  ;;  %6578 = vmatprep.subr.bf16.mxu0 %v7140_v26  ;;  %v7138_v2 = vld [vmem:[#allocation6 + $0x40] sm:$0xff]  }
 0x1c1   : > { %1357 = vst.msk [vmem:[#allocation2 + $0x1c0] sm:$0xff] %vm298_vm0, %v1348_v56  ;;  %v1329_v35 = vadd.f32 %v6690_v29, %v8296_v4  ;;  %v6692_v34 = vadd.f32 %v6305_v28, %v6265_v49  ;;  %v1297_v8 = vpop.f32.mrb[7].mxu0  ;;  %6529 = vmatmul.mubr.msk.bf16.vlgmr.msra.gmra.mrb[16].mxu1 %vm410_vm2, %v3719_v16  ;;  %6579 = vmatpush3.bf16.msra.mxu0 %v7140_v26  ;;  %v5888_v11 = vld [vmem:[%s7633_s10 + $0x220] sm:$0xff] }
 0x1c2   : > { %v1327_v36 = vadd.f32 %v6691_v21, %v8296_v4  ;;  %v6693_v13 = vadd.f32 %v1297_v8, %v871_v41  ;;  %6537 = vmatpush3.bf16.msra.mxu1 %v8287_v22  ;;  %6532 = vmatprep.mubr.msk.bf16.mxu1 %vm410_vm2, %v3720_v53  ;;  %v3931_v39 = vpack.c.bf16 %v8186_v7, %v5888_v11  ;;  %v4293_v11 = vld [vmem:[#allocation2 + $0x90] sm:$0xff] }
 0x1c3   : > { %vm1337_vm7 = vcmp.ge.f32.partialorder %v1329_v35, 0.0  ;;  %v1345_v17 = vmul.f32 0.01, %v1329_v35  ;;  %v1330_v18 = vadd.f32 %v6692_v34, %v8296_v4  ;;  %6546 = vmatprep.subr.bf16.mxu1 %v7136_v54  ;;  %v4035_v10 = vpack.c.bf16 %v8245_v63, %v8236_v12 }
 0x1c4   : > { %vm1335_vm8 = vcmp.ge.f32.partialorder %v1327_v36, 0.0  ;;  %v1343_v23 = vmul.f32 0.01, %v1327_v36  ;;  %v1328_v30 = vadd.f32 %v6693_v13, %v8296_v4  ;;  %v4036_v7 = vpack.c.bf16 %v8214_v32, %v8248_v25 }
 0x1c5   : > { %v1353_v45 = vsel %vm1337_vm7, %v1329_v35, %v1345_v17  ;;  %vm1338_vm9 = vcmp.ge.f32.partialorder %v1330_v18, 0.0  ;;  %v1346_v47 = vmul.f32 0.01, %v1330_v18 }
 0x1c6   : > { %1362 = vst.msk [vmem:[#allocation2 + $0x210] sm:$0xff] %vm298_vm0, %v1353_v45  ;;  %v1351_v22 = vsel %vm1335_vm8, %v1327_v36, %v1343_v23  ;;  %vm1336_vm10 = vcmp.ge.f32.partialorder %v1328_v30, 0.0  ;;  %v1344_v44 = vmul.f32 0.01, %v1328_v30 }
 0x1c7   : > { %1360 = vst.msk [vmem:[#allocation2 + $0x1f0] sm:$0xff] %vm298_vm0, %v1351_v22  ;;  %v1354_v1 = vsel %vm1338_vm9, %v1330_v18, %v1346_v47 }
 0x1c8   : > { %1363 = vst.msk [vmem:[#allocation2 + $0x220] sm:$0xff] %vm298_vm0, %v1354_v1  ;;  %v1352_v61 = vsel %vm1336_vm10, %v1328_v30, %v1344_v44 }
 0x1c9   : > { %1361 = vst.msk [vmem:[#allocation2 + $0x200] sm:$0xff] %vm298_vm0, %v1352_v61  ;;  %6533 = vmatmul.mubr.msk.bf16.gmra.mrb[20].mxu1 %vm410_vm2, %v3721_v48 }
 0x1ca   : > { %6538 = vmatprep.mubr.msk.bf16.mxu1 %vm410_vm2, %v8004_v3  ;;  %v5885_v3 = vld [vmem:[%s7633_s10 + $0x1f0] sm:$0xff] }
 0x1d1   : > { %6539 = vmatmul.mubr.msk.bf16.vlgmr.msra.gmra.mrb[16].mxu1 %vm410_vm2, %v8008_v58  ;;  %v5886_v58 = vld [vmem:[%s7633_s10 + $0x200] sm:$0xff] }
 0x1d2   : > { %6547 = vmatpush3.bf16.msra.mxu1 %v7136_v54  ;;  %6542 = vmatprep.mubr.msk.bf16.mxu1 %vm410_vm2, %v8018_v46  ;;  %v3929_v46 = vpack.c.bf16 %v5885_v3, %v8263_v9  ;;  %v3930_v15 = vpack.c.bf16 %v5887_v43, %v5886_v58  ;;  %v4034_v9 = vpack.c.bf16 %v8233_v55, %v8229_v51  ;;  %v5915_v55 = vld [vmem:[%s7633_s10 + $0x231] sm:$0xff] }
 0x1d3   : > { %6556 = vmatprep.subr.bf16.mxu1 %v7137_v6  ;;  %v4140_v51 = vpack.c.bf16 %v8127_v62, %v8110_v5  ;;  %v4141_v32 = vpack.c.bf16 %v5915_v55, %v8130_v0 }
 0x1d9   : > { %6543 = vmatmul.mubr.msk.bf16.gmra.mrb[20].mxu1 %vm410_vm2, %v8217_v33  ;;  %v4033_v33 = vpack.c.bf16 %v8226_v50, %v8210_v31  ;;  %v4138_v31 = vpack.c.bf16 %v8099_v40, %v8087_v52  ;;  %v4139_v50 = vpack.c.bf16 %v8107_v60, %v8102_v57 }
 0x1da   : > { %6548 = vmatprep.mubr.msk.bf16.mxu1 %vm410_vm2, %v3928_v27 }
 0x1e1   : > { %6549 = vmatmul.mubr.msk.bf16.vlgmr.msra.gmra.mrb[16].mxu1 %vm410_vm2, %v3929_v46 }
 0x1e2   : > { %6557 = vmatpush3.bf16.msra.mxu1 %v7137_v6  ;;  %6552 = vmatprep.mubr.msk.bf16.mxu1 %vm410_vm2, %v3930_v15 }
 0x1e3   : > { %6566 = vmatprep.subr.bf16.mxu1 %v7138_v2 }
 0x1e9   : > { %6553 = vmatmul.mubr.msk.bf16.gmra.mrb[20].mxu1 %vm410_vm2, %v3931_v39 }
 0x1ea   : > { %6558 = vmatprep.mubr.msk.bf16.mxu1 %vm410_vm2, %v4033_v33 }
 0x1f1   : > { %6559 = vmatmul.mubr.msk.bf16.vlgmr.msra.gmra.mrb[16].mxu1 %vm410_vm2, %v4034_v9 }
 0x1f2   : > { %6567 = vmatpush3.bf16.msra.mxu1 %v7138_v2  ;;  %6562 = vmatprep.mubr.msk.bf16.mxu1 %vm410_vm2, %v4035_v10 }
 0x1f9   : > { %6563 = vmatmul.mubr.msk.bf16.gmra.mrb[20].mxu1 %vm410_vm2, %v4036_v7 }
 0x1fa   : > { %6568 = vmatprep.mubr.msk.bf16.mxu1 %vm410_vm2, %v4138_v31 }
 0x201   : > { %6569 = vmatmul.mubr.msk.bf16.vlgmr.msra.gmra.mrb[16].mxu1 %vm410_vm2, %v4139_v50 }
 0x202   : > { %6572 = vmatprep.mubr.msk.bf16.mxu1 %vm410_vm2, %v4140_v51 }
 0x209   : > { %6573 = vmatmul.mubr.msk.bf16.gmra.mrb[20].mxu1 %vm410_vm2, %v4141_v32 }
 0x244   : > { %v6390_v52 = vpop.f32.mrb[8].mxu1 }
 0x245   : > { %v2295_v40 = vadd.f32 %v6390_v52, %v8296_v4  ;;  %v2254_v12 = vpop.f32.mrb[9].mxu1 }
 0x246   : > { %v6480_v63 = vpop.f32.mrb[8].mxu0  ;;  %v2293_v25 = vadd.f32 %v8296_v4, %v2254_v12  ;;  %v6391_v57 = vpop.f32.mrb[10].mxu1 }
 0x247   : > { %vm2303_vm11 = vcmp.ge.f32.partialorder %v2295_v40, 0.0  ;;  %v2311_v60 = vmul.f32 0.01, %v2295_v40  ;;  %v3267_v5 = vadd.f32 %v6480_v63, %v8296_v4  ;;  %v3226_v62 = vpop.f32.mrb[9].mxu0  ;;  %v2296_v16 = vadd.f32 %v6391_v57, %v8296_v4  ;;  %v2257_v24 = vpop.f32.mrb[11].mxu1 }
 0x248   : > { %vm2301_vm12 = vcmp.ge.f32.partialorder %v2293_v25, 0.0  ;;  %v2309_v0 = vmul.f32 0.01, %v2293_v25  ;;  %v3265_v59 = vadd.f32 %v8296_v4, %v3226_v62  ;;  %v6481_v37 = vpop.f32.mrb[10].mxu0  ;;  %v2294_v49 = vadd.f32 %v8296_v4, %v2257_v24 }
 0x249   : > { %v2319_v53 = vsel %vm2303_vm11, %v2295_v40, %v2311_v60  ;;  %vm3275_vm13 = vcmp.ge.f32.partialorder %v3267_v5, 0.0  ;;  %v3283_v19 = vmul.f32 0.01, %v3267_v5  ;;  %vm2304_vm14 = vcmp.ge.f32.partialorder %v2296_v16, 0.0  ;;  %v3229_v29 = vpop.f32.mrb[11].mxu0 }
 0x24a   : > { %2328 = vst.msk [vmem:[#allocation2 + $0x141] sm:$0xff] %vm298_vm0, %v2319_v53  ;;  %v2317_v42 = vsel %vm2301_vm12, %v2293_v25, %v2309_v0  ;;  %vm3273_vm15 = vcmp.ge.f32.partialorder %v3265_v59, 0.0  ;;  %v3281_v41 = vmul.f32 0.01, %v3265_v59  ;;  %v2312_v54 = vmul.f32 0.01, %v2296_v16 }
 0x24b   : > { %v3291_v56 = vsel %vm3275_vm13, %v3267_v5, %v3283_v19  ;;  %2326 = vst.msk [vmem:[#allocation2 + $0x121] sm:$0xff] %vm298_vm0, %v2317_v42  ;;  %v3268_v21 = vadd.f32 %v6481_v37, %v8296_v4  ;;  %vm2302_vm1 = vcmp.ge.f32.partialorder %v2294_v49, 0.0  ;;  %v2310_v28 = vmul.f32 0.01, %v2294_v49  ;;  %v8433_v42 = vld [vmem:[#allocation9 + $0x20] sm:$0xff]  }
 0x24c   : > { %3300 = vst.msk [vmem:[#allocation2 + $0xc0] sm:$0xff] %vm298_vm0, %v3291_v56  ;;  %v3289_v35 = vsel %vm3273_vm15, %v3265_v59, %v3281_v41  ;;  %v2320_v34 = vsel %vm2304_vm14, %v2296_v16, %v2312_v54  ;;  %v3266_v8 = vadd.f32 %v8296_v4, %v3229_v29  ;;  %v6394_v36 = vpop.f32.mrb[12].mxu1  ;;  %v7141_v59 = vld [vmem:[#allocation9] sm:$0xff]   ;;  %v7142_v29 = vld [vmem:[#allocation9 + $0x8] sm:$0xff]  }
 0x24d   : > { %3298 = vst.msk [vmem:[#allocation2 + $0xa0] sm:$0xff] %vm298_vm0, %v3289_v35  ;;  %2329 = vst.msk [vmem:[#allocation2 + $0x151] sm:$0xff] %vm298_vm0, %v2320_v34  ;;  %vm3276_vm2 = vcmp.ge.f32.partialorder %v3268_v21, 0.0  ;;  %v3284_v13 = vmul.f32 0.01, %v3268_v21  ;;  %v2318_v14 = vsel %vm2302_vm1, %v2294_v49, %v2310_v28  ;;  %v2299_v38 = vadd.f32 %v6394_v36, %v8296_v4  ;;  %v2270_v17 = vpop.f32.mrb[13].mxu1  ;;  %6588 = vmatprep.subr.bf16.mxu0 %v7141_v59 }
 0x24e   : > { %2327 = vst.msk [vmem:[#allocation2 + $0x131] sm:$0xff] %vm298_vm0, %v2318_v14  ;;  %vm3274_vm3 = vcmp.ge.f32.partialorder %v3266_v8, 0.0  ;;  %v3282_v18 = vmul.f32 0.01, %v3266_v8  ;;  %v6484_v23 = vpop.f32.mrb[12].mxu0  ;;  %v2297_v30 = vadd.f32 %v8296_v4, %v2270_v17  ;;  %v6395_v45 = vpop.f32.mrb[14].mxu1 }
 0x24f   : > { %v3292_v47 = vsel %vm3276_vm2, %v3268_v21, %v3284_v13  ;;  %vm2307_vm4 = vcmp.ge.f32.partialorder %v2299_v38, 0.0  ;;  %v2315_v48 = vmul.f32 0.01, %v2299_v38  ;;  %v3271_v22 = vadd.f32 %v6484_v23, %v8296_v4  ;;  %v3242_v44 = vpop.f32.mrb[13].mxu0  ;;  %v2273_v1 = vpop.f32.mrb[15].mxu1 }
 0x250   : > { %3301 = vst.msk [vmem:[#allocation2 + $0xd0] sm:$0xff] %vm298_vm0, %v3292_v47  ;;  %v3290_v61 = vsel %vm3274_vm3, %v3266_v8, %v3282_v18  ;;  %vm2305_vm5 = vcmp.ge.f32.partialorder %v2297_v30, 0.0  ;;  %v2313_v6 = vmul.f32 0.01, %v2297_v30  ;;  %v3269_v20 = vadd.f32 %v8296_v4, %v3242_v44  ;;  %v6485_v26 = vpop.f32.mrb[14].mxu0 }
 0x251   : > { %3299 = vst.msk [vmem:[#allocation2 + $0xb0] sm:$0xff] %vm298_vm0, %v3290_v61  ;;  %v2323_v27 = vsel %vm2307_vm4, %v2299_v38, %v2315_v48  ;;  %vm3279_vm6 = vcmp.ge.f32.partialorder %v3271_v22, 0.0  ;;  %v3287_v3 = vmul.f32 0.01, %v3271_v22  ;;  %v2300_v58 = vadd.f32 %v6395_v45, %v8296_v4  ;;  %v3245_v43 = vpop.f32.mrb[15].mxu0 }
 0x252   : > { %2332 = vst.msk [vmem:[#allocation2 + $0x181] sm:$0xff] %vm298_vm0, %v2323_v27  ;;  %v2321_v46 = vsel %vm2305_vm5, %v2297_v30, %v2313_v6  ;;  %vm3277_vm7 = vcmp.ge.f32.partialorder %v3269_v20, 0.0  ;;  %v3285_v15 = vmul.f32 0.01, %v3269_v20  ;;  %v3272_v2 = vadd.f32 %v6485_v26, %v8296_v4  ;;  %v4276_v27 = vld [vmem:[#allocation2] sm:$0xff] }
 0x253   : > { %v3295_v39 = vsel %vm3279_vm6, %v3271_v22, %v3287_v3  ;;  %2330 = vst.msk [vmem:[#allocation2 + $0x161] sm:$0xff] %vm298_vm0, %v2321_v46  ;;  %vm2308_vm8 = vcmp.ge.f32.partialorder %v2300_v58, 0.0  ;;  %v2316_v33 = vmul.f32 0.01, %v2300_v58  ;;  %v2298_v9 = vadd.f32 %v8296_v4, %v2273_v1  ;;  %v8404_v63 = vld [vmem:[#allocation2 + $0xc0] sm:$0xff] }
 0x254   : > { %3304 = vst.msk [vmem:[#allocation2 + $0x100] sm:$0xff] %vm298_vm0, %v3295_v39  ;;  %v3293_v10 = vsel %vm3277_vm7, %v3269_v20, %v3285_v15  ;;  %vm3280_vm9 = vcmp.ge.f32.partialorder %v3272_v2, 0.0  ;;  %v3288_v7 = vmul.f32 0.01, %v3272_v2  ;;  %v3270_v31 = vadd.f32 %v8296_v4, %v3245_v43  ;;  %v8397_v50 = vld [vmem:[#allocation2 + $0xa0] sm:$0xff] }
 0x255   : > { %3302 = vst.msk [vmem:[#allocation2 + $0xe0] sm:$0xff] %vm298_vm0, %v3293_v10  ;;  %v2324_v51 = vsel %vm2308_vm8, %v2300_v58, %v2316_v33  ;;  %vm2306_vm10 = vcmp.ge.f32.partialorder %v2298_v9, 0.0  ;;  %v2314_v55 = vmul.f32 0.01, %v2298_v9  ;;  %v4301_v32 = vpack.c.bf16 %v8397_v50, %v4293_v11 }
 0x256   : > { %2333 = vst.msk [vmem:[#allocation2 + $0x191] sm:$0xff] %vm298_vm0, %v2324_v51  ;;  %v3296_v52 = vsel %vm3280_vm9, %v3272_v2, %v3288_v7  ;;  %vm3278_vm11 = vcmp.ge.f32.partialorder %v3270_v31, 0.0  ;;  %v3286_v40 = vmul.f32 0.01, %v3270_v31 }
 0x257   : > { %3305 = vst.msk [vmem:[#allocation2 + $0x110] sm:$0xff] %vm298_vm0, %v3296_v52  ;;  %v2322_v12 = vsel %vm2306_vm10, %v2298_v9, %v2314_v55  ;;  %6580 = vmatprep.mubr.msk.bf16.mxu0 %vm298_vm0, %v4301_v32  ;;  %v8406_v25 = vld [vmem:[#allocation2 + $0xd0] sm:$0xff] }
 0x258   : > { %2331 = vst.msk [vmem:[#allocation2 + $0x171] sm:$0xff] %vm298_vm0, %v2322_v12  ;;  %v3294_v57 = vsel %vm3278_vm11, %v3270_v31, %v3286_v40  ;;  %v8409_v60 = vld [vmem:[#allocation2 + $0xb0] sm:$0xff]  ;;  %v5067_v5 = vpack.c.bf16 %v8406_v25, %v8404_v63 }
 0x259   : > { %3303 = vst.msk [vmem:[#allocation2 + $0xf0] sm:$0xff] %vm298_vm0, %v3294_v57  ;;  %v4302_v62 = vpack.c.bf16 %v8404_v63, %v8409_v60  ;;  %v5066_v16 = vpack.c.bf16 %v8409_v60, %v8397_v50  ;;  %v7144_v40 = vld [vmem:[#allocation9 + $0x28] sm:$0xff]  }
 0x25b   : > { %6581 = vmatmul.mubr.msk.bf16.vlgmr.msra.gmra.mrb[16].mxu0 %vm298_vm0, %v4302_v62  ;;  %v8426_v49 = vld [vmem:[#allocation2 + $0x100] sm:$0xff] }
 0x25c   : > { %v8419_v24 = vld [vmem:[#allocation2 + $0xe0] sm:$0xff]  ;;  %6589 = vmatpush3.bf16.msra.mxu0 %v7141_v59 }
 0x25d   : > { %v4303_v0 = vpack.c.bf16 %v8419_v24, %v8406_v25  ;;  %6590 = vmatprep.subr.bf16.mxu0 %v7142_v29  ;;  %v7145_v62 = vld [vmem:[#allocation9 + $0x30] sm:$0xff]  }
 0x25e   : > { %v5975_v25 = vld [vmem:[#allocation11] ss:$0 sm:$0xff] }
 0x25f   : > { %6584 = vmatprep.mubr.msk.bf16.mxu0 %vm298_vm0, %v4303_v0 }
 0x260   : > { %v8424_v37 = vld [vmem:[#allocation2 + $0xf0] sm:$0xff]  ;;  %6591 = vmatpush3.bf16.msra.mxu0 %v7142_v29 }
 0x261   : > { %v4304_v53 = vpack.c.bf16 %v8426_v49, %v8424_v37  ;;  %v5068_v19 = vpack.c.bf16 %v8424_v37, %v8419_v24  ;;  %6600 = vmatprep.subr.bf16.mxu0 %v8433_v42 }
 0x263   : > { %6585 = vmatmul.mubr.msk.bf16.gmra.mrb[20].mxu0 %vm298_vm0, %v4304_v53  ;;  %v4488_v53 = vld [vmem:[#allocation2 + $0x1] sm:$0xff] }
 0x2d4   : > { %v6570_v41 = vpop.f32.mrb[16].mxu1 }
 0x2d5   : > { %v4237_v54 = vadd.f32 %v6570_v41, %v8296_v4  ;;  %v4196_v56 = vpop.f32.mrb[17].mxu1 }
 0x2d6   : > { %v4235_v21 = vadd.f32 %v8296_v4, %v4196_v56  ;;  %v6571_v28 = vpop.f32.mrb[18].mxu1 }
 0x2d7   : > { %vm4245_vm12 = vcmp.ge.f32.partialorder %v4237_v54, 0.0  ;;  %v4253_v35 = vmul.f32 0.01, %v4237_v54  ;;  %v4238_v34 = vadd.f32 %v6571_v28, %v8296_v4  ;;  %v4199_v8 = vpop.f32.mrb[19].mxu1 }
 0x2d8   : > { %vm4243_vm13 = vcmp.ge.f32.partialorder %v4235_v21, 0.0  ;;  %v4251_v36 = vmul.f32 0.01, %v4235_v21  ;;  %v4236_v13 = vadd.f32 %v8296_v4, %v4199_v8  ;;  %v7146_v8 = vld [vmem:[#allocation9 + $0x38] sm:$0xff]  }
 0x2d9   : > { %v4261_v14 = vsel %vm4245_vm12, %v4237_v54, %v4253_v35  ;;  %vm4246_vm14 = vcmp.ge.f32.partialorder %v4238_v34, 0.0  ;;  %v4254_v38 = vmul.f32 0.01, %v4238_v34 }
 0x2da   : > { %4270 = vst.msk [vmem:[#allocation2 + $0x31] sm:$0xff] %vm298_vm0, %v4261_v14  ;;  %v4259_v17 = vsel %vm4243_vm13, %v4235_v21, %v4251_v36  ;;  %vm4244_vm15 = vcmp.ge.f32.partialorder %v4236_v13, 0.0  ;;  %v4252_v18 = vmul.f32 0.01, %v4236_v13  ;;  %v4603_v14 = vld [vmem:[#allocation2 + $0x130] sm:$0xff] }
 0x2db   : > { %4268 = vst.msk [vmem:[#allocation2 + $0x11] sm:$0xff] %vm298_vm0, %v4259_v17  ;;  %v4262_v23 = vsel %vm4246_vm14, %v4238_v34, %v4254_v38 }
 0x2dc   : > { %4271 = vst.msk [vmem:[#allocation2 + $0x41] sm:$0xff] %vm298_vm0, %v4262_v23  ;;  %v4260_v30 = vsel %vm4244_vm15, %v4236_v13, %v4252_v18  ;;  %v6574_v45 = vpop.f32.mrb[20].mxu1  ;;  %v7147_v13 = vld [vmem:[#allocation9 + $0x40] sm:$0xff]   ;;  %v4602_v18 = vld [vmem:[#allocation2 + $0x120] sm:$0xff] }
 0x2dd   : > { %4269 = vst.msk [vmem:[#allocation2 + $0x21] sm:$0xff] %vm298_vm0, %v4260_v30  ;;  %v4241_v47 = vadd.f32 %v6574_v45, %v8296_v4  ;;  %v4212_v48 = vpop.f32.mrb[21].mxu1  ;;  %v4610_v23 = vpack.c.bf16 %v4603_v14, %v4602_v18  ;;  %v4605_v30 = vld [vmem:[#allocation2 + $0x150] sm:$0xff]  ;;  %v4832_v14 = vld [vmem:[#allocation2 + $0x141] sm:$0xff] }
 0x2de   : > { %v4239_v22 = vadd.f32 %v8296_v4, %v4212_v48  ;;  %v6575_v44 = vpop.f32.mrb[22].mxu1  ;;  %v4607_v45 = vld [vmem:[#allocation2 + $0x170] sm:$0xff]  ;;  %v4834_v18 = vld [vmem:[#allocation2 + $0x161] sm:$0xff] }
 0x2df   : > { %vm4249_vm1 = vcmp.ge.f32.partialorder %v4241_v47, 0.0  ;;  %v4257_v1 = vmul.f32 0.01, %v4241_v47  ;;  %v4242_v61 = vadd.f32 %v6575_v44, %v8296_v4  ;;  %v4215_v6 = vpop.f32.mrb[23].mxu1  ;;  %v7148_v44 = vld [vmem:[#allocation9 + $0x48] sm:$0xff]  }
 0x2e0   : > { %vm4247_vm2 = vcmp.ge.f32.partialorder %v4239_v22, 0.0  ;;  %v4255_v20 = vmul.f32 0.01, %v4239_v22  ;;  %v4240_v26 = vadd.f32 %v8296_v4, %v4215_v6  ;;  %v4609_v6 = vld [vmem:[#allocation2 + $0x190] sm:$0xff] }
 0x2e1   : > { %v4265_v3 = vsel %vm4249_vm1, %v4241_v47, %v4257_v1  ;;  %vm4250_vm3 = vcmp.ge.f32.partialorder %v4242_v61, 0.0  ;;  %v4258_v58 = vmul.f32 0.01, %v4242_v61  ;;  %v8451_v2 = vld [vmem:[#allocation2 + $0x30] sm:$0xff]  ;;  %v4604_v47 = vld [vmem:[#allocation2 + $0x140] sm:$0xff] }
 0x2e2   : > { %4274 = vst.msk [vmem:[#allocation2 + $0x71] sm:$0xff] %vm298_vm0, %v4265_v3  ;;  %v4263_v43 = vsel %vm4247_vm2, %v4239_v22, %v4255_v20  ;;  %vm4248_vm4 = vcmp.ge.f32.partialorder %v4240_v26, 0.0  ;;  %v4256_v46 = vmul.f32 0.01, %v4240_v26  ;;  %v8449_v15 = vld [vmem:[#allocation2 + $0x10] sm:$0xff]  ;;  %v4611_v48 = vpack.c.bf16 %v4605_v30, %v4604_v47  ;;  %v4606_v22 = vld [vmem:[#allocation2 + $0x160] sm:$0xff] }
 0x2e3   : > { %4272 = vst.msk [vmem:[#allocation2 + $0x51] sm:$0xff] %vm298_vm0, %v4263_v43  ;;  %v4266_v11 = vsel %vm4250_vm3, %v4242_v61, %v4258_v58  ;;  %v4284_v39 = vpack.c.bf16 %v8449_v15, %v4276_v27  ;;  %v8455_v33 = vld [vmem:[#allocation2 + $0x40] sm:$0xff]  ;;  %v8457_v4 = vld [vmem:[#allocation2 + $0x31] sm:$0xff]  ;;  %v4612_v1 = vpack.c.bf16 %v4607_v45, %v4606_v22 }
 0x2e4   : > { %v8459_v9 = vld [vmem:[#allocation2 + $0x41] sm:$0xff]  ;;  %4275 = vst.msk [vmem:[#allocation2 + $0x81] sm:$0xff] %vm298_vm0, %v4266_v11  ;;  %v4264_v10 = vsel %vm4248_vm4, %v4240_v26, %v4256_v46  ;;  %v8464_v31 = vld [vmem:[#allocation2 + $0x11] sm:$0xff]  ;;  %v4953_v55 = vpack.c.bf16 %v8455_v33, %v8451_v2 }
 0x2e5   : > { %v8462_v7 = vld [vmem:[#allocation2 + $0x20] sm:$0xff]  ;;  %v5181_v32 = vpack.c.bf16 %v8459_v9, %v8457_v4  ;;  %4273 = vst.msk [vmem:[#allocation2 + $0x61] sm:$0xff] %vm298_vm0, %v4264_v10  ;;  %6592 = vmatprep.mubr.msk.bf16.mxu0 %vm298_vm0, %v4284_v39  ;;  %v4496_v28 = vpack.c.bf16 %v8464_v31, %v4488_v53  ;;  %v4716_v3 = vld [vmem:[#allocation2 + $0x1b0] sm:$0xff] }
 0x2e6   : > { %v8466_v51 = vld [vmem:[#allocation2 + $0x21] sm:$0xff]  ;;  %v4285_v52 = vpack.c.bf16 %v8451_v2, %v8462_v7  ;;  %v4952_v12 = vpack.c.bf16 %v8462_v7, %v8449_v15  ;;  %v4718_v11 = vld [vmem:[#allocation2 + $0x1d0] sm:$0xff] }
 0x2e7   : > { %v5180_v57 = vpack.c.bf16 %v8466_v51, %v8464_v31  ;;  %v4497_v34 = vpack.c.bf16 %v8457_v4, %v8466_v51  ;;  %v7149_v61 = vld [vmem:[#allocation9 + $0x50] sm:$0xff]   ;;  %v4720_v10 = vld [vmem:[#allocation2 + $0x1f0] sm:$0xff] }
 0x2e8   : > { %6593 = vmatmul.mubr.msk.bf16.vlgmr.msra.gmra.mrb[16].mxu0 %vm298_vm0, %v4285_v52  ;;  %v4717_v20 = vld [vmem:[#allocation2 + $0x1c0] sm:$0xff]  ;;  %v4831_v53 = vld [vmem:[#allocation2 + $0x131] sm:$0xff] }
 0x2e9   : > { %6601 = vmatpush3.bf16.msra.mxu0 %v8433_v42  ;;  %v8488_v41 = vld [vmem:[#allocation2 + $0x70] sm:$0xff]  ;;  %v4608_v26 = vld [vmem:[#allocation2 + $0x180] sm:$0xff]  ;;  %v4724_v58 = vpack.c.bf16 %v4717_v20, %v4716_v3 }
 0x2ea   : > { %6602 = vmatprep.subr.bf16.mxu0 %v7144_v40  ;;  %v8482_v0 = vld [vmem:[#allocation2 + $0x50] sm:$0xff]  ;;  %v4613_v27 = vpack.c.bf16 %v4609_v6, %v4608_v26  ;;  %v4719_v43 = vld [vmem:[#allocation2 + $0x1e0] sm:$0xff] }
 0x2eb   : > { %v4286_v59 = vpack.c.bf16 %v8482_v0, %v8455_v33  ;;  %v8495_v56 = vld [vmem:[#allocation2 + $0x51] sm:$0xff]  ;;  %v4721_v46 = vld [vmem:[#allocation2 + $0x200] sm:$0xff]  ;;  %v4725_v39 = vpack.c.bf16 %v4719_v43, %v4718_v11 }
 0x2ec   : > { %v8486_v29 = vld [vmem:[#allocation2 + $0x60] sm:$0xff]  ;;  %v4498_v36 = vpack.c.bf16 %v8495_v56, %v8459_v9  ;;  %v8510_v38 = vld [vmem:[#allocation2 + $0x71] sm:$0xff] }
 0x2ed   : > { %6603 = vmatpush3.bf16.msra.mxu0 %v7144_v40  ;;  %v8490_v54 = vld [vmem:[#allocation2 + $0x61] sm:$0xff]  ;;  %6596 = vmatprep.mubr.msk.bf16.mxu0 %vm298_vm0, %v4286_v59  ;;  %v4287_v42 = vpack.c.bf16 %v8488_v41, %v8486_v29  ;;  %v4954_v21 = vpack.c.bf16 %v8486_v29, %v8482_v0  ;;  %v4726_v40 = vpack.c.bf16 %v4721_v46, %v4720_v10  ;;  %v4837_v47 = vld [vmem:[#allocation2 + $0x191] sm:$0xff] }
 0x2ee   : > { %6612 = vmatprep.subr.bf16.mxu0 %v7145_v62  ;;  %v5182_v35 = vpack.c.bf16 %v8490_v54, %v8495_v56  ;;  %v4499_v17 = vpack.c.bf16 %v8510_v38, %v8490_v54  ;;  %v7150_v52 = vld [vmem:[#allocation9 + $0x58] sm:$0xff]   ;;  %v7153_v45 = vld [vmem:[#allocation9 + $0x70] sm:$0xff]   ;;  %v7156_v2 = vld [vmem:[#allocation9 + $0x88] sm:$0xff]  }
 0x2ef   : > { %v4723_v59 = vld [vmem:[#allocation2 + $0x220] sm:$0xff]  ;;  %v5065_v33 = vld [vmem:[#allocation2 + $0x110] sm:$0xff] }
 0x2f0   : > { %6597 = vmatmul.mubr.msk.bf16.gmra.mrb[20].mxu0 %vm298_vm0, %v4287_v42  ;;  %v4722_v42 = vld [vmem:[#allocation2 + $0x210] sm:$0xff]  ;;  %v5069_v7 = vpack.c.bf16 %v5065_v33, %v8426_v49  ;;  %v5179_v50 = vld [vmem:[#allocation2 + $0x81] sm:$0xff] }
 0x2f1   : > { %6604 = vmatprep.mubr.msk.bf16.mxu0 %vm298_vm0, %v4496_v28  ;;  %v4727_v28 = vpack.c.bf16 %v4723_v59, %v4722_v42  ;;  %v5183_v63 = vpack.c.bf16 %v5179_v50, %v8510_v38 }
 0x2f8   : > { %6605 = vmatmul.mubr.msk.bf16.vlgmr.msra.gmra.mrb[16].mxu0 %vm298_vm0, %v4497_v34  ;;  %v4830_v34 = vld [vmem:[#allocation2 + $0x121] sm:$0xff] }
 0x2f9   : > { %6608 = vmatprep.mubr.msk.bf16.mxu0 %vm298_vm0, %v4498_v36  ;;  %6613 = vmatpush3.bf16.msra.mxu0 %v7145_v62  ;;  %v7151_v62 = vld [vmem:[#allocation9 + $0x60] sm:$0xff]  }
 0x2fa   : > { %6614 = vmatprep.subr.bf16.mxu0 %v7146_v8  ;;  %v4833_v36 = vld [vmem:[#allocation2 + $0x151] sm:$0xff] }
 0x2fd   : > { %6615 = vmatpush3.bf16.msra.mxu0 %v7146_v8  ;;  %v4838_v8 = vpack.c.bf16 %v4831_v53, %v4830_v34 }
 0x2fe   : > { %6624 = vmatprep.subr.bf16.mxu0 %v7147_v13 }
 0x300   : > { %6609 = vmatmul.mubr.msk.bf16.gmra.mrb[20].mxu0 %vm298_vm0, %v4499_v17  ;;  %v4839_v17 = vpack.c.bf16 %v4833_v36, %v4832_v14 }
 0x301   : > { %6616 = vmatprep.mubr.msk.bf16.mxu0 %vm298_vm0, %v4610_v23  ;;  %v7152_v23 = vld [vmem:[#allocation9 + $0x68] sm:$0xff]  }
 0x308   : > { %6617 = vmatmul.mubr.msk.bf16.vlgmr.msra.gmra.mrb[16].mxu0 %vm298_vm0, %v4611_v48  ;;  %v4836_v48 = vld [vmem:[#allocation2 + $0x181] sm:$0xff] }
 0x309   : > { %6620 = vmatprep.mubr.msk.bf16.mxu0 %vm298_vm0, %v4612_v1  ;;  %6625 = vmatpush3.bf16.msra.mxu0 %v7147_v13  ;;  %v4835_v13 = vld [vmem:[#allocation2 + $0x171] sm:$0xff]  ;;  %v4841_v22 = vpack.c.bf16 %v4837_v47, %v4836_v48 }
 0x30a   : > { %6626 = vmatprep.subr.bf16.mxu0 %v7148_v44  ;;  %v4840_v30 = vpack.c.bf16 %v4835_v13, %v4834_v18  ;;  %v7155_v1 = vld [vmem:[#allocation9 + $0x80] sm:$0xff]  }
 0x30d   : > { %6627 = vmatpush3.bf16.msra.mxu0 %v7148_v44  ;;  %v7154_v44 = vld [vmem:[#allocation9 + $0x78] sm:$0xff]  }
 0x30e   : > { %6636 = vmatprep.subr.bf16.mxu0 %v7149_v61 }
 0x310   : > { %6621 = vmatmul.mubr.msk.bf16.gmra.mrb[20].mxu0 %vm298_vm0, %v4613_v27 }
 0x311   : > { %6628 = vmatprep.mubr.msk.bf16.mxu0 %vm298_vm0, %v4724_v58 }
 0x318   : > { %6629 = vmatmul.mubr.msk.bf16.vlgmr.msra.gmra.mrb[16].mxu0 %vm298_vm0, %v4725_v39 }
 0x319   : > { %6632 = vmatprep.mubr.msk.bf16.mxu0 %vm298_vm0, %v4726_v40  ;;  %6637 = vmatpush3.bf16.msra.mxu0 %v7149_v61  ;;  %v4951_v61 = vld [vmem:[#allocation2 + $0x80] sm:$0xff] }
 0x31a   : > { %6638 = vmatprep.subr.bf16.mxu0 %v7150_v52  ;;  %v4955_v15 = vpack.c.bf16 %v4951_v61, %v8488_v41 }
 0x31d   : > { %6639 = vmatpush3.bf16.msra.mxu0 %v7150_v52 }
 0x31e   : > { %6648 = vmatprep.subr.bf16.mxu0 %v7151_v62 }
 0x320   : > { %6633 = vmatmul.mubr.msk.bf16.gmra.mrb[20].mxu0 %vm298_vm0, %v4727_v28 }
 0x321   : > { %6640 = vmatprep.mubr.msk.bf16.mxu0 %vm298_vm0, %v4838_v8 }
 0x328   : > { %6641 = vmatmul.mubr.msk.bf16.vlgmr.msra.gmra.mrb[16].mxu0 %vm298_vm0, %v4839_v17 }
 0x329   : > { %6644 = vmatprep.mubr.msk.bf16.mxu0 %vm298_vm0, %v4840_v30  ;;  %6649 = vmatpush3.bf16.msra.mxu0 %v7151_v62 }
 0x32a   : > { %6650 = vmatprep.subr.bf16.mxu0 %v7152_v23 }
 0x32d   : > { %6651 = vmatpush3.bf16.msra.mxu0 %v7152_v23 }
 0x32e   : > { %6660 = vmatprep.subr.bf16.mxu0 %v7153_v45 }
 0x330   : > { %6645 = vmatmul.mubr.msk.bf16.gmra.mrb[20].mxu0 %vm298_vm0, %v4841_v22 }
 0x331   : > { %6652 = vmatprep.mubr.msk.bf16.mxu0 %vm298_vm0, %v4952_v12 }
 0x338   : > { %6653 = vmatmul.mubr.msk.bf16.vlgmr.msra.gmra.mrb[16].mxu0 %vm298_vm0, %v4953_v55 }
 0x339   : > { %6656 = vmatprep.mubr.msk.bf16.mxu0 %vm298_vm0, %v4954_v21  ;;  %6661 = vmatpush3.bf16.msra.mxu0 %v7153_v45 }
 0x33a   : > { %6662 = vmatprep.subr.bf16.mxu0 %v7154_v44 }
 0x33d   : > { %6663 = vmatpush3.bf16.msra.mxu0 %v7154_v44 }
 0x33e   : > { %6672 = vmatprep.subr.bf16.mxu0 %v7155_v1 }
 0x340   : > { %6657 = vmatmul.mubr.msk.bf16.gmra.mrb[20].mxu0 %vm298_vm0, %v4955_v15 }
 0x341   : > { %6664 = vmatprep.mubr.msk.bf16.mxu0 %vm298_vm0, %v5066_v16 }
 0x348   : > { %6665 = vmatmul.mubr.msk.bf16.vlgmr.msra.gmra.mrb[16].mxu0 %vm298_vm0, %v5067_v5 }
 0x349   : > { %6668 = vmatprep.mubr.msk.bf16.mxu0 %vm298_vm0, %v5068_v19  ;;  %6673 = vmatpush3.bf16.msra.mxu0 %v7155_v1 }
 0x34a   : > { %6674 = vmatprep.subr.bf16.mxu0 %v7156_v2 }
 0x34d   : > { %6675 = vmatpush3.bf16.msra.mxu0 %v7156_v2 }
 0x350   : > { %6669 = vmatmul.mubr.msk.bf16.gmra.mrb[20].mxu0 %vm298_vm0, %v5069_v7 }
 0x351   : > { %6676 = vmatprep.mubr.msk.bf16.mxu0 %vm298_vm0, %v5180_v57 }
 0x358   : > { %6677 = vmatmul.mubr.msk.bf16.vlgmr.msra.gmra.mrb[16].mxu0 %vm298_vm0, %v5181_v32 }
 0x359   : > { %6680 = vmatprep.mubr.msk.bf16.mxu0 %vm298_vm0, %v5182_v35 }
 0x360   : > { %6681 = vmatmul.mubr.msk.bf16.gmra.mrb[20].mxu0 %vm298_vm0, %v5183_v63  ;;  %vm5332_vm0 = vcmask 523264  }
 0x42b   : > { %v6678_v60 = vpop.f32.mrb[16].mxu0 }
 0x42c   : > { %v5247_v5 = vpop.f32.mrb[17].mxu0  ;;  %v5294_v9 = vadd.f32 %v6678_v60, %v5975_v25 }
 0x42d   : > { %v6679_v16 = vpop.f32.mrb[18].mxu0  ;;  %v5292_v24 = vadd.f32 %v5975_v25, %v5247_v5 }
 0x42e   : > { %v5250_v37 = vpop.f32.mrb[19].mxu0  ;;  %v5295_v55 = vadd.f32 %v6679_v16, %v5975_v25 }
 0x42f   : > { %5300 = vxpose.xlu0.b32.start [1/8] (short) (narrow) %v5292_v24, 32  ;;  %v5293_v49 = vadd.f32 %v5975_v25, %v5250_v37 }
 0x433   : > { %5301 = vxpose.xlu0.b32.cont [2/8] (short) (narrow) %v5293_v49, 32  ;;  %v6682_v19 = vpop.f32.mrb[20].mxu0 }
 0x434   : > { %v5263_v4 = vpop.f32.mrb[21].mxu0  ;;  %v5298_v57 = vadd.f32 %v6682_v19, %v5975_v25 }
 0x435   : > { %v6683_v31 = vpop.f32.mrb[22].mxu0  ;;  %v5296_v32 = vadd.f32 %v5975_v25, %v5263_v4 }
 0x436   : > { %v5266_v51 = vpop.f32.mrb[23].mxu0  ;;  %v5299_v0 = vadd.f32 %v6683_v31, %v5975_v25 }
 0x437   : > { %5302 = vxpose.xlu0.b32.cont [3/8] (short) (narrow) %v5294_v9, 32  ;;  %v5297_v12 = vadd.f32 %v5975_v25, %v5266_v51 }
 0x43b   : > { %5303 = vxpose.xlu0.b32.cont [4/8] (short) (narrow) %v5295_v55, 32 }
 0x43f   : > { %5304 = vxpose.xlu0.b32.cont [5/8] (short) (narrow) %v5296_v32, 32 }
 0x443   : > { %5305 = vxpose.xlu0.b32.cont [6/8] (short) (narrow) %v5297_v12, 32 }
 0x447   : > { %5306 = vxpose.xlu0.b32.cont [7/8] (short) (narrow) %v5298_v57, 32 }
 0x44b   : > { %5307 = vxpose.xlu0.b32.end [8/8] (short) (narrow) %v5299_v0, 32 }
 0x4af   : > { %v5316_v29 = vpop.trf.xlu0 }
 0x4b0   : > { %5333 = vst.msk [vmem:[%s296_s26] sm:$0xff] %vm5332_vm0, %v5316_v29 }
 0x4b3   : > { %v5317_v41 = vpop.trf.xlu0 }
 0x4b4   : > { %5334 = vst.msk [vmem:[%s296_s26 + $0x8] sm:$0xff] %vm5332_vm0, %v5317_v41 }
 0x4b7   : > { %v5318_v54 = vpop.trf.xlu0 }
 0x4b8   : > { %5335 = vst.msk [vmem:[%s296_s26 + $0x10] sm:$0xff] %vm5332_vm0, %v5318_v54 }
 0x4bb   : > { %v5319_v56 = vpop.trf.xlu0 }
 0x4bc   : > { %5336 = vst.msk [vmem:[%s296_s26 + $0x18] sm:$0xff] %vm5332_vm0, %v5319_v56 }
 0x4bd   : > { %7312 = shalt.err (!%p7309_p13)
}
 0x4be   : > { %s7313_s6 = scalar_lea.hbm %s8576_s30, 512  ;;  %s7317_s10 = scalar_lea.hbm %s8625_s5, 1024 }
 0x4bf   : > { %p7314_p9 = scmp.ne.s32.totalorder %s8576_s30, %s7313_s6  ;;  %p7318_p6 = scmp.lt.u32.totalorder %s8576_s30, %s8625_s5 }
 0x4c0   : > { %p7319_p4 = scmp.lt.u32.totalorder %s7317_s10, %s7313_s6  ;;  %p7321_p3 = scmp.lt.u32.totalorder %s7313_s6, %s8576_s30 }
 0x4c1   : > { %p7315_p0 = pnand %p7314_p9, %p7577_p10 }
 0x4c2   : > { %p7320_p8 = por %p7319_p4, %p7318_p6 }
 0x4c3   : > { %p7316_p11 = pneg %p7315_p0 }
 0x4c4   : > { %p7322_p5 = por %p7321_p3, %p7320_p8 }
 0x4c6   : > { %p7323_p7 = pnand %p7322_p5, %p7316_p11 }
 0x4c8   : > { %7326 = shalt.err (!%p7323_p7)
}
 0x4c9   : > { %s7386_s12 = smov 128   ;;  %s7387_s8 = smov 8  }
 0x4ca   : > { %7027 = dma.vmem_to_hbm [thread:$0]  (%p7577_p10), %s8571_s9, 512, %s8576_s30, %s5338_s7, %s7386_s12, %s7386_s12, %s7387_s8  }
 0x4cb PF: > { %s5366_s15 = sand.u32 1, %s7361_s18   ;;  %p8652_p12 = scmp.ne.s32.totalorder %s8631_s25, 0 }
 0x4cc   : > { %p8653_p2 = scmp.ge.s32.totalorder %s7373_s21, 2  ;;  %s5367_s11 = scalar_lea.sflag [#allocation5], %s5366_s15 }
 0x4ce   : > { %p7047_p1 = pnand %p8653_p2, %p8652_p12 }
 0x4d0   : > { %7356 = dma.done.wait (!%p7047_p1), %s5367_s11, 512  }
 0x4d1   : > { %7358 = vsyncadd (!%p7047_p1), %s5367_s11, 4294966784  ;;  %p20_p13 = scmp.ge.s32.totalorder %s7567_s14, 4   ;;  %s8654_s18 = smov %s7365_s19 }
 0x4d2   : > { %s8655_s19 = smov %s7369_s20  ;;  %s8656_s20 = smov %s7583_s28 }
 0x4d3   : > { %s8657_s21 = smov %s7567_s14  ;;  %22 = sbr.rel (!%p20_p13) target bundleno = 7 (0x7), region = 129 }
 0x4da   :  { %5372 = vsyncpa [#allocation4], 1 }
 0x4db   :  { %5374 = vsyncpa [#allocation4 + $0x1], 1 }
 0x4dc   :  { %5375 = vsyncpa [#allocation7], 1 }
 0x4dd   :  { %5376 = vsyncpa [#allocation10], 1 }
 0x4de   :  { %5377 = vsyncpa [#allocation5], 1 }
 0x4df   :  { %5379 = vsyncpa [#allocation5 + $0x1], 1 }

</bundles_post_ra>
